<compile_context>
chip_gen: v7x
topology: tpu7x:2x2x1
jax: 0.10.0
libtpu: 0.0.40
codegen_flags: <defaults>
</compile_context>

<pallas_src>
import functools

import jax
import jax.numpy as jnp
import numpy as np
from jax.experimental import pallas as pl
from jax.experimental.pallas import tpu as pltpu


NEG_SLOPE = 0.05


# ----------------------------------------------------------------------------
# Fused Pallas kernel (one invocation per image)
# ----------------------------------------------------------------------------
def _imd_kernel(x_ref, mask_ref,
                c1w_ref, c1b_ref, c2w_ref, c2b_ref,
                c3w_ref, c3b_ref, c4w_ref, c4b_ref,
                w1t_ref, b1_ref, w2_ref, b2_ref,
                c5w_ref, c5b_ref,
                o_ref,
                xpad_ref, patch_ref, cat_ref,
                *, H, W, C, dc, pad):
    HW = H * W
    rc = C - dc

    # Zero the padded flat buffer (halo rows must read as zero).
    xpad_ref[...] = jnp.zeros(xpad_ref.shape, xpad_ref.dtype)

    x_in = x_ref[0]                                    # (HW, C) f32
    xpad_ref[pad:pad + HW, :] = x_in                   # interior (aligned offset)

    def conv3x3(c0, cin, w_ref, b_ref):
        # Build (HW, 9*cin) im2col patches from 9 static shifted slices of the
        # padded flat buffer; one big-K MXU matmul per layer.
        t = 0
        for dy in (-1, 0, 1):
            for dx in (-1, 0, 1):
                off = pad + dy * W + dx
                tap = xpad_ref[off:off + HW, c0:c0 + cin]       # (HW, cin)
                patch_ref[:, t * cin:(t + 1) * cin] = tap * mask_ref[t]
                t += 1
        patches = patch_ref[:, :9 * cin]                        # (HW, 9*cin)
        y = jnp.dot(patches, w_ref[...],
                    preferred_element_type=jnp.float32) + b_ref[...]
        return jnp.where(y >= 0.0, y, NEG_SLOPE * y)            # LeakyReLU(0.05)

    # ---- c1 .. c4 with progressive distillation (all resident in VMEM) ----
    y = conv3x3(0, C, c1w_ref, c1b_ref)                 # (HW, C)
    xpad_ref[pad:pad + HW, :] = y                       # next input = chans [dc:]
    cat_ref[:, 0:dc] = xpad_ref[pad:pad + HW, 0:dc]     # distilled_c1

    y = conv3x3(dc, rc, c2w_ref, c2b_ref)
    xpad_ref[pad:pad + HW, :] = y
    cat_ref[:, dc:2 * dc] = xpad_ref[pad:pad + HW, 0:dc]

    y = conv3x3(dc, rc, c3w_ref, c3b_ref)
    xpad_ref[pad:pad + HW, :] = y
    cat_ref[:, 2 * dc:3 * dc] = xpad_ref[pad:pad + HW, 0:dc]

    y4 = conv3x3(dc, rc, c4w_ref, c4b_ref)              # (HW, dc)
    cat_ref[:, 3 * dc:4 * dc] = y4

    out = cat_ref[...]                                  # (HW, C) concat result

    # ---- channel attention (squeeze / excite), no transposes / tiny dots ----
    mean = jnp.sum(out, axis=0, keepdims=True) * (1.0 / HW)        # (1, C)
    # z1[j] = sum_c mean[c] * W1[c, j]   (W1 passed transposed as (Cr, C))
    z1 = jnp.sum(mean * w1t_ref[...], axis=-1, keepdims=True) + b1_ref[...]
    z1 = jnp.maximum(z1, 0.0)                                      # (Cr, 1)
    # z2[k] = sum_j z1[j] * W2[j, k]
    z2 = jnp.sum(z1 * w2_ref[...], axis=0, keepdims=True) + b2_ref[...]
    gate = 1.0 / (1.0 + jnp.exp(-z2))                              # sigmoid (1, C)
    scaled = out * gate                                            # channel attention

    # ---- 1x1 conv (c5) + residual ----
    res = jnp.dot(scaled, c5w_ref[...],
                  preferred_element_type=jnp.float32) + c5b_ref[...]
    o_ref[0] = res + x_in


# ----------------------------------------------------------------------------
# Wrapper
# ----------------------------------------------------------------------------
def _tap_masks(H, W):
    # (9, HW, 1) f32 validity mask per 3x3 tap (handles the zero-pad halo /
    # width-wraparound of the flattened layout).  Pure constant.
    hh = np.arange(H).repeat(W)
    ww = np.tile(np.arange(W), H)
    ms = []
    for dy in (-1, 0, 1):
        for dx in (-1, 0, 1):
            valid = ((hh + dy >= 0) & (hh + dy < H) &
                     (ww + dx >= 0) & (ww + dx < W))
            ms.append(valid.astype(np.float32))
    return jnp.asarray(np.stack(ms, 0)[:, :, None])


def _full_spec(shape):
    if len(shape) == 2:
        return pl.BlockSpec(shape, lambda n: (0, 0))
    return pl.BlockSpec(shape, lambda n: (0, 0, 0))


def imd_forward(x, p, dc):
    # x: (N, H, W, C) NHWC
    N, H, W, C = x.shape
    HW = H * W
    rc = C - dc
    Cr = p["ca_w1"].shape[1]
    pad = ((W + 1 + 7) // 8) * 8            # sublane-aligned halo offset
    rows = 2 * pad + HW                     # padded flat buffer rows

    x2 = x.reshape(N, HW, C)
    masks = _tap_masks(H, W)

    c1b = p["c1_b"].reshape(1, C)
    c2b = p["c2_b"].reshape(1, C)
    c3b = p["c3_b"].reshape(1, C)
    c4b = p["c4_b"].reshape(1, dc)
    w1t = p["ca_w1"].T                      # (Cr, C)
    b1 = p["ca_b1"].reshape(Cr, 1)
    b2 = p["ca_b2"].reshape(1, C)
    c5b = p["c5_b"].reshape(1, C)

    kernel = functools.partial(_imd_kernel, H=H, W=W, C=C, dc=dc, pad=pad)

    out = pl.pallas_call(
        kernel,
        out_shape=jax.ShapeDtypeStruct((N, HW, C), jnp.float32),
        grid=(N,),
        in_specs=[
            pl.BlockSpec((1, HW, C), lambda n: (n, 0, 0)),   # x
            _full_spec((9, HW, 1)),                          # tap masks
            _full_spec((9 * C, C)),  _full_spec((1, C)),     # c1
            _full_spec((9 * rc, C)), _full_spec((1, C)),     # c2
            _full_spec((9 * rc, C)), _full_spec((1, C)),     # c3
            _full_spec((9 * rc, dc)), _full_spec((1, dc)),   # c4
            _full_spec((Cr, C)),     _full_spec((Cr, 1)),    # CA squeeze
            _full_spec((Cr, C)),     _full_spec((1, C)),     # CA excite
            _full_spec((C, C)),      _full_spec((1, C)),     # c5
        ],
        out_specs=pl.BlockSpec((1, HW, C), lambda n: (n, 0, 0)),
        scratch_shapes=[
            pltpu.VMEM((rows, C), jnp.float32),        # padded flat layer input
            pltpu.VMEM((HW, 9 * C), jnp.float32),      # im2col patches
            pltpu.VMEM((HW, C), jnp.float32),          # concat of distilled chans
        ],
        compiler_params=pltpu.CompilerParams(
            dimension_semantics=("parallel",)),        # batch across TCs on v7x
    )(x2, masks,
      p["c1_w"], c1b, p["c2_w"], c2b, p["c3_w"], c3b, p["c4_w"], c4b,
      w1t, b1, p["ca_w2"], b2, p["c5_w"], c5b)
    return out.reshape(N, H, W, C)


# ----------------------------------------------------------------------------
# Pure-JAX reference for validation
# ----------------------------------------------------------------------------
def _conv3x3_ref(x, w_flat, b, act):
    cout = w_flat.shape[1]
    cin = w_flat.shape[0] // 9
    w = w_flat.reshape(3, 3, cin, cout)  # HWIO
    y = jax.lax.conv_general_dilated(
        x, w, (1, 1), "SAME", dimension_numbers=("NHWC", "HWIO", "NHWC"))
    y = y + b
    if act:
        y = jnp.where(y >= 0, y, NEG_SLOPE * y)
    return y


def imd_forward_ref(x, p, dc):
    o1 = _conv3x3_ref(x, p["c1_w"], p["c1_b"], True)
    d1, r1 = o1[..., :dc], o1[..., dc:]
    o2 = _conv3x3_ref(r1, p["c2_w"], p["c2_b"], True)
    d2, r2 = o2[..., :dc], o2[..., dc:]
    o3 = _conv3x3_ref(r2, p["c3_w"], p["c3_b"], True)
    d3, r3 = o3[..., :dc], o3[..., dc:]
    o4 = _conv3x3_ref(r3, p["c4_w"], p["c4_b"], True)
    out = jnp.concatenate([d1, d2, d3, o4], axis=-1)
    # CALayer
    m = jnp.mean(out, axis=(1, 2))                              # (N, C)
    y1 = jnp.maximum(m @ p["ca_w1"] + p["ca_b1"], 0.0)
    y2 = jax.nn.sigmoid(y1 @ p["ca_w2"] + p["ca_b2"])
    ca_out = out * y2[:, None, None, :]
    # c5 (1x1 conv) + residual
    c5 = jnp.einsum("nhwc,cd->nhwd", ca_out, p["c5_w"]) + p["c5_b"]
    return c5 + x


# ----------------------------------------------------------------------------
# Deterministic parameter init
# ----------------------------------------------------------------------------
def make_params(key, C, dc, rc, reduction=8):
    Cr = C // reduction
    ks = jax.random.split(key, 14)

    def w(i, shape, fan_in):
        return (jax.random.normal(ks[i], shape, jnp.float32)
                / jnp.sqrt(float(fan_in)))

    def b(i, shape):
        return 0.1 * jax.random.normal(ks[i], shape, jnp.float32)

    return {
        "c1_w": w(0, (3, 3, C, C), 9 * C).reshape(9 * C, C),
        "c1_b": b(1, (C,)),
        "c2_w": w(2, (3, 3, rc, C), 9 * rc).reshape(9 * rc, C),
        "c2_b": b(3, (C,)),
        "c3_w": w(4, (3, 3, rc, C), 9 * rc).reshape(9 * rc, C),
        "c3_b": b(5, (C,)),
        "c4_w": w(6, (3, 3, rc, dc), 9 * rc).reshape(9 * rc, dc),
        "c4_b": b(7, (dc,)),
        "c5_w": w(8, (C, C), C),
        "c5_b": b(9, (C,)),
        "ca_w1": w(10, (C, Cr), C),
        "ca_b1": b(11, (Cr,)),
        "ca_w2": w(12, (Cr, C), Cr),
        "ca_b2": b(13, (C,)),
    }


# ----------------------------------------------------------------------------
if __name__ == "__main__":
    N, H, W, C = 2, 8, 8, 16
    dc = int(C * 0.25)          # distilled_channels = 4
    rc = C - dc                 # remaining_channels = 12

    key = jax.random.PRNGKey(0)
    kx, kp = jax.random.split(key)
    x = jax.random.normal(kx, (N, H, W, C), jnp.float32)   # NHWC
    params = make_params(kp, C, dc, rc)

    out = jax.jit(functools.partial(imd_forward, dc=dc))(x, params)
    out = jax.block_until_ready(out)

    ref = imd_forward_ref(x, params, dc)
    assert out.shape == (N, H, W, C)
    assert jnp.allclose(out, ref, rtol=1e-4, atol=1e-4), (
        float(jnp.max(jnp.abs(out - ref))))

    print("KERNEL_OK")
</pallas_src>

<mosaic_0001>
module attributes {stable_mosaic.version = 11 : i64} {
  func.func @_imd_kernel(%arg0: i32, %arg1: memref<1x64x16xf32, #tpu.memory_space<vmem>>, %arg2: memref<9x64x1xf32, #tpu.memory_space<vmem>>, %arg3: memref<144x16xf32, #tpu.memory_space<vmem>>, %arg4: memref<1x16xf32, #tpu.memory_space<vmem>>, %arg5: memref<108x16xf32, #tpu.memory_space<vmem>>, %arg6: memref<1x16xf32, #tpu.memory_space<vmem>>, %arg7: memref<108x16xf32, #tpu.memory_space<vmem>>, %arg8: memref<1x16xf32, #tpu.memory_space<vmem>>, %arg9: memref<108x4xf32, #tpu.memory_space<vmem>>, %arg10: memref<1x4xf32, #tpu.memory_space<vmem>>, %arg11: memref<2x16xf32, #tpu.memory_space<vmem>>, %arg12: memref<2x1xf32, #tpu.memory_space<vmem>>, %arg13: memref<2x16xf32, #tpu.memory_space<vmem>>, %arg14: memref<1x16xf32, #tpu.memory_space<vmem>>, %arg15: memref<16x16xf32, #tpu.memory_space<vmem>>, %arg16: memref<1x16xf32, #tpu.memory_space<vmem>>, %arg17: memref<1x64x16xf32, #tpu.memory_space<vmem>>, %arg18: memref<96x16xf32, #tpu.memory_space<vmem>>, %arg19: memref<64x144xf32, #tpu.memory_space<vmem>>, %arg20: memref<64x16xf32, #tpu.memory_space<vmem>>) attributes {dimension_semantics = [#tpu.dimension_semantics<parallel>], iteration_bounds = array<i64: 2>, scalar_prefetch = 0 : i64, scratch_operands = 3 : i64, tpu.core_type = #tpu.core_type<tc>, window_params = [{transform_indices = @transform_0, window_bounds = array<i64: 1, 64, 16>}, {pipeline_mode = #tpu.pipeline_mode<synchronous>, transform_indices = @transform_1, window_bounds = array<i64: 9, 64, 1>}, {pipeline_mode = #tpu.pipeline_mode<synchronous>, transform_indices = @transform_2, window_bounds = array<i64: 144, 16>}, {pipeline_mode = #tpu.pipeline_mode<synchronous>, transform_indices = @transform_3, window_bounds = array<i64: 1, 16>}, {pipeline_mode = #tpu.pipeline_mode<synchronous>, transform_indices = @transform_4, window_bounds = array<i64: 108, 16>}, {pipeline_mode = #tpu.pipeline_mode<synchronous>, transform_indices = @transform_5, window_bounds = array<i64: 1, 16>}, {pipeline_mode = #tpu.pipeline_mode<synchronous>, transform_indices = @transform_6, window_bounds = array<i64: 108, 16>}, {pipeline_mode = #tpu.pipeline_mode<synchronous>, transform_indices = @transform_7, window_bounds = array<i64: 1, 16>}, {pipeline_mode = #tpu.pipeline_mode<synchronous>, transform_indices = @transform_8, window_bounds = array<i64: 108, 4>}, {pipeline_mode = #tpu.pipeline_mode<synchronous>, transform_indices = @transform_9, window_bounds = array<i64: 1, 4>}, {pipeline_mode = #tpu.pipeline_mode<synchronous>, transform_indices = @transform_10, window_bounds = array<i64: 2, 16>}, {pipeline_mode = #tpu.pipeline_mode<synchronous>, transform_indices = @transform_11, window_bounds = array<i64: 2, 1>}, {pipeline_mode = #tpu.pipeline_mode<synchronous>, transform_indices = @transform_12, window_bounds = array<i64: 2, 16>}, {pipeline_mode = #tpu.pipeline_mode<synchronous>, transform_indices = @transform_13, window_bounds = array<i64: 1, 16>}, {pipeline_mode = #tpu.pipeline_mode<synchronous>, transform_indices = @transform_14, window_bounds = array<i64: 16, 16>}, {pipeline_mode = #tpu.pipeline_mode<synchronous>, transform_indices = @transform_15, window_bounds = array<i64: 1, 16>}, {transform_indices = @transform_16, window_bounds = array<i64: 1, 64, 16>}]} {
    %cst = arith.constant 0.000000e+00 : f32
    %0 = vector.broadcast %cst : f32 to vector<96x16xf32>
    %c0 = arith.constant 0 : index
    %c0_0 = arith.constant 0 : index
    %1 = vector.load %arg18[%c0, %c0_0] : memref<96x16xf32, #tpu.memory_space<vmem>>, vector<96x16xf32>
    tpu.vector_store %arg18[%c0, %c0_0], %0 {strides = array<i32>} : memref<96x16xf32, #tpu.memory_space<vmem>>, vector<96x16xf32>,
    %c0_1 = arith.constant 0 : index
    %c0_2 = arith.constant 0 : index
    %c0_3 = arith.constant 0 : index
    %2 = vector.load %arg1[%c0_1, %c0_2, %c0_3] : memref<1x64x16xf32, #tpu.memory_space<vmem>>, vector<1x64x16xf32>
    %3 = vector.shape_cast %2 : vector<1x64x16xf32> to vector<64x16xf32>
    %c16 = arith.constant 16 : index
    %c0_4 = arith.constant 0 : index
    %4 = vector.load %arg18[%c16, %c0_4] : memref<96x16xf32, #tpu.memory_space<vmem>>, vector<64x16xf32>
    tpu.vector_store %arg18[%c16, %c0_4], %3 {strides = array<i32>} : memref<96x16xf32, #tpu.memory_space<vmem>>, vector<64x16xf32>,
    %c7 = arith.constant 7 : index
    %c0_5 = arith.constant 0 : index
    %5 = vector.load %arg18[%c7, %c0_5] : memref<96x16xf32, #tpu.memory_space<vmem>>, vector<64x16xf32>
    %c0_6 = arith.constant 0 : index
    %c0_7 = arith.constant 0 : index
    %c0_8 = arith.constant 0 : index
    %6 = vector.load %arg2[%c0_6, %c0_7, %c0_8] : memref<9x64x1xf32, #tpu.memory_space<vmem>>, vector<1x64x1xf32>
    %7 = vector.shape_cast %6 : vector<1x64x1xf32> to vector<64x1xf32>
    %8 = vector.broadcast %7 : vector<64x1xf32> to vector<64x16xf32>
    %9 = arith.mulf %5, %8 : vector<64x16xf32>
    %c0_9 = arith.constant 0 : index
    %c0_10 = arith.constant 0 : index
    %10 = vector.load %arg19[%c0_9, %c0_10] : memref<64x144xf32, #tpu.memory_space<vmem>>, vector<64x16xf32>
    tpu.vector_store %arg19[%c0_9, %c0_10], %9 {strides = array<i32>} : memref<64x144xf32, #tpu.memory_space<vmem>>, vector<64x16xf32>,
    %c8 = arith.constant 8 : index
    %c0_11 = arith.constant 0 : index
    %11 = vector.load %arg18[%c8, %c0_11] : memref<96x16xf32, #tpu.memory_space<vmem>>, vector<64x16xf32>
    %c1 = arith.constant 1 : index
    %c0_12 = arith.constant 0 : index
    %c0_13 = arith.constant 0 : index
    %12 = vector.load %arg2[%c1, %c0_12, %c0_13] : memref<9x64x1xf32, #tpu.memory_space<vmem>>, vector<1x64x1xf32>
    %13 = vector.shape_cast %12 : vector<1x64x1xf32> to vector<64x1xf32>
    %14 = vector.broadcast %13 : vector<64x1xf32> to vector<64x16xf32>
    %15 = arith.mulf %11, %14 : vector<64x16xf32>
    %c0_14 = arith.constant 0 : index
    %c16_15 = arith.constant 16 : index
    %16 = vector.load %arg19[%c0_14, %c16_15] : memref<64x144xf32, #tpu.memory_space<vmem>>, vector<64x16xf32>
    tpu.vector_store %arg19[%c0_14, %c16_15], %15 {strides = array<i32>} : memref<64x144xf32, #tpu.memory_space<vmem>>, vector<64x16xf32>,
    %c9 = arith.constant 9 : index
    %c0_16 = arith.constant 0 : index
    %17 = vector.load %arg18[%c9, %c0_16] : memref<96x16xf32, #tpu.memory_space<vmem>>, vector<64x16xf32>
    %c2 = arith.constant 2 : index
    %c0_17 = arith.constant 0 : index
    %c0_18 = arith.constant 0 : index
    %18 = vector.load %arg2[%c2, %c0_17, %c0_18] : memref<9x64x1xf32, #tpu.memory_space<vmem>>, vector<1x64x1xf32>
    %19 = vector.shape_cast %18 : vector<1x64x1xf32> to vector<64x1xf32>
    %20 = vector.broadcast %19 : vector<64x1xf32> to vector<64x16xf32>
    %21 = arith.mulf %17, %20 : vector<64x16xf32>
    %c0_19 = arith.constant 0 : index
    %c32 = arith.constant 32 : index
    %22 = vector.load %arg19[%c0_19, %c32] : memref<64x144xf32, #tpu.memory_space<vmem>>, vector<64x16xf32>
    tpu.vector_store %arg19[%c0_19, %c32], %21 {strides = array<i32>} : memref<64x144xf32, #tpu.memory_space<vmem>>, vector<64x16xf32>,
    %c15 = arith.constant 15 : index
    %c0_20 = arith.constant 0 : index
    %23 = vector.load %arg18[%c15, %c0_20] : memref<96x16xf32, #tpu.memory_space<vmem>>, vector<64x16xf32>
    %c3 = arith.constant 3 : index
    %c0_21 = arith.constant 0 : index
    %c0_22 = arith.constant 0 : index
    %24 = vector.load %arg2[%c3, %c0_21, %c0_22] : memref<9x64x1xf32, #tpu.memory_space<vmem>>, vector<1x64x1xf32>
    %25 = vector.shape_cast %24 : vector<1x64x1xf32> to vector<64x1xf32>
    %26 = vector.broadcast %25 : vector<64x1xf32> to vector<64x16xf32>
    %27 = arith.mulf %23, %26 : vector<64x16xf32>
    %c0_23 = arith.constant 0 : index
    %c48 = arith.constant 48 : index
    %28 = vector.load %arg19[%c0_23, %c48] : memref<64x144xf32, #tpu.memory_space<vmem>>, vector<64x16xf32>
    tpu.vector_store %arg19[%c0_23, %c48], %27 {strides = array<i32>} : memref<64x144xf32, #tpu.memory_space<vmem>>, vector<64x16xf32>,
    %c16_24 = arith.constant 16 : index
    %c0_25 = arith.constant 0 : index
    %29 = vector.load %arg18[%c16_24, %c0_25] : memref<96x16xf32, #tpu.memory_space<vmem>>, vector<64x16xf32>
    %c4 = arith.constant 4 : index
    %c0_26 = arith.constant 0 : index
    %c0_27 = arith.constant 0 : index
    %30 = vector.load %arg2[%c4, %c0_26, %c0_27] : memref<9x64x1xf32, #tpu.memory_space<vmem>>, vector<1x64x1xf32>
    %31 = vector.shape_cast %30 : vector<1x64x1xf32> to vector<64x1xf32>
    %32 = vector.broadcast %31 : vector<64x1xf32> to vector<64x16xf32>
    %33 = arith.mulf %29, %32 : vector<64x16xf32>
    %c0_28 = arith.constant 0 : index
    %c64 = arith.constant 64 : index
    %34 = vector.load %arg19[%c0_28, %c64] : memref<64x144xf32, #tpu.memory_space<vmem>>, vector<64x16xf32>
    tpu.vector_store %arg19[%c0_28, %c64], %33 {strides = array<i32>} : memref<64x144xf32, #tpu.memory_space<vmem>>, vector<64x16xf32>,
    %c17 = arith.constant 17 : index
    %c0_29 = arith.constant 0 : index
    %35 = vector.load %arg18[%c17, %c0_29] : memref<96x16xf32, #tpu.memory_space<vmem>>, vector<64x16xf32>
    %c5 = arith.constant 5 : index
    %c0_30 = arith.constant 0 : index
    %c0_31 = arith.constant 0 : index
    %36 = vector.load %arg2[%c5, %c0_30, %c0_31] : memref<9x64x1xf32, #tpu.memory_space<vmem>>, vector<1x64x1xf32>
    %37 = vector.shape_cast %36 : vector<1x64x1xf32> to vector<64x1xf32>
    %38 = vector.broadcast %37 : vector<64x1xf32> to vector<64x16xf32>
    %39 = arith.mulf %35, %38 : vector<64x16xf32>
    %c0_32 = arith.constant 0 : index
    %c80 = arith.constant 80 : index
    %40 = vector.load %arg19[%c0_32, %c80] : memref<64x144xf32, #tpu.memory_space<vmem>>, vector<64x16xf32>
    tpu.vector_store %arg19[%c0_32, %c80], %39 {strides = array<i32>} : memref<64x144xf32, #tpu.memory_space<vmem>>, vector<64x16xf32>,
    %c23 = arith.constant 23 : index
    %c0_33 = arith.constant 0 : index
    %41 = vector.load %arg18[%c23, %c0_33] : memref<96x16xf32, #tpu.memory_space<vmem>>, vector<64x16xf32>
    %c6 = arith.constant 6 : index
    %c0_34 = arith.constant 0 : index
    %c0_35 = arith.constant 0 : index
    %42 = vector.load %arg2[%c6, %c0_34, %c0_35] : memref<9x64x1xf32, #tpu.memory_space<vmem>>, vector<1x64x1xf32>
    %43 = vector.shape_cast %42 : vector<1x64x1xf32> to vector<64x1xf32>
    %44 = vector.broadcast %43 : vector<64x1xf32> to vector<64x16xf32>
    %45 = arith.mulf %41, %44 : vector<64x16xf32>
    %c0_36 = arith.constant 0 : index
    %c96 = arith.constant 96 : index
    %46 = vector.load %arg19[%c0_36, %c96] : memref<64x144xf32, #tpu.memory_space<vmem>>, vector<64x16xf32>
    tpu.vector_store %arg19[%c0_36, %c96], %45 {strides = array<i32>} : memref<64x144xf32, #tpu.memory_space<vmem>>, vector<64x16xf32>,
    %c24 = arith.constant 24 : index
    %c0_37 = arith.constant 0 : index
    %47 = vector.load %arg18[%c24, %c0_37] : memref<96x16xf32, #tpu.memory_space<vmem>>, vector<64x16xf32>
    %c7_38 = arith.constant 7 : index
    %c0_39 = arith.constant 0 : index
    %c0_40 = arith.constant 0 : index
    %48 = vector.load %arg2[%c7_38, %c0_39, %c0_40] : memref<9x64x1xf32, #tpu.memory_space<vmem>>, vector<1x64x1xf32>
    %49 = vector.shape_cast %48 : vector<1x64x1xf32> to vector<64x1xf32>
    %50 = vector.broadcast %49 : vector<64x1xf32> to vector<64x16xf32>
    %51 = arith.mulf %47, %50 : vector<64x16xf32>
    %c0_41 = arith.constant 0 : index
    %c112 = arith.constant 112 : index
    %52 = vector.load %arg19[%c0_41, %c112] : memref<64x144xf32, #tpu.memory_space<vmem>>, vector<64x16xf32>
    tpu.vector_store %arg19[%c0_41, %c112], %51 {strides = array<i32>} : memref<64x144xf32, #tpu.memory_space<vmem>>, vector<64x16xf32>,
    %c25 = arith.constant 25 : index
    %c0_42 = arith.constant 0 : index
    %53 = vector.load %arg18[%c25, %c0_42] : memref<96x16xf32, #tpu.memory_space<vmem>>, vector<64x16xf32>
    %c8_43 = arith.constant 8 : index
    %c0_44 = arith.constant 0 : index
    %c0_45 = arith.constant 0 : index
    %54 = vector.load %arg2[%c8_43, %c0_44, %c0_45] : memref<9x64x1xf32, #tpu.memory_space<vmem>>, vector<1x64x1xf32>
    %55 = vector.shape_cast %54 : vector<1x64x1xf32> to vector<64x1xf32>
    %56 = vector.broadcast %55 : vector<64x1xf32> to vector<64x16xf32>
    %57 = arith.mulf %53, %56 : vector<64x16xf32>
    %c0_46 = arith.constant 0 : index
    %c128 = arith.constant 128 : index
    %58 = vector.load %arg19[%c0_46, %c128] : memref<64x144xf32, #tpu.memory_space<vmem>>, vector<64x16xf32>
    tpu.vector_store %arg19[%c0_46, %c128], %57 {strides = array<i32>} : memref<64x144xf32, #tpu.memory_space<vmem>>, vector<64x16xf32>,
    %c0_47 = arith.constant 0 : index
    %c0_48 = arith.constant 0 : index
    %59 = vector.load %arg19[%c0_47, %c0_48] : memref<64x144xf32, #tpu.memory_space<vmem>>, vector<64x144xf32>
    %c0_49 = arith.constant 0 : index
    %c0_50 = arith.constant 0 : index
    %60 = vector.load %arg3[%c0_49, %c0_50] : memref<144x16xf32, #tpu.memory_space<vmem>>, vector<144x16xf32>
    %cst_51 = arith.constant dense<0.000000e+00> : vector<64x16xf32>
    %61 = tpu.matmul %59, %60, %cst_51 {dimension_numbers = #tpu.dot_dimension_numbers<[1], [0], [0], [1], [0, 0, 1, 1], [], []>} : vector<64x144xf32>, vector<144x16xf32>, vector<64x16xf32> -> vector<64x16xf32>
    %c0_52 = arith.constant 0 : index
    %c0_53 = arith.constant 0 : index
    %62 = vector.load %arg4[%c0_52, %c0_53] : memref<1x16xf32, #tpu.memory_space<vmem>>, vector<1x16xf32>
    %63 = vector.broadcast %62 : vector<1x16xf32> to vector<64x16xf32>
    %64 = arith.addf %61, %63 : vector<64x16xf32>
    %cst_54 = arith.constant 0.000000e+00 : f32
    %65 = vector.broadcast %cst_54 : f32 to vector<64x16xf32>
    %66 = arith.cmpf oge, %64, %65 : vector<64x16xf32>
    %cst_55 = arith.constant 5.000000e-02 : f32
    %67 = vector.broadcast %cst_55 : f32 to vector<64x16xf32>
    %68 = arith.mulf %67, %64 : vector<64x16xf32>
    %69 = arith.select %66, %64, %68 : vector<64x16xi1>, vector<64x16xf32>
    %c16_56 = arith.constant 16 : index
    %c0_57 = arith.constant 0 : index
    %70 = vector.load %arg18[%c16_56, %c0_57] : memref<96x16xf32, #tpu.memory_space<vmem>>, vector<64x16xf32>
    tpu.vector_store %arg18[%c16_56, %c0_57], %69 {strides = array<i32>} : memref<96x16xf32, #tpu.memory_space<vmem>>, vector<64x16xf32>,
    %c16_58 = arith.constant 16 : index
    %c0_59 = arith.constant 0 : index
    %71 = vector.load %arg18[%c16_58, %c0_59] : memref<96x16xf32, #tpu.memory_space<vmem>>, vector<64x4xf32>
    %c0_60 = arith.constant 0 : index
    %c0_61 = arith.constant 0 : index
    %72 = vector.load %arg20[%c0_60, %c0_61] : memref<64x16xf32, #tpu.memory_space<vmem>>, vector<64x4xf32>
    tpu.vector_store %arg20[%c0_60, %c0_61], %71 {strides = array<i32>} : memref<64x16xf32, #tpu.memory_space<vmem>>, vector<64x4xf32>,
    %c7_62 = arith.constant 7 : index
    %c4_63 = arith.constant 4 : index
    %73 = vector.load %arg18[%c7_62, %c4_63] : memref<96x16xf32, #tpu.memory_space<vmem>>, vector<64x12xf32>
    %c0_64 = arith.constant 0 : index
    %c0_65 = arith.constant 0 : index
    %c0_66 = arith.constant 0 : index
    %74 = vector.load %arg2[%c0_64, %c0_65, %c0_66] : memref<9x64x1xf32, #tpu.memory_space<vmem>>, vector<1x64x1xf32>
    %75 = vector.shape_cast %74 : vector<1x64x1xf32> to vector<64x1xf32>
    %76 = vector.broadcast %75 : vector<64x1xf32> to vector<64x12xf32>
    %77 = arith.mulf %73, %76 : vector<64x12xf32>
    %c0_67 = arith.constant 0 : index
    %c0_68 = arith.constant 0 : index
    %78 = vector.load %arg19[%c0_67, %c0_68] : memref<64x144xf32, #tpu.memory_space<vmem>>, vector<64x12xf32>
    tpu.vector_store %arg19[%c0_67, %c0_68], %77 {strides = array<i32>} : memref<64x144xf32, #tpu.memory_space<vmem>>, vector<64x12xf32>,
    %c8_69 = arith.constant 8 : index
    %c4_70 = arith.constant 4 : index
    %79 = vector.load %arg18[%c8_69, %c4_70] : memref<96x16xf32, #tpu.memory_space<vmem>>, vector<64x12xf32>
    %c1_71 = arith.constant 1 : index
    %c0_72 = arith.constant 0 : index
    %c0_73 = arith.constant 0 : index
    %80 = vector.load %arg2[%c1_71, %c0_72, %c0_73] : memref<9x64x1xf32, #tpu.memory_space<vmem>>, vector<1x64x1xf32>
    %81 = vector.shape_cast %80 : vector<1x64x1xf32> to vector<64x1xf32>
    %82 = vector.broadcast %81 : vector<64x1xf32> to vector<64x12xf32>
    %83 = arith.mulf %79, %82 : vector<64x12xf32>
    %c0_74 = arith.constant 0 : index
    %c12 = arith.constant 12 : index
    %84 = vector.load %arg19[%c0_74, %c12] : memref<64x144xf32, #tpu.memory_space<vmem>>, vector<64x12xf32>
    tpu.vector_store %arg19[%c0_74, %c12], %83 {strides = array<i32>} : memref<64x144xf32, #tpu.memory_space<vmem>>, vector<64x12xf32>,
    %c9_75 = arith.constant 9 : index
    %c4_76 = arith.constant 4 : index
    %85 = vector.load %arg18[%c9_75, %c4_76] : memref<96x16xf32, #tpu.memory_space<vmem>>, vector<64x12xf32>
    %c2_77 = arith.constant 2 : index
    %c0_78 = arith.constant 0 : index
    %c0_79 = arith.constant 0 : index
    %86 = vector.load %arg2[%c2_77, %c0_78, %c0_79] : memref<9x64x1xf32, #tpu.memory_space<vmem>>, vector<1x64x1xf32>
    %87 = vector.shape_cast %86 : vector<1x64x1xf32> to vector<64x1xf32>
    %88 = vector.broadcast %87 : vector<64x1xf32> to vector<64x12xf32>
    %89 = arith.mulf %85, %88 : vector<64x12xf32>
    %c0_80 = arith.constant 0 : index
    %c24_81 = arith.constant 24 : index
    %90 = vector.load %arg19[%c0_80, %c24_81] : memref<64x144xf32, #tpu.memory_space<vmem>>, vector<64x12xf32>
    tpu.vector_store %arg19[%c0_80, %c24_81], %89 {strides = array<i32>} : memref<64x144xf32, #tpu.memory_space<vmem>>, vector<64x12xf32>,
    %c15_82 = arith.constant 15 : index
    %c4_83 = arith.constant 4 : index
    %91 = vector.load %arg18[%c15_82, %c4_83] : memref<96x16xf32, #tpu.memory_space<vmem>>, vector<64x12xf32>
    %c3_84 = arith.constant 3 : index
    %c0_85 = arith.constant 0 : index
    %c0_86 = arith.constant 0 : index
    %92 = vector.load %arg2[%c3_84, %c0_85, %c0_86] : memref<9x64x1xf32, #tpu.memory_space<vmem>>, vector<1x64x1xf32>
    %93 = vector.shape_cast %92 : vector<1x64x1xf32> to vector<64x1xf32>
    %94 = vector.broadcast %93 : vector<64x1xf32> to vector<64x12xf32>
    %95 = arith.mulf %91, %94 : vector<64x12xf32>
    %c0_87 = arith.constant 0 : index
    %c36 = arith.constant 36 : index
    %96 = vector.load %arg19[%c0_87, %c36] : memref<64x144xf32, #tpu.memory_space<vmem>>, vector<64x12xf32>
    tpu.vector_store %arg19[%c0_87, %c36], %95 {strides = array<i32>} : memref<64x144xf32, #tpu.memory_space<vmem>>, vector<64x12xf32>,
    %c16_88 = arith.constant 16 : index
    %c4_89 = arith.constant 4 : index
    %97 = vector.load %arg18[%c16_88, %c4_89] : memref<96x16xf32, #tpu.memory_space<vmem>>, vector<64x12xf32>
    %c4_90 = arith.constant 4 : index
    %c0_91 = arith.constant 0 : index
    %c0_92 = arith.constant 0 : index
    %98 = vector.load %arg2[%c4_90, %c0_91, %c0_92] : memref<9x64x1xf32, #tpu.memory_space<vmem>>, vector<1x64x1xf32>
    %99 = vector.shape_cast %98 : vector<1x64x1xf32> to vector<64x1xf32>
    %100 = vector.broadcast %99 : vector<64x1xf32> to vector<64x12xf32>
    %101 = arith.mulf %97, %100 : vector<64x12xf32>
    %c0_93 = arith.constant 0 : index
    %c48_94 = arith.constant 48 : index
    %102 = vector.load %arg19[%c0_93, %c48_94] : memref<64x144xf32, #tpu.memory_space<vmem>>, vector<64x12xf32>
    tpu.vector_store %arg19[%c0_93, %c48_94], %101 {strides = array<i32>} : memref<64x144xf32, #tpu.memory_space<vmem>>, vector<64x12xf32>,
    %c17_95 = arith.constant 17 : index
    %c4_96 = arith.constant 4 : index
    %103 = vector.load %arg18[%c17_95, %c4_96] : memref<96x16xf32, #tpu.memory_space<vmem>>, vector<64x12xf32>
    %c5_97 = arith.constant 5 : index
    %c0_98 = arith.constant 0 : index
    %c0_99 = arith.constant 0 : index
    %104 = vector.load %arg2[%c5_97, %c0_98, %c0_99] : memref<9x64x1xf32, #tpu.memory_space<vmem>>, vector<1x64x1xf32>
    %105 = vector.shape_cast %104 : vector<1x64x1xf32> to vector<64x1xf32>
    %106 = vector.broadcast %105 : vector<64x1xf32> to vector<64x12xf32>
    %107 = arith.mulf %103, %106 : vector<64x12xf32>
    %c0_100 = arith.constant 0 : index
    %c60 = arith.constant 60 : index
    %108 = vector.load %arg19[%c0_100, %c60] : memref<64x144xf32, #tpu.memory_space<vmem>>, vector<64x12xf32>
    tpu.vector_store %arg19[%c0_100, %c60], %107 {strides = array<i32>} : memref<64x144xf32, #tpu.memory_space<vmem>>, vector<64x12xf32>,
    %c23_101 = arith.constant 23 : index
    %c4_102 = arith.constant 4 : index
    %109 = vector.load %arg18[%c23_101, %c4_102] : memref<96x16xf32, #tpu.memory_space<vmem>>, vector<64x12xf32>
    %c6_103 = arith.constant 6 : index
    %c0_104 = arith.constant 0 : index
    %c0_105 = arith.constant 0 : index
    %110 = vector.load %arg2[%c6_103, %c0_104, %c0_105] : memref<9x64x1xf32, #tpu.memory_space<vmem>>, vector<1x64x1xf32>
    %111 = vector.shape_cast %110 : vector<1x64x1xf32> to vector<64x1xf32>
    %112 = vector.broadcast %111 : vector<64x1xf32> to vector<64x12xf32>
    %113 = arith.mulf %109, %112 : vector<64x12xf32>
    %c0_106 = arith.constant 0 : index
    %c72 = arith.constant 72 : index
    %114 = vector.load %arg19[%c0_106, %c72] : memref<64x144xf32, #tpu.memory_space<vmem>>, vector<64x12xf32>
    tpu.vector_store %arg19[%c0_106, %c72], %113 {strides = array<i32>} : memref<64x144xf32, #tpu.memory_space<vmem>>, vector<64x12xf32>,
    %c24_107 = arith.constant 24 : index
    %c4_108 = arith.constant 4 : index
    %115 = vector.load %arg18[%c24_107, %c4_108] : memref<96x16xf32, #tpu.memory_space<vmem>>, vector<64x12xf32>
    %c7_109 = arith.constant 7 : index
    %c0_110 = arith.constant 0 : index
    %c0_111 = arith.constant 0 : index
    %116 = vector.load %arg2[%c7_109, %c0_110, %c0_111] : memref<9x64x1xf32, #tpu.memory_space<vmem>>, vector<1x64x1xf32>
    %117 = vector.shape_cast %116 : vector<1x64x1xf32> to vector<64x1xf32>
    %118 = vector.broadcast %117 : vector<64x1xf32> to vector<64x12xf32>
    %119 = arith.mulf %115, %118 : vector<64x12xf32>
    %c0_112 = arith.constant 0 : index
    %c84 = arith.constant 84 : index
    %120 = vector.load %arg19[%c0_112, %c84] : memref<64x144xf32, #tpu.memory_space<vmem>>, vector<64x12xf32>
    tpu.vector_store %arg19[%c0_112, %c84], %119 {strides = array<i32>} : memref<64x144xf32, #tpu.memory_space<vmem>>, vector<64x12xf32>,
    %c25_113 = arith.constant 25 : index
    %c4_114 = arith.constant 4 : index
    %121 = vector.load %arg18[%c25_113, %c4_114] : memref<96x16xf32, #tpu.memory_space<vmem>>, vector<64x12xf32>
    %c8_115 = arith.constant 8 : index
    %c0_116 = arith.constant 0 : index
    %c0_117 = arith.constant 0 : index
    %122 = vector.load %arg2[%c8_115, %c0_116, %c0_117] : memref<9x64x1xf32, #tpu.memory_space<vmem>>, vector<1x64x1xf32>
    %123 = vector.shape_cast %122 : vector<1x64x1xf32> to vector<64x1xf32>
    %124 = vector.broadcast %123 : vector<64x1xf32> to vector<64x12xf32>
    %125 = arith.mulf %121, %124 : vector<64x12xf32>
    %c0_118 = arith.constant 0 : index
    %c96_119 = arith.constant 96 : index
    %126 = vector.load %arg19[%c0_118, %c96_119] : memref<64x144xf32, #tpu.memory_space<vmem>>, vector<64x12xf32>
    tpu.vector_store %arg19[%c0_118, %c96_119], %125 {strides = array<i32>} : memref<64x144xf32, #tpu.memory_space<vmem>>, vector<64x12xf32>,
    %c0_120 = arith.constant 0 : index
    %c0_121 = arith.constant 0 : index
    %127 = vector.load %arg19[%c0_120, %c0_121] : memref<64x144xf32, #tpu.memory_space<vmem>>, vector<64x108xf32>
    %c0_122 = arith.constant 0 : index
    %c0_123 = arith.constant 0 : index
    %128 = vector.load %arg5[%c0_122, %c0_123] : memref<108x16xf32, #tpu.memory_space<vmem>>, vector<108x16xf32>
    %cst_124 = arith.constant dense<0.000000e+00> : vector<64x16xf32>
    %129 = tpu.matmul %127, %128, %cst_124 {dimension_numbers = #tpu.dot_dimension_numbers<[1], [0], [0], [1], [0, 0, 1, 1], [], []>} : vector<64x108xf32>, vector<108x16xf32>, vector<64x16xf32> -> vector<64x16xf32>
    %c0_125 = arith.constant 0 : index
    %c0_126 = arith.constant 0 : index
    %130 = vector.load %arg6[%c0_125, %c0_126] : memref<1x16xf32, #tpu.memory_space<vmem>>, vector<1x16xf32>
    %131 = vector.broadcast %130 : vector<1x16xf32> to vector<64x16xf32>
    %132 = arith.addf %129, %131 : vector<64x16xf32>
    %cst_127 = arith.constant 0.000000e+00 : f32
    %133 = vector.broadcast %cst_127 : f32 to vector<64x16xf32>
    %134 = arith.cmpf oge, %132, %133 : vector<64x16xf32>
    %cst_128 = arith.constant 5.000000e-02 : f32
    %135 = vector.broadcast %cst_128 : f32 to vector<64x16xf32>
    %136 = arith.mulf %135, %132 : vector<64x16xf32>
    %137 = arith.select %134, %132, %136 : vector<64x16xi1>, vector<64x16xf32>
    %c16_129 = arith.constant 16 : index
    %c0_130 = arith.constant 0 : index
    %138 = vector.load %arg18[%c16_129, %c0_130] : memref<96x16xf32, #tpu.memory_space<vmem>>, vector<64x16xf32>
    tpu.vector_store %arg18[%c16_129, %c0_130], %137 {strides = array<i32>} : memref<96x16xf32, #tpu.memory_space<vmem>>, vector<64x16xf32>,
    %c16_131 = arith.constant 16 : index
    %c0_132 = arith.constant 0 : index
    %139 = vector.load %arg18[%c16_131, %c0_132] : memref<96x16xf32, #tpu.memory_space<vmem>>, vector<64x4xf32>
    %c0_133 = arith.constant 0 : index
    %c4_134 = arith.constant 4 : index
    %140 = vector.load %arg20[%c0_133, %c4_134] : memref<64x16xf32, #tpu.memory_space<vmem>>, vector<64x4xf32>
    tpu.vector_store %arg20[%c0_133, %c4_134], %139 {strides = array<i32>} : memref<64x16xf32, #tpu.memory_space<vmem>>, vector<64x4xf32>,
    %c7_135 = arith.constant 7 : index
    %c4_136 = arith.constant 4 : index
    %141 = vector.load %arg18[%c7_135, %c4_136] : memref<96x16xf32, #tpu.memory_space<vmem>>, vector<64x12xf32>
    %c0_137 = arith.constant 0 : index
    %c0_138 = arith.constant 0 : index
    %c0_139 = arith.constant 0 : index
    %142 = vector.load %arg2[%c0_137, %c0_138, %c0_139] : memref<9x64x1xf32, #tpu.memory_space<vmem>>, vector<1x64x1xf32>
    %143 = vector.shape_cast %142 : vector<1x64x1xf32> to vector<64x1xf32>
    %144 = vector.broadcast %143 : vector<64x1xf32> to vector<64x12xf32>
    %145 = arith.mulf %141, %144 : vector<64x12xf32>
    %c0_140 = arith.constant 0 : index
    %c0_141 = arith.constant 0 : index
    %146 = vector.load %arg19[%c0_140, %c0_141] : memref<64x144xf32, #tpu.memory_space<vmem>>, vector<64x12xf32>
    tpu.vector_store %arg19[%c0_140, %c0_141], %145 {strides = array<i32>} : memref<64x144xf32, #tpu.memory_space<vmem>>, vector<64x12xf32>,
    %c8_142 = arith.constant 8 : index
    %c4_143 = arith.constant 4 : index
    %147 = vector.load %arg18[%c8_142, %c4_143] : memref<96x16xf32, #tpu.memory_space<vmem>>, vector<64x12xf32>
    %c1_144 = arith.constant 1 : index
    %c0_145 = arith.constant 0 : index
    %c0_146 = arith.constant 0 : index
    %148 = vector.load %arg2[%c1_144, %c0_145, %c0_146] : memref<9x64x1xf32, #tpu.memory_space<vmem>>, vector<1x64x1xf32>
    %149 = vector.shape_cast %148 : vector<1x64x1xf32> to vector<64x1xf32>
    %150 = vector.broadcast %149 : vector<64x1xf32> to vector<64x12xf32>
    %151 = arith.mulf %147, %150 : vector<64x12xf32>
    %c0_147 = arith.constant 0 : index
    %c12_148 = arith.constant 12 : index
    %152 = vector.load %arg19[%c0_147, %c12_148] : memref<64x144xf32, #tpu.memory_space<vmem>>, vector<64x12xf32>
    tpu.vector_store %arg19[%c0_147, %c12_148], %151 {strides = array<i32>} : memref<64x144xf32, #tpu.memory_space<vmem>>, vector<64x12xf32>,
    %c9_149 = arith.constant 9 : index
    %c4_150 = arith.constant 4 : index
    %153 = vector.load %arg18[%c9_149, %c4_150] : memref<96x16xf32, #tpu.memory_space<vmem>>, vector<64x12xf32>
    %c2_151 = arith.constant 2 : index
    %c0_152 = arith.constant 0 : index
    %c0_153 = arith.constant 0 : index
    %154 = vector.load %arg2[%c2_151, %c0_152, %c0_153] : memref<9x64x1xf32, #tpu.memory_space<vmem>>, vector<1x64x1xf32>
    %155 = vector.shape_cast %154 : vector<1x64x1xf32> to vector<64x1xf32>
    %156 = vector.broadcast %155 : vector<64x1xf32> to vector<64x12xf32>
    %157 = arith.mulf %153, %156 : vector<64x12xf32>
    %c0_154 = arith.constant 0 : index
    %c24_155 = arith.constant 24 : index
    %158 = vector.load %arg19[%c0_154, %c24_155] : memref<64x144xf32, #tpu.memory_space<vmem>>, vector<64x12xf32>
    tpu.vector_store %arg19[%c0_154, %c24_155], %157 {strides = array<i32>} : memref<64x144xf32, #tpu.memory_space<vmem>>, vector<64x12xf32>,
    %c15_156 = arith.constant 15 : index
    %c4_157 = arith.constant 4 : index
    %159 = vector.load %arg18[%c15_156, %c4_157] : memref<96x16xf32, #tpu.memory_space<vmem>>, vector<64x12xf32>
    %c3_158 = arith.constant 3 : index
    %c0_159 = arith.constant 0 : index
    %c0_160 = arith.constant 0 : index
    %160 = vector.load %arg2[%c3_158, %c0_159, %c0_160] : memref<9x64x1xf32, #tpu.memory_space<vmem>>, vector<1x64x1xf32>
    %161 = vector.shape_cast %160 : vector<1x64x1xf32> to vector<64x1xf32>
    %162 = vector.broadcast %161 : vector<64x1xf32> to vector<64x12xf32>
    %163 = arith.mulf %159, %162 : vector<64x12xf32>
    %c0_161 = arith.constant 0 : index
    %c36_162 = arith.constant 36 : index
    %164 = vector.load %arg19[%c0_161, %c36_162] : memref<64x144xf32, #tpu.memory_space<vmem>>, vector<64x12xf32>
    tpu.vector_store %arg19[%c0_161, %c36_162], %163 {strides = array<i32>} : memref<64x144xf32, #tpu.memory_space<vmem>>, vector<64x12xf32>,
    %c16_163 = arith.constant 16 : index
    %c4_164 = arith.constant 4 : index
    %165 = vector.load %arg18[%c16_163, %c4_164] : memref<96x16xf32, #tpu.memory_space<vmem>>, vector<64x12xf32>
    %c4_165 = arith.constant 4 : index
    %c0_166 = arith.constant 0 : index
    %c0_167 = arith.constant 0 : index
    %166 = vector.load %arg2[%c4_165, %c0_166, %c0_167] : memref<9x64x1xf32, #tpu.memory_space<vmem>>, vector<1x64x1xf32>
    %167 = vector.shape_cast %166 : vector<1x64x1xf32> to vector<64x1xf32>
    %168 = vector.broadcast %167 : vector<64x1xf32> to vector<64x12xf32>
    %169 = arith.mulf %165, %168 : vector<64x12xf32>
    %c0_168 = arith.constant 0 : index
    %c48_169 = arith.constant 48 : index
    %170 = vector.load %arg19[%c0_168, %c48_169] : memref<64x144xf32, #tpu.memory_space<vmem>>, vector<64x12xf32>
    tpu.vector_store %arg19[%c0_168, %c48_169], %169 {strides = array<i32>} : memref<64x144xf32, #tpu.memory_space<vmem>>, vector<64x12xf32>,
    %c17_170 = arith.constant 17 : index
    %c4_171 = arith.constant 4 : index
    %171 = vector.load %arg18[%c17_170, %c4_171] : memref<96x16xf32, #tpu.memory_space<vmem>>, vector<64x12xf32>
    %c5_172 = arith.constant 5 : index
    %c0_173 = arith.constant 0 : index
    %c0_174 = arith.constant 0 : index
    %172 = vector.load %arg2[%c5_172, %c0_173, %c0_174] : memref<9x64x1xf32, #tpu.memory_space<vmem>>, vector<1x64x1xf32>
    %173 = vector.shape_cast %172 : vector<1x64x1xf32> to vector<64x1xf32>
    %174 = vector.broadcast %173 : vector<64x1xf32> to vector<64x12xf32>
    %175 = arith.mulf %171, %174 : vector<64x12xf32>
    %c0_175 = arith.constant 0 : index
    %c60_176 = arith.constant 60 : index
    %176 = vector.load %arg19[%c0_175, %c60_176] : memref<64x144xf32, #tpu.memory_space<vmem>>, vector<64x12xf32>
    tpu.vector_store %arg19[%c0_175, %c60_176], %175 {strides = array<i32>} : memref<64x144xf32, #tpu.memory_space<vmem>>, vector<64x12xf32>,
    %c23_177 = arith.constant 23 : index
    %c4_178 = arith.constant 4 : index
    %177 = vector.load %arg18[%c23_177, %c4_178] : memref<96x16xf32, #tpu.memory_space<vmem>>, vector<64x12xf32>
    %c6_179 = arith.constant 6 : index
    %c0_180 = arith.constant 0 : index
    %c0_181 = arith.constant 0 : index
    %178 = vector.load %arg2[%c6_179, %c0_180, %c0_181] : memref<9x64x1xf32, #tpu.memory_space<vmem>>, vector<1x64x1xf32>
    %179 = vector.shape_cast %178 : vector<1x64x1xf32> to vector<64x1xf32>
    %180 = vector.broadcast %179 : vector<64x1xf32> to vector<64x12xf32>
    %181 = arith.mulf %177, %180 : vector<64x12xf32>
    %c0_182 = arith.constant 0 : index
    %c72_183 = arith.constant 72 : index
    %182 = vector.load %arg19[%c0_182, %c72_183] : memref<64x144xf32, #tpu.memory_space<vmem>>, vector<64x12xf32>
    tpu.vector_store %arg19[%c0_182, %c72_183], %181 {strides = array<i32>} : memref<64x144xf32, #tpu.memory_space<vmem>>, vector<64x12xf32>,
    %c24_184 = arith.constant 24 : index
    %c4_185 = arith.constant 4 : index
    %183 = vector.load %arg18[%c24_184, %c4_185] : memref<96x16xf32, #tpu.memory_space<vmem>>, vector<64x12xf32>
    %c7_186 = arith.constant 7 : index
    %c0_187 = arith.constant 0 : index
    %c0_188 = arith.constant 0 : index
    %184 = vector.load %arg2[%c7_186, %c0_187, %c0_188] : memref<9x64x1xf32, #tpu.memory_space<vmem>>, vector<1x64x1xf32>
    %185 = vector.shape_cast %184 : vector<1x64x1xf32> to vector<64x1xf32>
    %186 = vector.broadcast %185 : vector<64x1xf32> to vector<64x12xf32>
    %187 = arith.mulf %183, %186 : vector<64x12xf32>
    %c0_189 = arith.constant 0 : index
    %c84_190 = arith.constant 84 : index
    %188 = vector.load %arg19[%c0_189, %c84_190] : memref<64x144xf32, #tpu.memory_space<vmem>>, vector<64x12xf32>
    tpu.vector_store %arg19[%c0_189, %c84_190], %187 {strides = array<i32>} : memref<64x144xf32, #tpu.memory_space<vmem>>, vector<64x12xf32>,
    %c25_191 = arith.constant 25 : index
    %c4_192 = arith.constant 4 : index
    %189 = vector.load %arg18[%c25_191, %c4_192] : memref<96x16xf32, #tpu.memory_space<vmem>>, vector<64x12xf32>
    %c8_193 = arith.constant 8 : index
    %c0_194 = arith.constant 0 : index
    %c0_195 = arith.constant 0 : index
    %190 = vector.load %arg2[%c8_193, %c0_194, %c0_195] : memref<9x64x1xf32, #tpu.memory_space<vmem>>, vector<1x64x1xf32>
    %191 = vector.shape_cast %190 : vector<1x64x1xf32> to vector<64x1xf32>
    %192 = vector.broadcast %191 : vector<64x1xf32> to vector<64x12xf32>
    %193 = arith.mulf %189, %192 : vector<64x12xf32>
    %c0_196 = arith.constant 0 : index
    %c96_197 = arith.constant 96 : index
    %194 = vector.load %arg19[%c0_196, %c96_197] : memref<64x144xf32, #tpu.memory_space<vmem>>, vector<64x12xf32>
    tpu.vector_store %arg19[%c0_196, %c96_197], %193 {strides = array<i32>} : memref<64x144xf32, #tpu.memory_space<vmem>>, vector<64x12xf32>,
    %c0_198 = arith.constant 0 : index
    %c0_199 = arith.constant 0 : index
    %195 = vector.load %arg19[%c0_198, %c0_199] : memref<64x144xf32, #tpu.memory_space<vmem>>, vector<64x108xf32>
    %c0_200 = arith.constant 0 : index
    %c0_201 = arith.constant 0 : index
    %196 = vector.load %arg7[%c0_200, %c0_201] : memref<108x16xf32, #tpu.memory_space<vmem>>, vector<108x16xf32>
    %cst_202 = arith.constant dense<0.000000e+00> : vector<64x16xf32>
    %197 = tpu.matmul %195, %196, %cst_202 {dimension_numbers = #tpu.dot_dimension_numbers<[1], [0], [0], [1], [0, 0, 1, 1], [], []>} : vector<64x108xf32>, vector<108x16xf32>, vector<64x16xf32> -> vector<64x16xf32>
    %c0_203 = arith.constant 0 : index
    %c0_204 = arith.constant 0 : index
    %198 = vector.load %arg8[%c0_203, %c0_204] : memref<1x16xf32, #tpu.memory_space<vmem>>, vector<1x16xf32>
    %199 = vector.broadcast %198 : vector<1x16xf32> to vector<64x16xf32>
    %200 = arith.addf %197, %199 : vector<64x16xf32>
    %cst_205 = arith.constant 0.000000e+00 : f32
    %201 = vector.broadcast %cst_205 : f32 to vector<64x16xf32>
    %202 = arith.cmpf oge, %200, %201 : vector<64x16xf32>
    %cst_206 = arith.constant 5.000000e-02 : f32
    %203 = vector.broadcast %cst_206 : f32 to vector<64x16xf32>
    %204 = arith.mulf %203, %200 : vector<64x16xf32>
    %205 = arith.select %202, %200, %204 : vector<64x16xi1>, vector<64x16xf32>
    %c16_207 = arith.constant 16 : index
    %c0_208 = arith.constant 0 : index
    %206 = vector.load %arg18[%c16_207, %c0_208] : memref<96x16xf32, #tpu.memory_space<vmem>>, vector<64x16xf32>
    tpu.vector_store %arg18[%c16_207, %c0_208], %205 {strides = array<i32>} : memref<96x16xf32, #tpu.memory_space<vmem>>, vector<64x16xf32>,
    %c16_209 = arith.constant 16 : index
    %c0_210 = arith.constant 0 : index
    %207 = vector.load %arg18[%c16_209, %c0_210] : memref<96x16xf32, #tpu.memory_space<vmem>>, vector<64x4xf32>
    %c0_211 = arith.constant 0 : index
    %c8_212 = arith.constant 8 : index
    %208 = vector.load %arg20[%c0_211, %c8_212] : memref<64x16xf32, #tpu.memory_space<vmem>>, vector<64x4xf32>
    tpu.vector_store %arg20[%c0_211, %c8_212], %207 {strides = array<i32>} : memref<64x16xf32, #tpu.memory_space<vmem>>, vector<64x4xf32>,
    %c7_213 = arith.constant 7 : index
    %c4_214 = arith.constant 4 : index
    %209 = vector.load %arg18[%c7_213, %c4_214] : memref<96x16xf32, #tpu.memory_space<vmem>>, vector<64x12xf32>
    %c0_215 = arith.constant 0 : index
    %c0_216 = arith.constant 0 : index
    %c0_217 = arith.constant 0 : index
    %210 = vector.load %arg2[%c0_215, %c0_216, %c0_217] : memref<9x64x1xf32, #tpu.memory_space<vmem>>, vector<1x64x1xf32>
    %211 = vector.shape_cast %210 : vector<1x64x1xf32> to vector<64x1xf32>
    %212 = vector.broadcast %211 : vector<64x1xf32> to vector<64x12xf32>
    %213 = arith.mulf %209, %212 : vector<64x12xf32>
    %c0_218 = arith.constant 0 : index
    %c0_219 = arith.constant 0 : index
    %214 = vector.load %arg19[%c0_218, %c0_219] : memref<64x144xf32, #tpu.memory_space<vmem>>, vector<64x12xf32>
    tpu.vector_store %arg19[%c0_218, %c0_219], %213 {strides = array<i32>} : memref<64x144xf32, #tpu.memory_space<vmem>>, vector<64x12xf32>,
    %c8_220 = arith.constant 8 : index
    %c4_221 = arith.constant 4 : index
    %215 = vector.load %arg18[%c8_220, %c4_221] : memref<96x16xf32, #tpu.memory_space<vmem>>, vector<64x12xf32>
    %c1_222 = arith.constant 1 : index
    %c0_223 = arith.constant 0 : index
    %c0_224 = arith.constant 0 : index
    %216 = vector.load %arg2[%c1_222, %c0_223, %c0_224] : memref<9x64x1xf32, #tpu.memory_space<vmem>>, vector<1x64x1xf32>
    %217 = vector.shape_cast %216 : vector<1x64x1xf32> to vector<64x1xf32>
    %218 = vector.broadcast %217 : vector<64x1xf32> to vector<64x12xf32>
    %219 = arith.mulf %215, %218 : vector<64x12xf32>
    %c0_225 = arith.constant 0 : index
    %c12_226 = arith.constant 12 : index
    %220 = vector.load %arg19[%c0_225, %c12_226] : memref<64x144xf32, #tpu.memory_space<vmem>>, vector<64x12xf32>
    tpu.vector_store %arg19[%c0_225, %c12_226], %219 {strides = array<i32>} : memref<64x144xf32, #tpu.memory_space<vmem>>, vector<64x12xf32>,
    %c9_227 = arith.constant 9 : index
    %c4_228 = arith.constant 4 : index
    %221 = vector.load %arg18[%c9_227, %c4_228] : memref<96x16xf32, #tpu.memory_space<vmem>>, vector<64x12xf32>
    %c2_229 = arith.constant 2 : index
    %c0_230 = arith.constant 0 : index
    %c0_231 = arith.constant 0 : index
    %222 = vector.load %arg2[%c2_229, %c0_230, %c0_231] : memref<9x64x1xf32, #tpu.memory_space<vmem>>, vector<1x64x1xf32>
    %223 = vector.shape_cast %222 : vector<1x64x1xf32> to vector<64x1xf32>
    %224 = vector.broadcast %223 : vector<64x1xf32> to vector<64x12xf32>
    %225 = arith.mulf %221, %224 : vector<64x12xf32>
    %c0_232 = arith.constant 0 : index
    %c24_233 = arith.constant 24 : index
    %226 = vector.load %arg19[%c0_232, %c24_233] : memref<64x144xf32, #tpu.memory_space<vmem>>, vector<64x12xf32>
    tpu.vector_store %arg19[%c0_232, %c24_233], %225 {strides = array<i32>} : memref<64x144xf32, #tpu.memory_space<vmem>>, vector<64x12xf32>,
    %c15_234 = arith.constant 15 : index
    %c4_235 = arith.constant 4 : index
    %227 = vector.load %arg18[%c15_234, %c4_235] : memref<96x16xf32, #tpu.memory_space<vmem>>, vector<64x12xf32>
    %c3_236 = arith.constant 3 : index
    %c0_237 = arith.constant 0 : index
    %c0_238 = arith.constant 0 : index
    %228 = vector.load %arg2[%c3_236, %c0_237, %c0_238] : memref<9x64x1xf32, #tpu.memory_space<vmem>>, vector<1x64x1xf32>
    %229 = vector.shape_cast %228 : vector<1x64x1xf32> to vector<64x1xf32>
    %230 = vector.broadcast %229 : vector<64x1xf32> to vector<64x12xf32>
    %231 = arith.mulf %227, %230 : vector<64x12xf32>
    %c0_239 = arith.constant 0 : index
    %c36_240 = arith.constant 36 : index
    %232 = vector.load %arg19[%c0_239, %c36_240] : memref<64x144xf32, #tpu.memory_space<vmem>>, vector<64x12xf32>
    tpu.vector_store %arg19[%c0_239, %c36_240], %231 {strides = array<i32>} : memref<64x144xf32, #tpu.memory_space<vmem>>, vector<64x12xf32>,
    %c16_241 = arith.constant 16 : index
    %c4_242 = arith.constant 4 : index
    %233 = vector.load %arg18[%c16_241, %c4_242] : memref<96x16xf32, #tpu.memory_space<vmem>>, vector<64x12xf32>
    %c4_243 = arith.constant 4 : index
    %c0_244 = arith.constant 0 : index
    %c0_245 = arith.constant 0 : index
    %234 = vector.load %arg2[%c4_243, %c0_244, %c0_245] : memref<9x64x1xf32, #tpu.memory_space<vmem>>, vector<1x64x1xf32>
    %235 = vector.shape_cast %234 : vector<1x64x1xf32> to vector<64x1xf32>
    %236 = vector.broadcast %235 : vector<64x1xf32> to vector<64x12xf32>
    %237 = arith.mulf %233, %236 : vector<64x12xf32>
    %c0_246 = arith.constant 0 : index
    %c48_247 = arith.constant 48 : index
    %238 = vector.load %arg19[%c0_246, %c48_247] : memref<64x144xf32, #tpu.memory_space<vmem>>, vector<64x12xf32>
    tpu.vector_store %arg19[%c0_246, %c48_247], %237 {strides = array<i32>} : memref<64x144xf32, #tpu.memory_space<vmem>>, vector<64x12xf32>,
    %c17_248 = arith.constant 17 : index
    %c4_249 = arith.constant 4 : index
    %239 = vector.load %arg18[%c17_248, %c4_249] : memref<96x16xf32, #tpu.memory_space<vmem>>, vector<64x12xf32>
    %c5_250 = arith.constant 5 : index
    %c0_251 = arith.constant 0 : index
    %c0_252 = arith.constant 0 : index
    %240 = vector.load %arg2[%c5_250, %c0_251, %c0_252] : memref<9x64x1xf32, #tpu.memory_space<vmem>>, vector<1x64x1xf32>
    %241 = vector.shape_cast %240 : vector<1x64x1xf32> to vector<64x1xf32>
    %242 = vector.broadcast %241 : vector<64x1xf32> to vector<64x12xf32>
    %243 = arith.mulf %239, %242 : vector<64x12xf32>
    %c0_253 = arith.constant 0 : index
    %c60_254 = arith.constant 60 : index
    %244 = vector.load %arg19[%c0_253, %c60_254] : memref<64x144xf32, #tpu.memory_space<vmem>>, vector<64x12xf32>
    tpu.vector_store %arg19[%c0_253, %c60_254], %243 {strides = array<i32>} : memref<64x144xf32, #tpu.memory_space<vmem>>, vector<64x12xf32>,
    %c23_255 = arith.constant 23 : index
    %c4_256 = arith.constant 4 : index
    %245 = vector.load %arg18[%c23_255, %c4_256] : memref<96x16xf32, #tpu.memory_space<vmem>>, vector<64x12xf32>
    %c6_257 = arith.constant 6 : index
    %c0_258 = arith.constant 0 : index
    %c0_259 = arith.constant 0 : index
    %246 = vector.load %arg2[%c6_257, %c0_258, %c0_259] : memref<9x64x1xf32, #tpu.memory_space<vmem>>, vector<1x64x1xf32>
    %247 = vector.shape_cast %246 : vector<1x64x1xf32> to vector<64x1xf32>
    %248 = vector.broadcast %247 : vector<64x1xf32> to vector<64x12xf32>
    %249 = arith.mulf %245, %248 : vector<64x12xf32>
    %c0_260 = arith.constant 0 : index
    %c72_261 = arith.constant 72 : index
    %250 = vector.load %arg19[%c0_260, %c72_261] : memref<64x144xf32, #tpu.memory_space<vmem>>, vector<64x12xf32>
    tpu.vector_store %arg19[%c0_260, %c72_261], %249 {strides = array<i32>} : memref<64x144xf32, #tpu.memory_space<vmem>>, vector<64x12xf32>,
    %c24_262 = arith.constant 24 : index
    %c4_263 = arith.constant 4 : index
    %251 = vector.load %arg18[%c24_262, %c4_263] : memref<96x16xf32, #tpu.memory_space<vmem>>, vector<64x12xf32>
    %c7_264 = arith.constant 7 : index
    %c0_265 = arith.constant 0 : index
    %c0_266 = arith.constant 0 : index
    %252 = vector.load %arg2[%c7_264, %c0_265, %c0_266] : memref<9x64x1xf32, #tpu.memory_space<vmem>>, vector<1x64x1xf32>
    %253 = vector.shape_cast %252 : vector<1x64x1xf32> to vector<64x1xf32>
    %254 = vector.broadcast %253 : vector<64x1xf32> to vector<64x12xf32>
    %255 = arith.mulf %251, %254 : vector<64x12xf32>
    %c0_267 = arith.constant 0 : index
    %c84_268 = arith.constant 84 : index
    %256 = vector.load %arg19[%c0_267, %c84_268] : memref<64x144xf32, #tpu.memory_space<vmem>>, vector<64x12xf32>
    tpu.vector_store %arg19[%c0_267, %c84_268], %255 {strides = array<i32>} : memref<64x144xf32, #tpu.memory_space<vmem>>, vector<64x12xf32>,
    %c25_269 = arith.constant 25 : index
    %c4_270 = arith.constant 4 : index
    %257 = vector.load %arg18[%c25_269, %c4_270] : memref<96x16xf32, #tpu.memory_space<vmem>>, vector<64x12xf32>
    %c8_271 = arith.constant 8 : index
    %c0_272 = arith.constant 0 : index
    %c0_273 = arith.constant 0 : index
    %258 = vector.load %arg2[%c8_271, %c0_272, %c0_273] : memref<9x64x1xf32, #tpu.memory_space<vmem>>, vector<1x64x1xf32>
    %259 = vector.shape_cast %258 : vector<1x64x1xf32> to vector<64x1xf32>
    %260 = vector.broadcast %259 : vector<64x1xf32> to vector<64x12xf32>
    %261 = arith.mulf %257, %260 : vector<64x12xf32>
    %c0_274 = arith.constant 0 : index
    %c96_275 = arith.constant 96 : index
    %262 = vector.load %arg19[%c0_274, %c96_275] : memref<64x144xf32, #tpu.memory_space<vmem>>, vector<64x12xf32>
    tpu.vector_store %arg19[%c0_274, %c96_275], %261 {strides = array<i32>} : memref<64x144xf32, #tpu.memory_space<vmem>>, vector<64x12xf32>,
    %c0_276 = arith.constant 0 : index
    %c0_277 = arith.constant 0 : index
    %263 = vector.load %arg19[%c0_276, %c0_277] : memref<64x144xf32, #tpu.memory_space<vmem>>, vector<64x108xf32>
    %c0_278 = arith.constant 0 : index
    %c0_279 = arith.constant 0 : index
    %264 = vector.load %arg9[%c0_278, %c0_279] : memref<108x4xf32, #tpu.memory_space<vmem>>, vector<108x4xf32>
    %cst_280 = arith.constant dense<0.000000e+00> : vector<64x4xf32>
    %265 = tpu.matmul %263, %264, %cst_280 {dimension_numbers = #tpu.dot_dimension_numbers<[1], [0], [0], [1], [0, 0, 1, 1], [], []>} : vector<64x108xf32>, vector<108x4xf32>, vector<64x4xf32> -> vector<64x4xf32>
    %c0_281 = arith.constant 0 : index
    %c0_282 = arith.constant 0 : index
    %266 = vector.load %arg10[%c0_281, %c0_282] : memref<1x4xf32, #tpu.memory_space<vmem>>, vector<1x4xf32>
    %267 = vector.broadcast %266 : vector<1x4xf32> to vector<64x4xf32>
    %268 = arith.addf %265, %267 : vector<64x4xf32>
    %cst_283 = arith.constant 0.000000e+00 : f32
    %269 = vector.broadcast %cst_283 : f32 to vector<64x4xf32>
    %270 = arith.cmpf oge, %268, %269 : vector<64x4xf32>
    %cst_284 = arith.constant 5.000000e-02 : f32
    %271 = vector.broadcast %cst_284 : f32 to vector<64x4xf32>
    %272 = arith.mulf %271, %268 : vector<64x4xf32>
    %273 = arith.select %270, %268, %272 : vector<64x4xi1>, vector<64x4xf32>
    %c0_285 = arith.constant 0 : index
    %c12_286 = arith.constant 12 : index
    %274 = vector.load %arg20[%c0_285, %c12_286] : memref<64x16xf32, #tpu.memory_space<vmem>>, vector<64x4xf32>
    tpu.vector_store %arg20[%c0_285, %c12_286], %273 {strides = array<i32>} : memref<64x16xf32, #tpu.memory_space<vmem>>, vector<64x4xf32>,
    %c0_287 = arith.constant 0 : index
    %c0_288 = arith.constant 0 : index
    %275 = vector.load %arg20[%c0_287, %c0_288] : memref<64x16xf32, #tpu.memory_space<vmem>>, vector<64x16xf32>
    %cst_289 = arith.constant dense<0.000000e+00> : vector<16xf32>
    %276 = vector.multi_reduction <add>, %275, %cst_289 [0] : vector<64x16xf32> to vector<16xf32>
    %277 = vector.shape_cast %276 : vector<16xf32> to vector<1x16xf32>
    %cst_290 = arith.constant 1.562500e-02 : f32
    %278 = vector.broadcast %cst_290 : f32 to vector<1x16xf32>
    %279 = arith.mulf %277, %278 : vector<1x16xf32>
    %c0_291 = arith.constant 0 : index
    %c0_292 = arith.constant 0 : index
    %280 = vector.load %arg11[%c0_291, %c0_292] : memref<2x16xf32, #tpu.memory_space<vmem>>, vector<2x16xf32>
    %281 = vector.broadcast %279 : vector<1x16xf32> to vector<2x16xf32>
    %282 = arith.mulf %281, %280 : vector<2x16xf32>
    %cst_293 = arith.constant dense<0.000000e+00> : vector<2xf32>
    %283 = vector.multi_reduction <add>, %282, %cst_293 [1] : vector<2x16xf32> to vector<2xf32>
    %284 = vector.shape_cast %283 : vector<2xf32> to vector<2x1xf32>
    %c0_294 = arith.constant 0 : index
    %c0_295 = arith.constant 0 : index
    %285 = vector.load %arg12[%c0_294, %c0_295] : memref<2x1xf32, #tpu.memory_space<vmem>>, vector<2x1xf32>
    %286 = arith.addf %284, %285 : vector<2x1xf32>
    %cst_296 = arith.constant 0.000000e+00 : f32
    %287 = vector.broadcast %cst_296 : f32 to vector<2x1xf32>
    %288 = arith.maximumf %286, %287 : vector<2x1xf32>
    %c0_297 = arith.constant 0 : index
    %c0_298 = arith.constant 0 : index
    %289 = vector.load %arg13[%c0_297, %c0_298] : memref<2x16xf32, #tpu.memory_space<vmem>>, vector<2x16xf32>
    %290 = vector.broadcast %288 : vector<2x1xf32> to vector<2x16xf32>
    %291 = arith.mulf %290, %289 : vector<2x16xf32>
    %cst_299 = arith.constant dense<0.000000e+00> : vector<16xf32>
    %292 = vector.multi_reduction <add>, %291, %cst_299 [0] : vector<2x16xf32> to vector<16xf32>
    %293 = vector.shape_cast %292 : vector<16xf32> to vector<1x16xf32>
    %c0_300 = arith.constant 0 : index
    %c0_301 = arith.constant 0 : index
    %294 = vector.load %arg14[%c0_300, %c0_301] : memref<1x16xf32, #tpu.memory_space<vmem>>, vector<1x16xf32>
    %295 = arith.addf %293, %294 : vector<1x16xf32>
    %cst_302 = arith.constant 0.000000e+00 : f32
    %296 = vector.broadcast %cst_302 : f32 to vector<1x16xf32>
    %297 = arith.subf %296, %295 : vector<1x16xf32>
    %298 = math.exp %297 : vector<1x16xf32>
    %cst_303 = arith.constant 1.000000e+00 : f32
    %299 = vector.broadcast %cst_303 : f32 to vector<1x16xf32>
    %300 = arith.addf %299, %298 : vector<1x16xf32>
    %cst_304 = arith.constant 1.000000e+00 : f32
    %301 = vector.broadcast %cst_304 : f32 to vector<1x16xf32>
    %302 = arith.divf %301, %300 : vector<1x16xf32>
    %303 = vector.broadcast %302 : vector<1x16xf32> to vector<64x16xf32>
    %304 = arith.mulf %275, %303 : vector<64x16xf32>
    %c0_305 = arith.constant 0 : index
    %c0_306 = arith.constant 0 : index
    %305 = vector.load %arg15[%c0_305, %c0_306] : memref<16x16xf32, #tpu.memory_space<vmem>>, vector<16x16xf32>
    %cst_307 = arith.constant dense<0.000000e+00> : vector<64x16xf32>
    %306 = tpu.matmul %304, %305, %cst_307 {dimension_numbers = #tpu.dot_dimension_numbers<[1], [0], [0], [1], [0, 0, 1, 1], [], []>} : vector<64x16xf32>, vector<16x16xf32>, vector<64x16xf32> -> vector<64x16xf32>
    %c0_308 = arith.constant 0 : index
    %c0_309 = arith.constant 0 : index
    %307 = vector.load %arg16[%c0_308, %c0_309] : memref<1x16xf32, #tpu.memory_space<vmem>>, vector<1x16xf32>
    %308 = vector.broadcast %307 : vector<1x16xf32> to vector<64x16xf32>
    %309 = arith.addf %306, %308 : vector<64x16xf32>
    %310 = arith.addf %309, %3 : vector<64x16xf32>
    %c0_310 = arith.constant 0 : index
    %c0_311 = arith.constant 0 : index
    %c0_312 = arith.constant 0 : index
    %311 = vector.load %arg17[%c0_310, %c0_311, %c0_312] : memref<1x64x16xf32, #tpu.memory_space<vmem>>, vector<1x64x16xf32>
    %312 = vector.shape_cast %311 : vector<1x64x16xf32> to vector<64x16xf32>
    %313 = vector.shape_cast %310 : vector<64x16xf32> to vector<1x64x16xf32>
    tpu.vector_store %arg17[%c0_310, %c0_311, %c0_312], %313 {strides = array<i32>} : memref<1x64x16xf32, #tpu.memory_space<vmem>>, vector<1x64x16xf32>,
    return
  }
  func.func @transform_0(%arg0: i32) -> (i32, i32, i32) {
    %c0_i32 = arith.constant 0 : i32
    %c0_i32_0 = arith.constant 0 : i32
    %c0_i32_1 = arith.constant 0 : i32
    return %arg0, %c0_i32, %c0_i32_0 : i32, i32, i32
  }
  func.func @transform_1(%arg0: i32) -> (i32, i32, i32) {
    %c0_i32 = arith.constant 0 : i32
    %c0_i32_0 = arith.constant 0 : i32
    %c0_i32_1 = arith.constant 0 : i32
    %c0_i32_2 = arith.constant 0 : i32
    return %c0_i32, %c0_i32_0, %c0_i32_1 : i32, i32, i32
  }
  func.func @transform_2(%arg0: i32) -> (i32, i32) {
    %c0_i32 = arith.constant 0 : i32
    %c0_i32_0 = arith.constant 0 : i32
    %c0_i32_1 = arith.constant 0 : i32
    return %c0_i32, %c0_i32_0 : i32, i32
  }
  func.func @transform_3(%arg0: i32) -> (i32, i32) {
    %c0_i32 = arith.constant 0 : i32
    %c0_i32_0 = arith.constant 0 : i32
    %c0_i32_1 = arith.constant 0 : i32
    return %c0_i32, %c0_i32_0 : i32, i32
  }
  func.func @transform_4(%arg0: i32) -> (i32, i32) {
    %c0_i32 = arith.constant 0 : i32
    %c0_i32_0 = arith.constant 0 : i32
    %c0_i32_1 = arith.constant 0 : i32
    return %c0_i32, %c0_i32_0 : i32, i32
  }
  func.func @transform_5(%arg0: i32) -> (i32, i32) {
    %c0_i32 = arith.constant 0 : i32
    %c0_i32_0 = arith.constant 0 : i32
    %c0_i32_1 = arith.constant 0 : i32
    return %c0_i32, %c0_i32_0 : i32, i32
  }
  func.func @transform_6(%arg0: i32) -> (i32, i32) {
    %c0_i32 = arith.constant 0 : i32
    %c0_i32_0 = arith.constant 0 : i32
    %c0_i32_1 = arith.constant 0 : i32
    return %c0_i32, %c0_i32_0 : i32, i32
  }
  func.func @transform_7(%arg0: i32) -> (i32, i32) {
    %c0_i32 = arith.constant 0 : i32
    %c0_i32_0 = arith.constant 0 : i32
    %c0_i32_1 = arith.constant 0 : i32
    return %c0_i32, %c0_i32_0 : i32, i32
  }
  func.func @transform_8(%arg0: i32) -> (i32, i32) {
    %c0_i32 = arith.constant 0 : i32
    %c0_i32_0 = arith.constant 0 : i32
    %c0_i32_1 = arith.constant 0 : i32
    return %c0_i32, %c0_i32_0 : i32, i32
  }
  func.func @transform_9(%arg0: i32) -> (i32, i32) {
    %c0_i32 = arith.constant 0 : i32
    %c0_i32_0 = arith.constant 0 : i32
    %c0_i32_1 = arith.constant 0 : i32
    return %c0_i32, %c0_i32_0 : i32, i32
  }
  func.func @transform_10(%arg0: i32) -> (i32, i32) {
    %c0_i32 = arith.constant 0 : i32
    %c0_i32_0 = arith.constant 0 : i32
    %c0_i32_1 = arith.constant 0 : i32
    return %c0_i32, %c0_i32_0 : i32, i32
  }
  func.func @transform_11(%arg0: i32) -> (i32, i32) {
    %c0_i32 = arith.constant 0 : i32
    %c0_i32_0 = arith.constant 0 : i32
    %c0_i32_1 = arith.constant 0 : i32
    return %c0_i32, %c0_i32_0 : i32, i32
  }
  func.func @transform_12(%arg0: i32) -> (i32, i32) {
    %c0_i32 = arith.constant 0 : i32
    %c0_i32_0 = arith.constant 0 : i32
    %c0_i32_1 = arith.constant 0 : i32
    return %c0_i32, %c0_i32_0 : i32, i32
  }
  func.func @transform_13(%arg0: i32) -> (i32, i32) {
    %c0_i32 = arith.constant 0 : i32
    %c0_i32_0 = arith.constant 0 : i32
    %c0_i32_1 = arith.constant 0 : i32
    return %c0_i32, %c0_i32_0 : i32, i32
  }
  func.func @transform_14(%arg0: i32) -> (i32, i32) {
    %c0_i32 = arith.constant 0 : i32
    %c0_i32_0 = arith.constant 0 : i32
    %c0_i32_1 = arith.constant 0 : i32
    return %c0_i32, %c0_i32_0 : i32, i32
  }
  func.func @transform_15(%arg0: i32) -> (i32, i32) {
    %c0_i32 = arith.constant 0 : i32
    %c0_i32_0 = arith.constant 0 : i32
    %c0_i32_1 = arith.constant 0 : i32
    return %c0_i32, %c0_i32_0 : i32, i32
  }
  func.func @transform_16(%arg0: i32) -> (i32, i32, i32) {
    %c0_i32 = arith.constant 0 : i32
    %c0_i32_0 = arith.constant 0 : i32
    %c0_i32_1 = arith.constant 0 : i32
    return %arg0, %c0_i32, %c0_i32_0 : i32, i32, i32
  }
}

</mosaic_0001>

<bundles_post_ra>
// kernel: imd_forward.1
= control target key start
LH: loop header
LB: loop body
LE: loop exit
PB: predicated region body
PF: predicated region fallthrough
CT: control target
= control target key end

     0   :  { %s9376_s0 = inlined_call_operand.hbm [shape: f32[2,64,16], index: 0, kind: input, shape index: {}]   ;;  %s9377_s1 = inlined_call_operand.vmem [shape: f32[9,64,1], index: 1, kind: input, shape index: {}]   ;;  %s9378_s2 = inlined_call_operand.vmem [shape: f32[144,16], index: 2, kind: input, shape index: {}]   ;;  %s9379_s3 = inlined_call_operand.vmem [shape: f32[1,16], index: 3, kind: input, shape index: {}]   ;;  %s9380_s4 = inlined_call_operand.vmem [shape: f32[108,16], index: 4, kind: input, shape index: {}]   ;;  %s9381_s5 = inlined_call_operand.vmem [shape: f32[1,16], index: 5, kind: input, shape index: {}]   ;;  %s9382_s6 = inlined_call_operand.vmem [shape: f32[108,16], index: 6, kind: input, shape index: {}]   ;;  %s9383_s7 = inlined_call_operand.vmem [shape: f32[1,16], index: 7, kind: input, shape index: {}]   ;;  %s9384_s8 = inlined_call_operand.vmem [shape: f32[108,4], index: 8, kind: input, shape index: {}]   ;;  %s9385_s9 = inlined_call_operand.vmem [shape: f32[1,4], index: 9, kind: input, shape index: {}]   ;;  %s9386_s10 = inlined_call_operand.vmem [shape: f32[2,16], index: 10, kind: input, shape index: {}]   ;;  %s9387_s11 = inlined_call_operand.vmem [shape: f32[2,1], index: 11, kind: input, shape index: {}]   ;;  %s9388_s12 = inlined_call_operand.vmem [shape: f32[2,16], index: 12, kind: input, shape index: {}]   ;;  %s9389_s13 = inlined_call_operand.vmem [shape: f32[1,16], index: 13, kind: input, shape index: {}]   ;;  %s9390_s14 = inlined_call_operand.vmem [shape: f32[16,16], index: 14, kind: input, shape index: {}]   ;;  %s9391_s15 = inlined_call_operand.vmem [shape: f32[1,16], index: 15, kind: input, shape index: {}]   ;;  %s9392_s16 = inlined_call_operand.hbm [shape: f32[2,64,16], index: 16, kind: output, shape index: {}]  }
   0x1   :  { %9440 = sst [smem:[#allocation48_spill]] %s9376_s0 }
   0x2   :  { %9441 = sst [smem:[#allocation49_spill]] %s9378_s2 }
   0x3   :  { %9442 = sst [smem:[#allocation50_spill]] %s9379_s3 }
   0x4   :  { %9443 = sst [smem:[#allocation51_spill]] %s9380_s4 }
   0x5   :  { %9444 = sst [smem:[#allocation52_spill]] %s9381_s5 }
   0x6   :  { %9445 = sst [smem:[#allocation53_spill]] %s9382_s6 }
   0x7   :  { %9446 = sst [smem:[#allocation54_spill]] %s9391_s15 }
   0x8   :  { %9447 = sst [smem:[#allocation55_spill]] %s9392_s16 }
   0x9   :  { %21 = vsyncpa [#allocation6], 0 }
   0xa   :  { %23 = vsyncpa [#allocation6 + $0x1], 0 }
   0xb   :  { %24 = vsyncpa [#allocation7], 0 }
   0xc   :  { %26 = vsyncpa [#allocation7 + $0x1], 0  ;;  %s6454_s21 = smov 0   ;;  %s6456_s22 = smov 0  }
   0xd   :  { %s6458_s23 = smov 0   ;;  %s6460_s24 = smov 0  }
   0xe LB: > { %9448 = sst [smem:[#allocation11_spill]] %s6330_s21  ;;  %s6475_s25 = sadd.s32 4294967295, %s6342_s24   ;;  %s6342_s24 = sphi %s6460_s24, %s9577_s24   ;;  %s6338_s23 = sphi %s6458_s23, %s9579_s23   ;;  %s6334_s22 = sphi %s6456_s22, %s9581_s22   ;;  %s6330_s21 = sphi %s6454_s21, %s9580_s21  }
   0xf   : > { %9449 = sst [smem:[#allocation12_spill]] %s6338_s23  ;;  %s5518_s26 = sadd.s32 4294967294, %s6342_s24  }
  0x10   : > { %9450 = sst [smem:[#allocation13_spill]] %s6475_s25  ;;  %s6479_s27 = sadd.s32 1, %s6342_s24  }
  0x11   : > { %9451 = sst [smem:[#allocation14_spill]] %s6479_s27  ;;  %s39_s28 = sadd.s32 1, %s6338_s23 }
  0x12   : > { %s36_s29 = ssub.s32 %s6342_s24, %s6479_s27  ;;  %p46_p0 = scmp.ne.s32.totalorder %s6338_s23, %s6334_s22 }
  0x13   : > { %p37_p1 = scmp.eq.s32.totalorder %s36_s29, 0  ;;  %p47_p2 = scmp.eq.s32.totalorder %s6342_s24, 0 }
  0x14   : > { %p52_p3 = scmp.ne.s32.totalorder %s6334_s22, %s6330_s21  ;;  %p53_p4 = scmp.eq.s32.totalorder %s6475_s25, 0 }
  0x15   : > { %s6491_s30 = scalar_select %p37_p1, %s6338_s23, %s39_s28  }
  0x16   : > { %p6493_p5 = por %p47_p2, %p46_p0  ;;  %p6497_p6 = por %p53_p4, %p52_p3 }
  0x17   : > { %9452 = sst [smem:[#allocation15_spill]] %s6491_s30  ;;  %p391_p7 = scmp.eq.s32.totalorder %s6475_s25, 1 }
  0x18   : > { %p397_p8 = scmp.eq.s32.totalorder %s5518_s26, 1  ;;  %p6183_p10 = scmp.lt.s32.totalorder %s6342_s24, 2 }
  0x19   : > { %p6504_p11 = por %p391_p7, %p46_p0  ;;  %s462_s20 = sand.u32 1, %s6338_s23  }
  0x1a   : > { %p6508_p12 = por %p397_p8, %p52_p3  ;;  %s5836_s28 = sshll.u32 %s6342_s24, 10 }
  0x1b   : > { %s9455_s18 = scalar_select %p6504_p11, 1, 0 }
  0x1c   : > { %s9457_s19 = scalar_select %p6508_p12, 1, 0 }
  0x1d   : > { %9456 = sst [smem:[#allocation16_spill]] %s9455_s18  ;;  %s5521_s29 = sshll.u32 %s462_s20, 6 }
  0x1e   : > { %s9458_s21 = sld [smem:[#allocation48_spill]]  ;;  %s466_s26 = scalar_lea.vmem [#allocation5], %s5521_s29 }
  0x1f   : > { %s473_s25 = sshll.u32 %s466_s26, 4  ;;  %p6521_p13 = pnand %p6183_p10, %p6493_p5  ;;  %s6525_s25 = int_to_ptr.vmem [resolvable:$true] %s473_s25 }
  0x20   : > { %s6527_s23 = scalar_lea.sflag [#allocation6], %s462_s20 }
  0x21   : > { %p6248_p1 = pneg %p6521_p13 }
  0x24   : > { %s9459_s16 = smov %s9458_s21  ;;  %s6517_s15 = scalar_lea.hbm %s9458_s21, %s5836_s28 }
  0x25   : > { %s6246_s27 = scalar_lea.hbm %s6517_s15, 1024  ;;  %s6251_s0 = scalar_lea.hbm %s9459_s16, 2048 }
  0x26   : > { %p6247_p0 = scmp.ne.s32.totalorder %s6517_s15, %s6246_s27  ;;  %p6252_p4 = scmp.lt.u32.totalorder %s6517_s15, %s9459_s16 }
  0x27   : > { %p6253_p5 = scmp.lt.u32.totalorder %s6251_s0, %s6246_s27  ;;  %p6255_p8 = scmp.lt.u32.totalorder %s6246_s27, %s6517_s15 }
  0x28   : > { %p6249_p2 = pnand %p6248_p1, %p6247_p0 }
  0x29   : > { %p6254_p7 = por %p6253_p5, %p6252_p4 }
  0x2a   : > { %p6250_p3 = pneg %p6249_p2 }
  0x2b   : > { %p6256_p10 = por %p6255_p8, %p6254_p7 }
  0x2d   : > { %p6257_p9 = pnand %p6256_p10, %p6250_p3 }
  0x2f   : > { %6260 = shalt.err (!%p6257_p9)
}
  0x30   : > { %s6261_s20 = scalar_lea.vmem %s6525_s25, 1024  ;;  %s6344_s26 = smov [#allocation5]  }
  0x31   : > { %p6262_p0 = scmp.ne.s32.totalorder %s6525_s25, %s6261_s20  ;;  %s6266_s21 = sshll.u32 %s6344_s26, 4  ;;  %s6267_s21 = int_to_ptr.vmem [resolvable:$false] %s6266_s21 }
  0x32   : > { %s6268_s30 = scalar_lea.vmem %s6267_s21, 2048  ;;  %p6269_p11 = scmp.lt.s32.totalorder %s6525_s25, %s6267_s21 }
  0x33   : > { %p6264_p2 = pnand %p6262_p0, %p6248_p1  ;;  %p6270_p4 = scmp.lt.s32.totalorder %s6268_s30, %s6261_s20 }
  0x35   : > { %p6265_p12 = pneg %p6264_p2  ;;  %p6271_p5 = por %p6270_p4, %p6269_p11 }
  0x37   : > { %p6272_p7 = pnand %p6271_p5, %p6265_p12 }
  0x39   : > { %6275 = shalt.err (!%p6272_p7)
}
  0x3a   : > { %s6345_s27 = smov 128   ;;  %s6346_s0 = smov 8  }
  0x3b   : > { %6178 = dma.hbm_to_vmem [thread:$0]  (!%p6521_p13), %s6517_s15, 1024, %s6525_s25, %s6527_s23, %s6345_s27, %s6345_s27, %s6346_s0  }
  0x3c   : > { %p5524_p9 = scmp.ge.s32.totalorder %s6342_s24, 1  ;;  %p481_p1 = scmp.lt.s32.totalorder %s6342_s24, 3 }
  0x3e   : > { %p482_p3 = pnand %p5524_p9, %p481_p1 }
  0x40   : > { %485 = sbr.rel (%p482_p3) target bundleno = 2635 (0xa4b), region = 84 }
  0x47   : > { %s6558_s28 = sand.u32 1, %s6334_s22  }
  0x48   : > { %s9403_s29 = sshll.u32 %s6558_s28, 6  ;;  %s488_s20 = scalar_lea.sflag [#allocation6], %s6558_s28 }
  0x49   : > { %s6564_s26 = scalar_lea.vmem [#allocation5], %s9403_s29 }
  0x4a   : > { %6321 = dma.done.wait (%p6497_p6), %s488_s20, 1024  }
  0x4b   : > { %6323 = vsyncadd (%p6497_p6), %s488_s20, 4294966272  ;;  %vm540_vm0 = vcmask 130048   ;;  %v6347_v0 = vmov 0   ;;  %v6348_v1 = vmov 0.0   ;;  %v6585_v2 = vld [vmem:[%s9377_s1 + $0xc0] sm:$0xff]  ;;  %v6609_v7 = vld [vmem:[%s9377_s1 + $0x48] sm:$0xff] }
  0x4c   : > { %6241 = vset.pattern.permute.xlu1 %v6347_v0  ;;  %6240 = vset.pattern.permute.xlu0 %v6347_v0  ;;  %542 = vst.msk [vmem:[#allocation2 + $0x8] sm:$0xff] %vm540_vm0, %v6348_v1  ;;  %543 = vst.msk [vmem:[#allocation2 + $0x10] sm:$0xff] %vm540_vm0, %v6348_v1  ;;  %v6590_v3 = vld [vmem:[%s9377_s1 + $0x40] sm:$0xff]  ;;  %v6618_v9 = vld [vmem:[%s9377_s1 + $0x88] sm:$0xff]  ;;  %s9469_s2 = sld [smem:[#allocation49_spill]]  ;;  %s6351_s0 = smov 64  }
  0x4d   : > { %541 = vst.msk [vmem:[#allocation2] sm:$0xff] %vm540_vm0, %v6348_v1  ;;  %544 = vst.msk [vmem:[#allocation2 + $0x18] sm:$0xff] %vm540_vm0, %v6348_v1  ;;  %872 = vperm.xlu1 %6241, %v6585_v2   ;;  %660 = vperm.xlu0 %6240, %v6590_v3   ;;  %v5551_v4 = vld [vmem:[%s9377_s1 + $0x100] sm:$0xff]  ;;  %v6627_v11 = vld [vmem:[%s9377_s1 + $0xc8] sm:$0xff]  ;;  %s9417_s20 = smov 32   ;;  %s9419_s18 = smov 80  }
  0x4e   : > { %545 = vst.msk [vmem:[#allocation2 + $0x20] sm:$0xff] %vm540_vm0, %v6348_v1  ;;  %546 = vst.msk [vmem:[#allocation2 + $0x28] sm:$0xff] %vm540_vm0, %v6348_v1  ;;  %v6600_v5 = vld [vmem:[%s9377_s1 + $0x80] sm:$0xff]  ;;  %v5529_v12 = vld [vmem:[%s9377_s1 + $0x50] sm:$0xff]  ;;  %s6354_s21 = smov 48   ;;  %s6355_s29 = smov 96  }
  0x4f   : > { %547 = vst.msk [vmem:[#allocation2 + $0x30] sm:$0xff] %vm540_vm0, %v6348_v1  ;;  %548 = vst.msk [vmem:[#allocation2 + $0x38] sm:$0xff] %vm540_vm0, %v6348_v1  ;;  %v5559_v6 = vld [vmem:[%s9377_s1 + $0x140] sm:$0xff]  ;;  %v5552_v13 = vld [vmem:[%s9377_s1 + $0x108] sm:$0xff]  ;;  %s9404_s15 = smov 112   ;;  %s9470_s25 = smov 112  }
  0x50   : > { %549 = vst.msk [vmem:[#allocation2 + $0x40] sm:$0xff] %vm540_vm0, %v6348_v1  ;;  %550 = vst.msk [vmem:[#allocation2 + $0x48] sm:$0xff] %vm540_vm0, %v6348_v1  ;;  %v5567_v8 = vld [vmem:[%s9377_s1 + $0x180] sm:$0xff]  ;;  %v6640_v15 = vld [vmem:[%s6564_s26 + $0x8] sm:$0xff]  ;;  %vm738_vm1 = vcmask 261248   ;;  %vm844_vm2 = vcmask 392448  }
  0x51   : > { %551 = vst.msk [vmem:[#allocation2 + $0x50] sm:$0xff] %vm540_vm0, %v6348_v1  ;;  %552 = vst.msk [vmem:[#allocation2 + $0x58] sm:$0xff] %vm540_vm0, %v6348_v1  ;;  %978 = vperm.xlu1 %6241, %v5551_v4   ;;  %766 = vperm.xlu0 %6240, %v6600_v5   ;;  %v5575_v10 = vld [vmem:[%s9377_s1 + $0x1c0] sm:$0xff]  ;;  %v5537_v16 = vld [vmem:[%s9377_s1 + $0x90] sm:$0xff]  ;;  %vm950_vm3 = vcmask 523648   ;;  %vm1056_vm4 = vcmask 654848  }
  0x52   : > { %v6637_v14 = vld [vmem:[%s6564_s26] sm:$0xff]  ;;  %9462 = vst [vmem:[#allocation18_spill] sm:$0xff] %v6640_v15  ;;  %v5560_v17 = vld [vmem:[%s9377_s1 + $0x148] sm:$0xff]  ;;  %562 = vst.msk [vmem:[#allocation2 + $0x18] sm:$0xff] %vm540_vm0, %v6640_v15  ;;  %vm1162_vm5 = vcmask 786048   ;;  %vm1268_vm6 = vcmask 917248  }
  0x53   : > { %9461 = vst [vmem:[#allocation17_spill] sm:$0xff] %v6637_v14  ;;  %561 = vst.msk [vmem:[#allocation2 + $0x10] sm:$0xff] %vm540_vm0, %v6637_v14  ;;  %v6653_v18 = vld [vmem:[%s6564_s26 + $0x10] sm:$0xff]  ;;  %v5568_v20 = vld [vmem:[%s9377_s1 + $0x188] sm:$0xff]  ;;  %vm1374_vm7 = vcmask 1048448   ;;  %s9428_s23 = smov 8  }
  0x54   : > { %9463 = vst [vmem:[#allocation19_spill] sm:$0xff] %v6653_v18  ;;  %563 = vst.msk [vmem:[#allocation2 + $0x20] sm:$0xff] %vm540_vm0, %v6653_v18  ;;  %v5545_v19 = vld [vmem:[%s9377_s1 + $0xd0] sm:$0xff]  ;;  %v6664_v21 = vld [vmem:[%s6564_s26 + $0x18] sm:$0xff]  ;;  %s9471_s3 = sld [smem:[#allocation50_spill]]  ;;  %vm1666_vm9 = vcmask 31744  }
  0x55   : > { %1084 = vperm.xlu1 %6241, %v5559_v6   ;;  %665 = vperm.xlu0 %6240, %v6609_v7   ;;  %9464 = vst [vmem:[#allocation20_spill] sm:$0xff] %v6664_v21  ;;  %564 = vst.msk [vmem:[#allocation2 + $0x28] sm:$0xff] %vm540_vm0, %v6664_v21  ;;  %v5553_v22 = vld [vmem:[%s9377_s1 + $0x110] sm:$0xff]  ;;  %v5576_v23 = vld [vmem:[%s9377_s1 + $0x1c8] sm:$0xff]  ;;  %vm1771_vm11 = vcmask 97280   ;;  %vm1876_vm13 = vcmask 195680  }
  0x56   : > { %v5561_v24 = vld [vmem:[%s9377_s1 + $0x150] sm:$0xff]  ;;  %v5530_v25 = vld [vmem:[%s9377_s1 + $0x58] sm:$0xff]  ;;  %v6693_v30 = vld [vmem:[%s6564_s26 + $0x20] sm:$0xff]  ;;  %s9472_s4 = sld [smem:[#allocation51_spill]]  ;;  %s9413_s17 = smov 56   ;;  %vm2674_vm15 = vcmask 1043456  }
  0x57   : > { %v5569_v26 = vld [vmem:[%s9377_s1 + $0x190] sm:$0xff]  ;;  %v5538_v27 = vld [vmem:[%s9377_s1 + $0x98] sm:$0xff]  ;;  %9465 = vst [vmem:[#allocation21_spill] sm:$0xff] %v6693_v30  ;;  %565 = vst.msk [vmem:[#allocation2 + $0x30] sm:$0xff] %vm540_vm0, %v6693_v30  ;;  %s9415_s27 = smov 68   ;;  %s9484_s5 = sld [smem:[#allocation52_spill]] }
  0x58   : > { %v5577_v28 = vld [vmem:[%s9377_s1 + $0x1d0] sm:$0xff]  ;;  %v5546_v29 = vld [vmem:[%s9377_s1 + $0xd8] sm:$0xff]  ;;  %v5531_v31 = vld [vmem:[%s9377_s1 + $0x60] sm:$0xff]  ;;  %s9498_s6 = sld [smem:[#allocation53_spill]] }
  0x59   : > { %1190 = vperm.xlu1 %6241, %v5567_v8   ;;  %771 = vperm.xlu0 %6240, %v6618_v9   ;;  %v5554_v32 = vld [vmem:[%s9377_s1 + $0x118] sm:$0xff]  ;;  %v5539_v33 = vld [vmem:[%s9377_s1 + $0xa0] sm:$0xff]  ;;  %v6716_v37 = vld [vmem:[%s6564_s26 + $0x28] sm:$0xff] }
  0x5a   : > { %v5562_v34 = vld [vmem:[%s9377_s1 + $0x158] sm:$0xff]  ;;  %v5547_v35 = vld [vmem:[%s9377_s1 + $0xe0] sm:$0xff]  ;;  %9466 = vst [vmem:[#allocation22_spill] sm:$0xff] %v6716_v37  ;;  %566 = vst.msk [vmem:[#allocation2 + $0x38] sm:$0xff] %vm540_vm0, %v6716_v37 }
  0x5b   : > { %v5570_v36 = vld [vmem:[%s9377_s1 + $0x198] sm:$0xff]  ;;  %v5555_v38 = vld [vmem:[%s9377_s1 + $0x120] sm:$0xff]  ;;  %v5532_v41 = vld [vmem:[%s9377_s1 + $0x68] sm:$0xff] }
  0x5c   : > { %v5578_v39 = vld [vmem:[%s9377_s1 + $0x1d8] sm:$0xff]  ;;  %v5563_v40 = vld [vmem:[%s9377_s1 + $0x160] sm:$0xff]  ;;  %v5540_v43 = vld [vmem:[%s9377_s1 + $0xa8] sm:$0xff] }
  0x5d   : > { %1296 = vperm.xlu1 %6241, %v5575_v10   ;;  %877 = vperm.xlu0 %6240, %v6627_v11   ;;  %v5571_v42 = vld [vmem:[%s9377_s1 + $0x1a0] sm:$0xff]  ;;  %v5548_v45 = vld [vmem:[%s9377_s1 + $0xe8] sm:$0xff]  ;;  %v6745_v46 = vld [vmem:[%s6564_s26 + $0x30] sm:$0xff] }
  0x5e   : > { %v5579_v44 = vld [vmem:[%s9377_s1 + $0x1e0] sm:$0xff]  ;;  %9467 = vst [vmem:[#allocation23_spill] sm:$0xff] %v6745_v46  ;;  %567 = vst.msk [vmem:[#allocation2 + $0x40] sm:$0xff] %vm540_vm0, %v6745_v46  ;;  %v5533_v47 = vld [vmem:[%s9377_s1 + $0x70] sm:$0xff] }
  0x5f   : > { %v5556_v48 = vld [vmem:[%s9377_s1 + $0x128] sm:$0xff]  ;;  %v5541_v49 = vld [vmem:[%s9377_s1 + $0xb0] sm:$0xff]  ;;  %v6768_v53 = vld [vmem:[%s6564_s26 + $0x38] sm:$0xff]  ;;  %s6350_s26 = smov 16  }
  0x60   : > { %v5564_v50 = vld [vmem:[%s9377_s1 + $0x168] sm:$0xff]  ;;  %v5549_v51 = vld [vmem:[%s9377_s1 + $0xf0] sm:$0xff]  ;;  %9468 = vst [vmem:[#allocation24_spill] sm:$0xff] %v6768_v53  ;;  %568 = vst.msk [vmem:[#allocation2 + $0x48] sm:$0xff] %vm540_vm0, %v6768_v53 }
  0x61   : > { %670 = vperm.xlu1 %6241, %v5529_v12   ;;  %983 = vperm.xlu0 %6240, %v5552_v13   ;;  %v5572_v52 = vld [vmem:[%s9377_s1 + $0x1a8] sm:$0xff]  ;;  %v5557_v54 = vld [vmem:[%s9377_s1 + $0x130] sm:$0xff]  ;;  %v5534_v57 = vld [vmem:[%s9377_s1 + $0x78] sm:$0xff] }
  0x62   : > { %v5580_v55 = vld [vmem:[%s9377_s1 + $0x1e8] sm:$0xff]  ;;  %v5565_v56 = vld [vmem:[%s9377_s1 + $0x170] sm:$0xff]  ;;  %v5542_v59 = vld [vmem:[%s9377_s1 + $0xb8] sm:$0xff] }
  0x63   : > { %v5573_v58 = vld [vmem:[%s9377_s1 + $0x1b0] sm:$0xff]  ;;  %v5550_v61 = vld [vmem:[%s9377_s1 + $0xf8] sm:$0xff]  ;;  %v6811_v4 = vld [vmem:[%s9377_s1 + $0x8] sm:$0xff] }
  0x64   : > { %v5581_v60 = vld [vmem:[%s9377_s1 + $0x1f0] sm:$0xff]  ;;  %v5566_v62 = vld [vmem:[%s9377_s1 + $0x178] sm:$0xff]  ;;  %v6816_v6 = vld [vmem:[%s9377_s1] sm:$0xff] }
  0x65   : > { %776 = vperm.xlu1 %6241, %v5537_v16   ;;  %1089 = vperm.xlu0 %6240, %v5560_v17   ;;  %v5558_v63 = vld [vmem:[%s9377_s1 + $0x138] sm:$0xff]  ;;  %v6823_v8 = vld [vmem:[%s9377_s1 + $0x10] sm:$0xff]  ;;  %v6828_v10 = vld [vmem:[%s9377_s1 + $0x200] sm:$0xff] }
  0x66   : > { %v5582_v0 = vld [vmem:[%s9377_s1 + $0x1f8] sm:$0xff]  ;;  %v5584_v12 = vld [vmem:[%s9377_s1 + $0x208] sm:$0xff]  ;;  %v5585_v13 = vld [vmem:[%s9377_s1 + $0x210] sm:$0xff] }
  0x67   : > { %v5574_v1 = vld [vmem:[%s9377_s1 + $0x1b8] sm:$0xff]  ;;  %v1472_v16 = vld [vmem:[%s9469_s2] sm:$0xff]  ;;  %v1473_v17 = vld [vmem:[%s9469_s2 + $0x8] sm:$0xff] }
  0x69   : > { %882 = vperm.xlu1 %6241, %v5545_v19   ;;  %1195 = vperm.xlu0 %6240, %v5568_v20   ;;  %v6847_v19 = vld [vmem:[%s9377_s1 + $0x18] sm:$0xff]  ;;  %v6051_v20 = vpack.c.bf16 %v1473_v17, %v1472_v16  ;;  %v1484_v16 = vld [vmem:[%s9469_s2 + $0x60] sm:$0xff]  ;;  %v1485_v17 = vld [vmem:[%s9469_s2 + $0x68] sm:$0xff] }
  0x6d   : > { %988 = vperm.xlu1 %6241, %v5553_v22   ;;  %1301 = vperm.xlu0 %6240, %v5576_v23   ;;  %v6349_v22 = vmov 0.0|0.0   ;;  %v641_v23 = vld [vmem:[#allocation2 + $0x8] sm:$0xff] }
  0x6e   : > { %6050 = vmatprep.subr.bf16.mxu0 %v6349_v22 }
  0x6f   : > { %6052 = vmatpush1.bf16.msra.mxu0 %v6051_v20  ;;  %v6069_v20 = vpack.c.bf16 %v1485_v17, %v1484_v16  ;;  %v5587_v17 = vld [vmem:[%s9377_s1 + $0x220] sm:$0xff] }
  0x70   : > { %6053 = vmatprep.subr.bf16.mxu0 %v6349_v22 }
  0x71   : > { %1094 = vperm.xlu1 %6241, %v5561_v24   ;;  %675 = vperm.xlu0 %6240, %v5530_v25   ;;  %v1474_v24 = vld [vmem:[%s9469_s2 + $0x10] sm:$0xff]  ;;  %v1475_v25 = vld [vmem:[%s9469_s2 + $0x18] sm:$0xff] }
  0x75   : > { %1200 = vperm.xlu1 %6241, %v5569_v26   ;;  %781 = vperm.xlu0 %6240, %v5538_v27   ;;  %v6054_v26 = vpack.c.bf16 %v1475_v25, %v1474_v24 }
  0x77   : > { %6055 = vmatpush1.bf16.msra.mxu0 %v6054_v26 }
  0x78   : > { %6056 = vmatprep.subr.bf16.mxu0 %v6349_v22 }
  0x79   : > { %1306 = vperm.xlu1 %6241, %v5577_v28   ;;  %887 = vperm.xlu0 %6240, %v5546_v29  }
  0x7d   : > { %680 = vperm.xlu1 %6241, %v5531_v31   ;;  %993 = vperm.xlu0 %6240, %v5554_v32   ;;  %v959_v31 = vld [vmem:[#allocation2 + $0x10] sm:$0xff] }
  0x7e   : > { %v747_v32 = vld [vmem:[#allocation2 + $0x9] sm:$0xff] }
  0x81   : > { %786 = vperm.xlu1 %6241, %v5539_v33   ;;  %1099 = vperm.xlu0 %6240, %v5562_v34   ;;  %v1476_v33 = vld [vmem:[%s9469_s2 + $0x20] sm:$0xff]  ;;  %v1477_v34 = vld [vmem:[%s9469_s2 + $0x28] sm:$0xff] }
  0x85   : > { %892 = vperm.xlu1 %6241, %v5547_v35   ;;  %1205 = vperm.xlu0 %6240, %v5570_v36   ;;  %v6057_v35 = vpack.c.bf16 %v1477_v34, %v1476_v33 }
  0x87   : > { %6058 = vmatpush1.bf16.msra.mxu0 %v6057_v35  ;;  %v6923_v35 = vld [vmem:[#allocation2 + $0x19] sm:$0xff] }
  0x88   : > { %6059 = vmatprep.subr.bf16.mxu0 %v6349_v22 }
  0x89   : > { %998 = vperm.xlu1 %6241, %v5555_v38   ;;  %1311 = vperm.xlu0 %6240, %v5578_v39   ;;  %v6866_v39 = vld [vmem:[#allocation2 + $0xf] sm:$0xff] }
  0x8d   : > { %1104 = vperm.xlu1 %6241, %v5563_v40   ;;  %685 = vperm.xlu0 %6240, %v5532_v41  }
  0x91   : > { %1210 = vperm.xlu1 %6241, %v5571_v42   ;;  %791 = vperm.xlu0 %6240, %v5540_v43   ;;  %v1065_v42 = vld [vmem:[#allocation2 + $0x11] sm:$0xff] }
  0x92   : > { %v1478_v43 = vld [vmem:[%s9469_s2 + $0x30] sm:$0xff] }
  0x95   : > { %1316 = vperm.xlu1 %6241, %v5579_v44   ;;  %897 = vperm.xlu0 %6240, %v5548_v45   ;;  %v1479_v44 = vld [vmem:[%s9469_s2 + $0x38] sm:$0xff] }
  0x96   : > { %v6060_v45 = vpack.c.bf16 %v1479_v44, %v1478_v43  ;;  %v6937_v43 = vld [vmem:[%s9377_s1 + $0x218] sm:$0xff] }
  0x97   : > { %v6940_v44 = vld [vmem:[#allocation2 + $0x1f] sm:$0xff] }
  0x98   : > { %6061 = vmatpush1.bf16.msra.mxu0 %v6060_v45 }
  0x99   : > { %690 = vperm.xlu1 %6241, %v5533_v47   ;;  %1003 = vperm.xlu0 %6240, %v5556_v48  }
  0x9a   : > { %6062 = vmatprep.subr.bf16.mxu0 %v6349_v22 }
  0x9d   : > { %796 = vperm.xlu1 %6241, %v5541_v49   ;;  %1109 = vperm.xlu0 %6240, %v5564_v50  }
  0xa1   : > { %902 = vperm.xlu1 %6241, %v5549_v51   ;;  %1215 = vperm.xlu0 %6240, %v5572_v52   ;;  %v1480_v51 = vld [vmem:[%s9469_s2 + $0x40] sm:$0xff]  ;;  %v1481_v52 = vld [vmem:[%s9469_s2 + $0x48] sm:$0xff] }
  0xa5   : > { %1008 = vperm.xlu1 %6241, %v5557_v54   ;;  %1321 = vperm.xlu0 %6240, %v5580_v55   ;;  %v6063_v54 = vpack.c.bf16 %v1481_v52, %v1480_v51  ;;  %v6951_v52 = vld [vmem:[%s9377_s1 + $0x28] sm:$0xff] }
  0xa7   : > { %6064 = vmatpush1.bf16.msra.mxu0 %v6063_v54 }
  0xa8   : > { %6065 = vmatprep.subr.bf16.mxu0 %v6349_v22 }
  0xa9   : > { %1114 = vperm.xlu1 %6241, %v5565_v56   ;;  %695 = vperm.xlu0 %6240, %v5534_v57  }
  0xad   : > { %1220 = vperm.xlu1 %6241, %v5573_v58   ;;  %801 = vperm.xlu0 %6240, %v5542_v59   ;;  %v6887_v59 = vld [vmem:[#allocation2 + $0x17] sm:$0xff] }
  0xb1   : > { %1326 = vperm.xlu1 %6241, %v5581_v60   ;;  %907 = vperm.xlu0 %6240, %v5550_v61   ;;  %v1482_v60 = vld [vmem:[%s9469_s2 + $0x50] sm:$0xff]  ;;  %v1483_v61 = vld [vmem:[%s9469_s2 + $0x58] sm:$0xff] }
  0xb5   : > { %1119 = vperm.xlu1 %6241, %v5566_v62   ;;  %1013 = vperm.xlu0 %6240, %v5558_v63   ;;  %v6066_v62 = vpack.c.bf16 %v1483_v61, %v1482_v60  ;;  %v6956_v61 = vld [vmem:[#allocation2 + $0x21] sm:$0xff] }
  0xb7   : > { %6067 = vmatpush1.bf16.msra.mxu0 %v6066_v62 }
  0xb8   : > { %6068 = vmatprep.subr.bf16.mxu0 %v6349_v22 }
  0xb9   : > { %1331 = vperm.xlu1 %6241, %v5582_v0   ;;  %1225 = vperm.xlu0 %6240, %v5574_v1   ;;  %v6901_v1 = vld [vmem:[%s9377_s1 + $0x20] sm:$0xff] }
  0xbb   : > { %6070 = vmatpush1.bf16.msra.mxu0 %v6069_v20 }
  0xbc   : > { %6071 = vmatprep.subr.bf16.mxu0 %v6349_v22 }
  0xbd   : > { %592 = vperm.xlu1 %6241, %v6811_v4   ;;  %587 = vperm.xlu0 %6240, %v6816_v6  }
  0xc1   : > { %597 = vperm.xlu1 %6241, %v6823_v8   ;;  %1402 = vperm.xlu0 %6240, %v6828_v10  }
  0xc5   : > { %1407 = vperm.xlu1 %6241, %v5584_v12   ;;  %1412 = vperm.xlu0 %6240, %v5585_v13   ;;  %v1277_v13 = vld [vmem:[#allocation2 + $0x18] sm:$0xff] }
  0xc9   : > { %602 = vperm.xlu1 %6241, %v6847_v19  }
  0xcc   : > { %v873_v27 = vpop.permute.xlu1 %872  ;;  %v661_v28 = vpop.permute.xlu0 %660 }
  0xcd   : > { %v698_v29 = vmul.f32 %v661_v28, %v641_v23  ;;  %v910_v49 = vmul.f32 %v873_v27, %v6866_v39  ;;  %v1486_v27 = vld [vmem:[%s9469_s2 + $0x70] sm:$0xff]  ;;  %v1487_v28 = vld [vmem:[%s9469_s2 + $0x78] sm:$0xff] }
  0xcf   : > { %714 = vrot.lane.b32.xlu0 %v698_v29, %s6350_s26  ;;  %v6072_v29 = vpack.c.bf16 %v1487_v28, %v1486_v27  ;;  %v1279_v28 = vld [vmem:[#allocation2 + $0x28] sm:$0xff] }
  0xd0   : > { %v979_v36 = vpop.permute.xlu1 %978  ;;  %v767_v38 = vpop.permute.xlu0 %766 }
  0xd1   : > { %v1016_v40 = vmul.f32 %v979_v36, %v959_v31  ;;  %v804_v41 = vmul.f32 %v767_v38, %v747_v32  ;;  %6073 = vmatpush1.bf16.msra.mxu0 %v6072_v29  ;;  %v1488_v36 = vld [vmem:[%s9469_s2 + $0x80] sm:$0xff]  ;;  %v1489_v38 = vld [vmem:[%s9469_s2 + $0x88] sm:$0xff]  ;;  %s9502_s2 = smov 124  }
  0xd2   : > { %6074 = vmatprep.subr.bf16.mxu0 %v6349_v22 }
  0xd3   : > { %1032 = vrot.lane.b32.xlu1 %v1016_v40, %s6351_s0  ;;  %820 = vrot.lane.b32.xlu0 %v804_v41, %s9417_s20  ;;  %v6075_v40 = vpack.c.bf16 %v1489_v38, %v1488_v36 }
  0xd4   : > { %v1085_v47 = vpop.permute.xlu1 %1084  ;;  %v666_v48 = vpop.permute.xlu0 %665 }
  0xd5   : > { %v1122_v50 = vmul.f32 %v1085_v47, %v1065_v42  ;;  %v699_v57 = vmul.f32 %v959_v31, %v666_v48  ;;  %6076 = vmatpush1.bf16.msra.mxu0 %v6075_v40 }
  0xd7   : > { %1138 = vrot.lane.b32.xlu1 %v1122_v50, %s9419_s18  ;;  %926 = vrot.lane.b32.xlu0 %v910_v49, %s6354_s21 }
  0xd8   : > { %v1191_v55 = vpop.permute.xlu1 %1190  ;;  %v772_v56 = vpop.permute.xlu0 %771 }
  0xd9   : > { %v805_v58 = vmul.f32 %v1065_v42, %v772_v56  ;;  %v1228_v12 = vmul.f32 %v1191_v55, %v6887_v59  ;;  %v961_v55 = vld [vmem:[#allocation2 + $0x20] sm:$0xff] }
  0xdb   : > { %822 = vrot.lane.b32.xlu1 %v805_v58, %s9417_s20  ;;  %716 = vrot.lane.b32.xlu0 %v699_v57, %s6350_s26 }
  0xdc   : > { %v1297_v63 = vpop.permute.xlu1 %1296  ;;  %v878_v0 = vpop.permute.xlu0 %877 }
  0xdd   : > { %v1334_v25 = vmul.f32 %v1297_v63, %v1277_v13  ;;  %v911_v26 = vmul.f32 %v6887_v59, %v878_v0 }
  0xdf   : > { %607 = vperm.xlu1 %6241, %v6901_v1   ;;  %1244 = vrot.lane.b32.xlu0 %v1228_v12, %s6355_s29 }
  0xe0   : > { %v671_v23 = vpop.permute.xlu1 %670  ;;  %v984_v24 = vpop.permute.xlu0 %983 }
  0xe1   : > { %v700_v33 = vmul.f32 %v1277_v13, %v671_v23  ;;  %v1017_v34 = vmul.f32 %v1277_v13, %v984_v24  ;;  %v6967_v23 = vld [vmem:[#allocation2 + $0x27] sm:$0xff] }
  0xe3   : > { %1350 = vrot.lane.b32.xlu1 %v1334_v25, %s9404_s15  ;;  %928 = vrot.lane.b32.xlu0 %v911_v26, %s6354_s21  ;;  %v6973_v26 = vld [vmem:[%s9377_s1 + $0x30] sm:$0xff]  ;;  %s9430_s15 = smov 124  }
  0xe4   : > { %v777_v31 = vpop.permute.xlu1 %776  ;;  %v1090_v32 = vpop.permute.xlu0 %1089 }
  0xe5   : > { %v1123_v22 = vmul.f32 %v1090_v32, %v6923_v35  ;;  %v806_v48 = vmul.f32 %v777_v31, %v6923_v35 }
  0xe7   : > { %718 = vrot.lane.b32.xlu1 %v700_v33, %s6350_s26  ;;  %1034 = vrot.lane.b32.xlu0 %v1017_v34, %s6351_s0 }
  0xe8   : > { %v883_v41 = vpop.permute.xlu1 %882  ;;  %v1196_v42 = vpop.permute.xlu0 %1195 }
  0xe9   : > { %v1229_v49 = vmul.f32 %v1196_v42, %v6940_v44  ;;  %v912_v54 = vmul.f32 %v883_v41, %v6940_v44  ;;  %v6981_v41 = vld [vmem:[#allocation2 + $0x29] sm:$0xff] }
  0xeb   : > { %1417 = vperm.xlu1 %6241, %v6937_v43   ;;  %1140 = vrot.lane.b32.xlu0 %v1123_v22, %s9419_s18 }
  0xec   : > { %v989_v45 = vpop.permute.xlu1 %988  ;;  %v1302_v47 = vpop.permute.xlu0 %1301 }
  0xed   : > { %v1018_v58 = vmul.f32 %v989_v45, %v961_v55  ;;  %v1335_v60 = vmul.f32 %v1302_v47, %v961_v55  ;;  %v6988_v45 = vld [vmem:[%s9377_s1 + $0x228] sm:$0xff] }
  0xef   : > { %1246 = vrot.lane.b32.xlu1 %v1229_v49, %s6355_s29  ;;  %824 = vrot.lane.b32.xlu0 %v806_v48, %s9417_s20  ;;  %v6991_v48 = vld [vmem:[#allocation2 + $0x2f] sm:$0xff] }
  0xf0   : > { %v1095_v50 = vpop.permute.xlu1 %1094  ;;  %v676_v51 = vpop.permute.xlu0 %675 }
  0xf1   : > { %v1124_v0 = vmul.f32 %v1095_v50, %v6956_v61  ;;  %v701_v12 = vmul.f32 %v961_v55, %v676_v51 }
  0xf3   : > { %930 = vrot.lane.b32.xlu1 %v912_v54, %s6354_s21  ;;  %612 = vperm.xlu0 %6240, %v6951_v52  }
  0xf4   : > { %v1201_v56 = vpop.permute.xlu1 %1200  ;;  %v782_v57 = vpop.permute.xlu0 %781 }
  0xf5   : > { %v807_v20 = vmul.f32 %v6956_v61, %v782_v57  ;;  %v1230_v27 = vmul.f32 %v1201_v56, %v6967_v23  ;;  %v7002_v57 = vld [vmem:[%s9377_s1 + $0x38] sm:$0xff] }
  0xf7   : > { %1036 = vrot.lane.b32.xlu1 %v1018_v58, %s6351_s0  ;;  %1352 = vrot.lane.b32.xlu0 %v1335_v60, %s9470_s25  ;;  %v963_v60 = vld [vmem:[#allocation2 + $0x30] sm:$0xff] }
  0xf8   : > { %v1307_v62 = vpop.permute.xlu1 %1306  ;;  %v888_v63 = vpop.permute.xlu0 %887 }
  0xf9   : > { %v1336_v32 = vmul.f32 %v1307_v62, %v1279_v28  ;;  %v913_v33 = vmul.f32 %v6967_v23, %v888_v63 }
  0xfb   : > { %1142 = vrot.lane.b32.xlu1 %v1124_v0, %s9419_s18  ;;  %720 = vrot.lane.b32.xlu0 %v701_v12, %s6350_s26 }
  0xfc   : > { %v681_v13 = vpop.permute.xlu1 %680  ;;  %v994_v16 = vpop.permute.xlu0 %993 }
  0xfd   : > { %v702_v38 = vmul.f32 %v1279_v28, %v681_v13  ;;  %v1019_v40 = vmul.f32 %v1279_v28, %v994_v16  ;;  %v7007_v13 = vld [vmem:[#allocation2 + $0x31] sm:$0xff] }
  0xfe   : > { %v7017_v28 = vld [vmem:[%s9377_s1 + $0x230] sm:$0xff] }
  0xff   : > { %826 = vrot.lane.b32.xlu1 %v807_v20, %s9417_s20  ;;  %1422 = vperm.xlu0 %6240, %v5587_v17  }
 0x100   : > { %v787_v24 = vpop.permute.xlu1 %786  ;;  %v1100_v25 = vpop.permute.xlu0 %1099 }
 0x101   : > { %v1125_v47 = vmul.f32 %v1100_v25, %v6981_v41  ;;  %v808_v51 = vmul.f32 %v787_v24, %v6981_v41 }
 0x103   : > { %617 = vperm.xlu1 %6241, %v6973_v26   ;;  %1248 = vrot.lane.b32.xlu0 %v1230_v27, %s6355_s29 }
 0x104   : > { %v893_v29 = vpop.permute.xlu1 %892  ;;  %v1206_v31 = vpop.permute.xlu0 %1205 }
 0x105   : > { %v1231_v54 = vmul.f32 %v1206_v31, %v6991_v48  ;;  %v914_v58 = vmul.f32 %v893_v29, %v6991_v48  ;;  %v7020_v31 = vld [vmem:[#allocation2 + $0x37] sm:$0xff] }
 0x107   : > { %1354 = vrot.lane.b32.xlu1 %v1336_v32, %s9470_s25  ;;  %932 = vrot.lane.b32.xlu0 %v913_v33, %s6354_s21 }
 0x108   : > { %v999_v34 = vpop.permute.xlu1 %998  ;;  %v1312_v36 = vpop.permute.xlu0 %1311 }
 0x109   : > { %v1020_v0 = vmul.f32 %v999_v34, %v963_v60  ;;  %v1337_v12 = vmul.f32 %v1312_v36, %v963_v60 }
 0x10b   : > { %722 = vrot.lane.b32.xlu1 %v702_v38, %s6350_s26  ;;  %1038 = vrot.lane.b32.xlu0 %v1019_v40, %s6351_s0  ;;  %v1281_v38 = vld [vmem:[#allocation2 + $0x38] sm:$0xff] }
 0x10c   : > { %v1105_v42 = vpop.permute.xlu1 %1104  ;;  %v686_v22 = vpop.permute.xlu0 %685 }
 0x10d   : > { %v1126_v20 = vmul.f32 %v1105_v42, %v7007_v13  ;;  %v703_v24 = vmul.f32 %v963_v60, %v686_v22 }
 0x10f   : > { %1427 = vperm.xlu1 %6241, %v6988_v45   ;;  %1144 = vrot.lane.b32.xlu0 %v1125_v47, %s9419_s18 }
 0x110   : > { %v1211_v49 = vpop.permute.xlu1 %1210  ;;  %v792_v50 = vpop.permute.xlu0 %791 }
 0x111   : > { %v809_v29 = vmul.f32 %v7007_v13, %v792_v50  ;;  %v1232_v34 = vmul.f32 %v1211_v49, %v7020_v31  ;;  %v7028_v50 = vld [vmem:[#allocation2 + $0x39] sm:$0xff] }
 0x113   : > { %1250 = vrot.lane.b32.xlu1 %v1231_v54, %s6355_s29  ;;  %828 = vrot.lane.b32.xlu0 %v808_v51, %s9417_s20 }
 0x114   : > { %v1317_v55 = vpop.permute.xlu1 %1316  ;;  %v898_v56 = vpop.permute.xlu0 %897 }
 0x115   : > { %v915_v36 = vmul.f32 %v7020_v31, %v898_v56  ;;  %v1338_v22 = vmul.f32 %v1317_v55, %v1281_v38  ;;  %v7038_v55 = vld [vmem:[%s9377_s1 + $0x238] sm:$0xff] }
 0x117   : > { %934 = vrot.lane.b32.xlu1 %v914_v58, %s6354_s21  ;;  %622 = vperm.xlu0 %6240, %v7002_v57  }
 0x118   : > { %v691_v62 = vpop.permute.xlu1 %690  ;;  %v1004_v63 = vpop.permute.xlu0 %1003 }
 0x119   : > { %v1021_v47 = vmul.f32 %v1281_v38, %v1004_v63  ;;  %v704_v49 = vmul.f32 %v1281_v38, %v691_v62  ;;  %v7049_v38 = vld [vmem:[#allocation2 + $0x41] sm:$0xff] }
 0x11b   : > { %1040 = vrot.lane.b32.xlu1 %v1020_v0, %s6351_s0  ;;  %1356 = vrot.lane.b32.xlu0 %v1337_v12, %s9470_s25  ;;  %v7041_v0 = vld [vmem:[#allocation2 + $0x3f] sm:$0xff] }
 0x11c   : > { %v797_v16 = vpop.permute.xlu1 %796  ;;  %v1110_v17 = vpop.permute.xlu0 %1109 }
 0x11d   : > { %v1127_v56 = vmul.f32 %v1110_v17, %v7028_v50  ;;  %v810_v63 = vmul.f32 %v797_v16, %v7028_v50 }
 0x11f   : > { %1146 = vrot.lane.b32.xlu1 %v1126_v20, %s9419_s18  ;;  %724 = vrot.lane.b32.xlu0 %v703_v24, %s6350_s26  ;;  %v965_v24 = vld [vmem:[#allocation2 + $0x40] sm:$0xff] }
 0x120   : > { %v903_v25 = vpop.permute.xlu1 %902  ;;  %v1216_v27 = vpop.permute.xlu0 %1215 }
 0x121   : > { %v916_v17 = vmul.f32 %v903_v25, %v7041_v0  ;;  %v1233_v20 = vmul.f32 %v1216_v27, %v7041_v0 }
 0x123   : > { %830 = vrot.lane.b32.xlu1 %v809_v29, %s9417_s20  ;;  %1432 = vperm.xlu0 %6240, %v7017_v28  }
 0x124   : > { %v1009_v32 = vpop.permute.xlu1 %1008  ;;  %v1322_v33 = vpop.permute.xlu0 %1321 }
 0x125   : > { %v1022_v16 = vmul.f32 %v1009_v32, %v965_v24 }
 0x127   : > { %936 = vrot.lane.b32.xlu1 %v915_v36, %s6354_s21  ;;  %1252 = vrot.lane.b32.xlu0 %v1232_v34, %s6355_s29  ;;  %v1339_v36 = vmul.f32 %v1322_v33, %v965_v24 }
 0x128   : > { %v1115_v40 = vpop.permute.xlu1 %1114  ;;  %v696_v42 = vpop.permute.xlu0 %695 }
 0x129   : > { %v1128_v27 = vmul.f32 %v1115_v40, %v7049_v38 }
 0x12b   : > { %1042 = vrot.lane.b32.xlu1 %v1021_v47, %s6351_s0  ;;  %1358 = vrot.lane.b32.xlu0 %v1338_v22, %s9470_s25  ;;  %v7051_v22 = vld [vmem:[#allocation2 + $0x7] sm:$0xff] }
 0x12c   : > { %v1221_v51 = vpop.permute.xlu1 %1220  ;;  %v802_v54 = vpop.permute.xlu0 %801 }
 0x12f   : > { %1148 = vrot.lane.b32.xlu1 %v1127_v56, %s9419_s18  ;;  %726 = vrot.lane.b32.xlu0 %v704_v49, %s6350_s26  ;;  %v705_v49 = vmul.f32 %v965_v24, %v696_v42  ;;  %v1283_v42 = vld [vmem:[#allocation2 + $0x48] sm:$0xff] }
 0x130   : > { %v1327_v58 = vpop.permute.xlu1 %1326  ;;  %v908_v60 = vpop.permute.xlu0 %907 }
 0x133   : > { %832 = vrot.lane.b32.xlu1 %v810_v63, %s9417_s20  ;;  %1437 = vperm.xlu0 %6240, %v7038_v55  }
 0x134   : > { %v1120_v62 = vpop.permute.xlu1 %1119  ;;  %v1014_v12 = vpop.permute.xlu0 %1013 }
 0x137   : > { %938 = vrot.lane.b32.xlu1 %v916_v17, %s6354_s21  ;;  %1254 = vrot.lane.b32.xlu0 %v1233_v20, %s6355_s29  ;;  %v1177_v17 = vld [vmem:[#allocation2 + $0x47] sm:$0xff] }
 0x138   : > { %v1332_v29 = vpop.permute.xlu1 %1331  ;;  %v1226_v34 = vpop.permute.xlu0 %1225  ;;  %v1234_v20 = vmul.f32 %v1221_v51, %v1177_v17 }
 0x13b   : > { %1044 = vrot.lane.b32.xlu1 %v1022_v16, %s6351_s0  ;;  %1360 = vrot.lane.b32.xlu0 %v1339_v36, %s9470_s25  ;;  %v811_v16 = vmul.f32 %v7049_v38, %v802_v54 }
 0x13c   : > { %v593_v25 = vpop.permute.xlu1 %592  ;;  %v588_v47 = vpop.permute.xlu0 %587 }
 0x13d   : > { %v626_v56 = vmul.f32 %v6866_v39, %v593_v25  ;;  %v625_v63 = vmul.f32 %v588_v47, %v7051_v22  ;;  %v1340_v25 = vmul.f32 %v1327_v58, %v1283_v42  ;;  %v917_v47 = vmul.f32 %v1177_v17, %v908_v60 }
 0x13f   : > { %634 = vst.msk [vmem:[#allocation3 + $0x10] sm:$0xff] %vm540_vm0, %v626_v56  ;;  %633 = vst.msk [vmem:[#allocation3] sm:$0xff] %vm540_vm0, %v625_v63  ;;  %1150 = vrot.lane.b32.xlu1 %v1128_v27, %s9419_s18  ;;  %728 = vrot.lane.b32.xlu0 %v705_v49, %s6350_s26  ;;  %v1178_v56 = vld [vmem:[#allocation2 + $0x4f] sm:$0xff]  ;;  %s9426_s26 = smov 44  }
 0x140   : > { %v598_v32 = vpop.permute.xlu1 %597  ;;  %v1403_v33 = vpop.permute.xlu0 %1402 }
 0x141   : > { %v627_v40 = vmul.f32 %v6887_v59, %v598_v32  ;;  %v1440_v39 = vmul.f32 %v1403_v33, %v6923_v35  ;;  %v7071_v59 = vld [vmem:[#allocation2 + $0x49] sm:$0xff] }
 0x142   : > { %v1129_v58 = vmul.f32 %v1120_v62, %v7071_v59 }
 0x143   : > { %635 = vst.msk [vmem:[#allocation3 + $0x20] sm:$0xff] %vm540_vm0, %v627_v40  ;;  %1448 = vst.msk [vmem:[#allocation3 + $0x8] sm:$0xff] %vm540_vm0, %v1440_v39  ;;  %1256 = vrot.lane.b32.xlu1 %v1234_v20, %s6355_s29  ;;  %834 = vrot.lane.b32.xlu0 %v811_v16, %s9417_s20  ;;  %v5632_v16 = vld [vmem:[%s9377_s1 + $0x140] sm:$0xff] }
 0x144   : > { %v1408_v24 = vpop.permute.xlu1 %1407  ;;  %v1413_v36 = vpop.permute.xlu0 %1412 }
 0x145   : > { %v1441_v51 = vmul.f32 %v1408_v24, %v6956_v61  ;;  %v1442_v54 = vmul.f32 %v1413_v36, %v6981_v41  ;;  %v1023_v61 = vmul.f32 %v1283_v42, %v1014_v12  ;;  %v1284_v41 = vld [vmem:[#allocation2 + $0x50] sm:$0xff]  ;;  %v5603_v36 = vld [vmem:[%s9377_s1 + $0x58] sm:$0xff] }
 0x146   : > { %v1341_v62 = vmul.f32 %v1332_v29, %v1284_v41  ;;  %v5641_v41 = vld [vmem:[%s9377_s1 + $0x188] sm:$0xff] }
 0x147   : > { %1449 = vst.msk [vmem:[#allocation3 + $0x18] sm:$0xff] %vm540_vm0, %v1441_v51  ;;  %1450 = vst.msk [vmem:[#allocation3 + $0x28] sm:$0xff] %vm540_vm0, %v1442_v54  ;;  %1362 = vrot.lane.b32.xlu1 %v1340_v25, %s9470_s25  ;;  %940 = vrot.lane.b32.xlu0 %v917_v47, %s6354_s21  ;;  %v5633_v47 = vld [vmem:[%s9377_s1 + $0x148] sm:$0xff]  ;;  %s9421_s21 = smov 92  }
 0x148   : > { %v603_v35 = vpop.permute.xlu1 %602  ;;  %v715_v27 = vpop.permute.xlu0 %714 }
 0x149   : > { %v628_v60 = vmul.f32 %v6940_v44, %v603_v35  ;;  %739 = vst.msk [vmem:[#allocation3] sm:$0xff] %vm738_vm1, %v715_v27  ;;  %v1235_v44 = vmul.f32 %v1226_v34, %v1178_v56  ;;  %v5618_v27 = vld [vmem:[%s9377_s1 + $0xd0] sm:$0xff] }
 0x14a   : > { %v1457_v49 = vld [vmem:[#allocation3 + $0x8] sm:$0xff] }
 0x14b   : > { %636 = vst.msk [vmem:[#allocation3 + $0x30] sm:$0xff] %vm540_vm0, %v628_v60  ;;  %5592 = vmatprep.mubr.msk.f32.mxu0 %vm540_vm0, %v1457_v49  ;;  %1152 = vrot.lane.b32.xlu1 %v1129_v58, %s9419_s18  ;;  %v5611_v58 = vld [vmem:[%s9377_s1 + $0x98] sm:$0xff] }
 0x14c   : > { %1046 = vrot.lane.b32.xlu0 %v1023_v61, %s6351_s0  ;;  %v1033_v63 = vpop.permute.xlu1 %1032  ;;  %v821_v17 = vpop.permute.xlu0 %820 }
 0x14d   : > { %845 = vst.msk [vmem:[#allocation3] sm:$0xff] %vm844_vm2, %v821_v17 }
 0x14e   : > { %v1459_v24 = vld [vmem:[#allocation3 + $0x18] sm:$0xff] }
 0x14f   : > { %1364 = vrot.lane.b32.xlu1 %v1341_v62, %s9470_s25  ;;  %s9475_s25 = smov 56  }
 0x150   : > { %1258 = vrot.lane.b32.xlu0 %v1235_v44, %s6355_s29  ;;  %v1139_v12 = vpop.permute.xlu1 %1138  ;;  %v927_v32 = vpop.permute.xlu0 %926  ;;  %s9423_s29 = smov 20  }
 0x151   : > { %951 = vst.msk [vmem:[#allocation3] sm:$0xff] %vm950_vm3, %v927_v32  ;;  %v1461_v32 = vld [vmem:[#allocation3 + $0x28] sm:$0xff] }
 0x152   : > { %1057 = vst.msk [vmem:[#allocation3] sm:$0xff] %vm1056_vm4, %v1033_v63  ;;  %v5619_v63 = vld [vmem:[%s9377_s1 + $0xd8] sm:$0xff] }
 0x153   : > { %1698 = vperm.xlu1 %6241, %v6811_v4   ;;  %1163 = vst.msk [vmem:[#allocation3] sm:$0xff] %vm1162_vm5, %v1139_v12 }
 0x154   : > { %1693 = vperm.xlu0 %6240, %v6816_v6   ;;  %v823_v29 = vpop.permute.xlu1 %822  ;;  %v717_v34 = vpop.permute.xlu0 %716 }
 0x155   : > { %740 = vst.msk [vmem:[#allocation3 + $0x10] sm:$0xff] %vm738_vm1, %v717_v34  ;;  %v5626_v34 = vld [vmem:[%s9377_s1 + $0x110] sm:$0xff] }
 0x156   : > { %846 = vst.msk [vmem:[#allocation3 + $0x10] sm:$0xff] %vm844_vm2, %v823_v29  ;;  %v5649_v29 = vld [vmem:[%s9377_s1 + $0x1c8] sm:$0xff] }
 0x157   : > { %1803 = vperm.xlu1 %6241, %v6609_v7  }
 0x158   : > { %1798 = vperm.xlu0 %6240, %v6590_v3   ;;  %v1245_v33 = vpop.permute.xlu0 %1244  ;;  %v5624_v3 = vld [vmem:[%s9377_s1 + $0x100] sm:$0xff] }
 0x159   : > { %1269 = vst.msk [vmem:[#allocation3] sm:$0xff] %vm1268_vm6, %v1245_v33 }
 0x15b   : > { %1908 = vperm.xlu1 %6241, %v6618_v9  }
 0x15c   : > { %1903 = vperm.xlu0 %6240, %v6600_v5   ;;  %v929_v4 = vpop.permute.xlu0 %928 }
 0x15d   : > { %952 = vst.msk [vmem:[#allocation3 + $0x10] sm:$0xff] %vm950_vm3, %v929_v4 }
 0x15e   : > { %v608_v6 = vpop.permute.xlu1 %607 }
 0x15f   : > { %v629_v20 = vmul.f32 %v6967_v23, %v608_v6  ;;  %1703 = vperm.xlu1 %6241, %v6823_v8  }
 0x160   : > { %2008 = vperm.xlu0 %6240, %v6585_v2   ;;  %v1035_v7 = vpop.permute.xlu0 %1034  ;;  %v5602_v2 = vld [vmem:[%s9377_s1 + $0x50] sm:$0xff] }
 0x161   : > { %637 = vst.msk [vmem:[#allocation3 + $0x40] sm:$0xff] %vm540_vm0, %v629_v20  ;;  %v5604_v20 = vld [vmem:[%s9377_s1 + $0x60] sm:$0xff] }
 0x162   : > { %1058 = vst.msk [vmem:[#allocation3 + $0x10] sm:$0xff] %vm1056_vm4, %v1035_v7  ;;  %v1351_v5 = vpop.permute.xlu1 %1350 }
 0x163   : > { %1375 = vst.msk [vmem:[#allocation3] sm:$0xff] %vm1374_vm7, %v1351_v5  ;;  %2113 = vperm.xlu1 %6241, %v5624_v3  }
 0x164   : > { %2013 = vperm.xlu0 %6240, %v6627_v11   ;;  %v1141_v9 = vpop.permute.xlu0 %1140  ;;  %v5625_v11 = vld [vmem:[%s9377_s1 + $0x108] sm:$0xff] }
 0x165   : > { %1164 = vst.msk [vmem:[#allocation3 + $0x10] sm:$0xff] %vm1162_vm5, %v1141_v9 }
 0x166   : > { %v719_v8 = vpop.permute.xlu1 %718 }
 0x167   : > { %741 = vst.msk [vmem:[#allocation3 + $0x20] sm:$0xff] %vm738_vm1, %v719_v8  ;;  %1808 = vperm.xlu1 %6241, %v5602_v2  }
 0x168   : > { %1708 = vperm.xlu0 %6240, %v6847_v19   ;;  %v825_v23 = vpop.permute.xlu0 %824  ;;  %v5610_v19 = vld [vmem:[%s9377_s1 + $0x90] sm:$0xff] }
 0x169   : > { %847 = vst.msk [vmem:[#allocation3 + $0x20] sm:$0xff] %vm844_vm2, %v825_v23 }
 0x16a   : > { %v1418_v40 = vpop.permute.xlu1 %1417  ;;  %v1456_v39 = vld [vmem:[#allocation3] sm:$0xff] }
 0x16b   : > { %v1443_v42 = vmul.f32 %v1418_v40, %v7007_v13  ;;  %2218 = vperm.xlu1 %6241, %v5632_v16   ;;  %1586 = vmatmul.mubr.f32.vlgmr.msra.gmra.mrb[0].mxu0 %v1456_v39  ;;  %v5640_v13 = vld [vmem:[%s9377_s1 + $0x180] sm:$0xff]  ;;  %v5642_v39 = vld [vmem:[%s9377_s1 + $0x190] sm:$0xff] }
 0x16c   : > { %2118 = vperm.xlu0 %6240, %v5625_v11   ;;  %5593 = vmatprep.mubr.msk.f32.mxu0 %vm540_vm0, %v1459_v24  ;;  %v5612_v16 = vld [vmem:[%s9377_s1 + $0xa0] sm:$0xff]  ;;  %v5605_v11 = vld [vmem:[%s9377_s1 + $0x68] sm:$0xff] }
 0x16d   : > { %1451 = vst.msk [vmem:[#allocation3 + $0x38] sm:$0xff] %vm540_vm0, %v1443_v42  ;;  %v5635_v42 = vld [vmem:[%s9377_s1 + $0x158] sm:$0xff] }
 0x16e   : > { %v1247_v25 = vpop.permute.xlu1 %1246 }
 0x16f   : > { %1270 = vst.msk [vmem:[#allocation3 + $0x10] sm:$0xff] %vm1268_vm6, %v1247_v25  ;;  %1913 = vperm.xlu1 %6241, %v5610_v19   ;;  %v5620_v25 = vld [vmem:[%s9377_s1 + $0xe0] sm:$0xff] }
 0x170   : > { %1813 = vperm.xlu0 %6240, %v5603_v36  }
 0x172   : > { %v931_v51 = vpop.permute.xlu1 %930  ;;  %v613_v54 = vpop.permute.xlu0 %612 }
 0x173   : > { %953 = vst.msk [vmem:[#allocation3 + $0x20] sm:$0xff] %vm950_vm3, %v931_v51  ;;  %v630_v35 = vmul.f32 %v6991_v48, %v613_v54  ;;  %2323 = vperm.xlu1 %6241, %v5640_v13   ;;  %v5648_v48 = vld [vmem:[%s9377_s1 + $0x1c0] sm:$0xff]  ;;  %v5613_v13 = vld [vmem:[%s9377_s1 + $0xa8] sm:$0xff]  ;;  %v5643_v54 = vld [vmem:[%s9377_s1 + $0x198] sm:$0xff] }
 0x174   : > { %2223 = vperm.xlu0 %6240, %v5633_v47   ;;  %v1463_v23 = vld [vmem:[#allocation3 + $0x38] sm:$0xff] }
 0x175   : > { %638 = vst.msk [vmem:[#allocation3 + $0x50] sm:$0xff] %vm540_vm0, %v630_v35 }
 0x176   : > { %v1037_v60 = vpop.permute.xlu1 %1036  ;;  %v1353_v61 = vpop.permute.xlu0 %1352 }
 0x177   : > { %1059 = vst.msk [vmem:[#allocation3 + $0x20] sm:$0xff] %vm1056_vm4, %v1037_v60  ;;  %2018 = vperm.xlu1 %6241, %v5618_v27  }
 0x178   : > { %1376 = vst.msk [vmem:[#allocation3 + $0x10] sm:$0xff] %vm1374_vm7, %v1353_v61  ;;  %1918 = vperm.xlu0 %6240, %v5611_v58   ;;  %v5621_v58 = vld [vmem:[%s9377_s1 + $0xe8] sm:$0xff] }
 0x17a   : > { %v1143_v49 = vpop.permute.xlu1 %1142  ;;  %v721_v56 = vpop.permute.xlu0 %720 }
 0x17b   : > { %1165 = vst.msk [vmem:[#allocation3 + $0x20] sm:$0xff] %vm1162_vm5, %v1143_v49  ;;  %2428 = vperm.xlu1 %6241, %v5648_v48  }
 0x17c   : > { %742 = vst.msk [vmem:[#allocation3 + $0x30] sm:$0xff] %vm738_vm1, %v721_v56  ;;  %2328 = vperm.xlu0 %6240, %v5641_v41   ;;  %v5651_v56 = vld [vmem:[%s9377_s1 + $0x1d8] sm:$0xff] }
 0x17e   : > { %v827_v17 = vpop.permute.xlu1 %826  ;;  %v1423_v62 = vpop.permute.xlu0 %1422 }
 0x17f   : > { %v1458_v44 = vld [vmem:[#allocation3 + $0x10] sm:$0xff]  ;;  %848 = vst.msk [vmem:[#allocation3 + $0x30] sm:$0xff] %vm844_vm2, %v827_v17  ;;  %v1444_v12 = vmul.f32 %v1423_v62, %v7028_v50  ;;  %2023 = vperm.xlu1 %6241, %v5619_v63   ;;  %v5628_v63 = vld [vmem:[%s9377_s1 + $0x120] sm:$0xff] }
 0x180   : > { %1591 = vmatmul.mubr.f32.gmra.mrb[2].mxu0 %v1458_v44  ;;  %1713 = vperm.xlu0 %6240, %v6901_v1  }
 0x181   : > { %5594 = vmatprep.mubr.msk.f32.mxu0 %vm540_vm0, %v1461_v32  ;;  %1452 = vst.msk [vmem:[#allocation3 + $0x48] sm:$0xff] %vm540_vm0, %v1444_v12  ;;  %v5629_v12 = vld [vmem:[%s9377_s1 + $0x128] sm:$0xff]  ;;  %v5606_v32 = vld [vmem:[%s9377_s1 + $0x70] sm:$0xff] }
 0x182   : > { %v618_v33 = vpop.permute.xlu1 %617  ;;  %v1249_v4 = vpop.permute.xlu0 %1248 }
 0x183   : > { %v631_v50 = vmul.f32 %v7020_v31, %v618_v33  ;;  %1271 = vst.msk [vmem:[#allocation3 + $0x20] sm:$0xff] %vm1268_vm6, %v1249_v4  ;;  %2433 = vperm.xlu1 %6241, %v5649_v29   ;;  %v5627_v31 = vld [vmem:[%s9377_s1 + $0x118] sm:$0xff] }
 0x184   : > { %2123 = vperm.xlu0 %6240, %v5626_v34   ;;  %v7260_v33 = vld [vmem:[#allocation2 + $0x51] sm:$0xff] }
 0x185   : > { %639 = vst.msk [vmem:[#allocation3 + $0x60] sm:$0xff] %vm540_vm0, %v631_v50 }
 0x186   : > { %v1355_v1 = vpop.permute.xlu1 %1354  ;;  %v933_v6 = vpop.permute.xlu0 %932 }
 0x187   : > { %1377 = vst.msk [vmem:[#allocation3 + $0x20] sm:$0xff] %vm1374_vm7, %v1355_v1  ;;  %1718 = vperm.xlu1 %6241, %v6951_v52   ;;  %v5634_v52 = vld [vmem:[%s9377_s1 + $0x150] sm:$0xff] }
 0x188   : > { %954 = vst.msk [vmem:[#allocation3 + $0x30] sm:$0xff] %vm950_vm3, %v933_v6  ;;  %2533 = vperm.xlu0 %6240, %v6828_v10   ;;  %v5657_v10 = vld [vmem:[%s9377_s1 + $0x208] sm:$0xff] }
 0x189   : > { %v1465_v49 = vld [vmem:[#allocation3 + $0x48] sm:$0xff] }
 0x18a   : > { %v723_v7 = vpop.permute.xlu1 %722  ;;  %v1039_v3 = vpop.permute.xlu0 %1038 }
 0x18b   : > { %743 = vst.msk [vmem:[#allocation3 + $0x40] sm:$0xff] %vm738_vm1, %v723_v7  ;;  %2128 = vperm.xlu1 %6241, %v5627_v31   ;;  %v5607_v7 = vld [vmem:[%s9377_s1 + $0x78] sm:$0xff] }
 0x18c   : > { %1060 = vst.msk [vmem:[#allocation3 + $0x30] sm:$0xff] %vm1056_vm4, %v1039_v3  ;;  %1818 = vperm.xlu0 %6240, %v5604_v20   ;;  %v5614_v20 = vld [vmem:[%s9377_s1 + $0xb0] sm:$0xff] }
 0x18e   : > { %v1428_v5 = vpop.permute.xlu1 %1427  ;;  %v1145_v9 = vpop.permute.xlu0 %1144  ;;  %v1460_v2 = vld [vmem:[#allocation3 + $0x20] sm:$0xff] }
 0x18f   : > { %v1445_v8 = vmul.f32 %v1428_v5, %v7049_v38  ;;  %1166 = vst.msk [vmem:[#allocation3 + $0x30] sm:$0xff] %vm1162_vm5, %v1145_v9  ;;  %2538 = vperm.xlu1 %6241, %v5657_v10   ;;  %1596 = vmatmul.mubr.f32.gmra.mrb[4].mxu0 %v1460_v2  ;;  %v5622_v2 = vld [vmem:[%s9377_s1 + $0xf0] sm:$0xff] }
 0x190   : > { %2228 = vperm.xlu0 %6240, %v5634_v52   ;;  %5595 = vmatprep.mubr.msk.f32.mxu0 %vm540_vm0, %v1463_v23  ;;  %v5637_v52 = vld [vmem:[%s9377_s1 + $0x168] sm:$0xff] }
 0x191   : > { %1453 = vst.msk [vmem:[#allocation3 + $0x58] sm:$0xff] %vm540_vm0, %v1445_v8  ;;  %v5615_v8 = vld [vmem:[%s9377_s1 + $0xb8] sm:$0xff] }
 0x192   : > { %v1251_v40 = vpop.permute.xlu1 %1250  ;;  %v829_v38 = vpop.permute.xlu0 %828 }
 0x193   : > { %1272 = vst.msk [vmem:[#allocation3 + $0x30] sm:$0xff] %vm1268_vm6, %v1251_v40  ;;  %1923 = vperm.xlu1 %6241, %v5612_v16   ;;  %v5645_v40 = vld [vmem:[%s9377_s1 + $0x1a8] sm:$0xff] }
 0x194   : > { %849 = vst.msk [vmem:[#allocation3 + $0x40] sm:$0xff] %vm844_vm2, %v829_v38  ;;  %1823 = vperm.xlu0 %6240, %v5605_v11   ;;  %v5652_v11 = vld [vmem:[%s9377_s1 + $0x1e0] sm:$0xff] }
 0x196   : > { %v935_v24 = vpop.permute.xlu1 %934  ;;  %v623_v19 = vpop.permute.xlu0 %622 }
 0x197   : > { %955 = vst.msk [vmem:[#allocation3 + $0x40] sm:$0xff] %vm950_vm3, %v935_v24  ;;  %v632_v36 = vmul.f32 %v7041_v0, %v623_v19  ;;  %2333 = vperm.xlu1 %6241, %v5642_v39   ;;  %v5650_v0 = vld [vmem:[%s9377_s1 + $0x1d0] sm:$0xff] }
 0x198   : > { %2233 = vperm.xlu0 %6240, %v5635_v42   ;;  %v1467_v31 = vld [vmem:[#allocation3 + $0x58] sm:$0xff]  ;;  %v5630_v19 = vld [vmem:[%s9377_s1 + $0x130] sm:$0xff] }
 0x199   : > { %640 = vst.msk [vmem:[#allocation3 + $0x70] sm:$0xff] %vm540_vm0, %v632_v36  ;;  %v5623_v36 = vld [vmem:[%s9377_s1 + $0xf8] sm:$0xff] }
 0x19a   : > { %v1041_v47 = vpop.permute.xlu1 %1040  ;;  %v1357_v51 = vpop.permute.xlu0 %1356 }
 0x19b   : > { %1061 = vst.msk [vmem:[#allocation3 + $0x40] sm:$0xff] %vm1056_vm4, %v1041_v47  ;;  %2028 = vperm.xlu1 %6241, %v5620_v25   ;;  %v5660_v47 = vld [vmem:[%s9377_s1 + $0x220] sm:$0xff] }
 0x19c   : > { %1378 = vst.msk [vmem:[#allocation3 + $0x30] sm:$0xff] %vm1374_vm7, %v1357_v51  ;;  %1928 = vperm.xlu0 %6240, %v5613_v13   ;;  %v5653_v51 = vld [vmem:[%s9377_s1 + $0x1e8] sm:$0xff] }
 0x19e   : > { %v1147_v35 = vpop.permute.xlu1 %1146  ;;  %v725_v27 = vpop.permute.xlu0 %724 }
 0x19f   : > { %1167 = vst.msk [vmem:[#allocation3 + $0x40] sm:$0xff] %vm1162_vm5, %v1147_v35  ;;  %2438 = vperm.xlu1 %6241, %v5650_v0   ;;  %v5638_v35 = vld [vmem:[%s9377_s1 + $0x170] sm:$0xff] }
 0x1a0   : > { %744 = vst.msk [vmem:[#allocation3 + $0x50] sm:$0xff] %vm738_vm1, %v725_v27  ;;  %2338 = vperm.xlu0 %6240, %v5643_v54   ;;  %v5631_v27 = vld [vmem:[%s9377_s1 + $0x138] sm:$0xff] }
 0x1a2   : > { %v831_v60 = vpop.permute.xlu1 %830  ;;  %v1433_v61 = vpop.permute.xlu0 %1432 }
 0x1a3   : > { %v1462_v48 = vld [vmem:[#allocation3 + $0x30] sm:$0xff]  ;;  %850 = vst.msk [vmem:[#allocation3 + $0x50] sm:$0xff] %vm844_vm2, %v831_v60  ;;  %v1446_v41 = vmul.f32 %v1433_v61, %v7071_v59  ;;  %2033 = vperm.xlu1 %6241, %v5621_v58  }
 0x1a4   : > { %1601 = vmatmul.mubr.f32.gmra.mrb[6].mxu0 %v1462_v48  ;;  %1723 = vperm.xlu0 %6240, %v6973_v26   ;;  %v5658_v26 = vld [vmem:[%s9377_s1 + $0x210] sm:$0xff] }
 0x1a5   : > { %5596 = vmatprep.mubr.msk.f32.mxu0 %vm540_vm0, %v1465_v49  ;;  %1454 = vst.msk [vmem:[#allocation3 + $0x68] sm:$0xff] %vm540_vm0, %v1446_v41  ;;  %v5639_v41 = vld [vmem:[%s9377_s1 + $0x178] sm:$0xff] }
 0x1a6   : > { %v937_v17 = vpop.permute.xlu1 %936  ;;  %v1253_v62 = vpop.permute.xlu0 %1252 }
 0x1a7   : > { %956 = vst.msk [vmem:[#allocation3 + $0x50] sm:$0xff] %vm950_vm3, %v937_v17  ;;  %2443 = vperm.xlu1 %6241, %v5651_v56   ;;  %v5647_v56 = vld [vmem:[%s9377_s1 + $0x1b8] sm:$0xff] }
 0x1a8   : > { %1273 = vst.msk [vmem:[#allocation3 + $0x40] sm:$0xff] %vm1268_vm6, %v1253_v62  ;;  %2133 = vperm.xlu0 %6240, %v5628_v63   ;;  %v5646_v63 = vld [vmem:[%s9377_s1 + $0x1b0] sm:$0xff] }
 0x1aa   : > { %v1043_v59 = vpop.permute.xlu1 %1042  ;;  %v1359_v44 = vpop.permute.xlu0 %1358 }
 0x1ab   : > { %1062 = vst.msk [vmem:[#allocation3 + $0x50] sm:$0xff] %vm1056_vm4, %v1043_v59  ;;  %1728 = vperm.xlu1 %6241, %v7002_v57   ;;  %v5636_v57 = vld [vmem:[%s9377_s1 + $0x160] sm:$0xff] }
 0x1ac   : > { %1379 = vst.msk [vmem:[#allocation3 + $0x40] sm:$0xff] %vm1374_vm7, %v1359_v44  ;;  %2543 = vperm.xlu0 %6240, %v5658_v26   ;;  %v1469_v24 = vld [vmem:[#allocation3 + $0x68] sm:$0xff]  ;;  %v5655_v26 = vld [vmem:[%s9377_s1 + $0x1f8] sm:$0xff] }
 0x1ae   : > { %v1149_v29 = vpop.permute.xlu1 %1148  ;;  %v727_v34 = vpop.permute.xlu0 %726 }
 0x1af   : > { %1168 = vst.msk [vmem:[#allocation3 + $0x50] sm:$0xff] %vm1162_vm5, %v1149_v29  ;;  %2138 = vperm.xlu1 %6241, %v5629_v12  }
 0x1b0   : > { %745 = vst.msk [vmem:[#allocation3 + $0x60] sm:$0xff] %vm738_vm1, %v727_v34  ;;  %1828 = vperm.xlu0 %6240, %v5606_v32   ;;  %v1780_v32 = vld [vmem:[#allocation2 + $0x8] sm:$0xff] }
 0x1b2   : > { %v833_v4 = vpop.permute.xlu1 %832  ;;  %v1438_v50 = vpop.permute.xlu0 %1437 }
 0x1b3   : > { %v1464_v1 = vld [vmem:[#allocation3 + $0x40] sm:$0xff]  ;;  %851 = vst.msk [vmem:[#allocation3 + $0x60] sm:$0xff] %vm844_vm2, %v833_v4  ;;  %v1447_v6 = vmul.f32 %v1438_v50, %v7260_v33  ;;  %2548 = vperm.xlu1 %6241, %v6937_v43  }
 0x1b4   : > { %1606 = vmatmul.mubr.f32.gmra.mrb[8].mxu0 %v1464_v1  ;;  %2238 = vperm.xlu0 %6240, %v5636_v57   ;;  %v5644_v43 = vld [vmem:[%s9377_s1 + $0x1a0] sm:$0xff] }
 0x1b5   : > { %5597 = vmatprep.mubr.msk.f32.mxu0 %vm540_vm0, %v1467_v31  ;;  %1455 = vst.msk [vmem:[#allocation3 + $0x78] sm:$0xff] %vm540_vm0, %v1447_v6 }
 0x1b6   : > { %v939_v3 = vpop.permute.xlu1 %938  ;;  %v1255_v10 = vpop.permute.xlu0 %1254 }
 0x1b7   : > { %957 = vst.msk [vmem:[#allocation3 + $0x60] sm:$0xff] %vm950_vm3, %v939_v3  ;;  %1933 = vperm.xlu1 %6241, %v5614_v20  }
 0x1b8   : > { %1274 = vst.msk [vmem:[#allocation3 + $0x50] sm:$0xff] %vm1268_vm6, %v1255_v10  ;;  %1833 = vperm.xlu0 %6240, %v5607_v7  }
 0x1ba   : > { %v1045_v5 = vpop.permute.xlu1 %1044  ;;  %v1361_v9 = vpop.permute.xlu0 %1360 }
 0x1bb   : > { %1063 = vst.msk [vmem:[#allocation3 + $0x60] sm:$0xff] %vm1056_vm4, %v1045_v5  ;;  %2343 = vperm.xlu1 %6241, %v5644_v43  }
 0x1bc   : > { %1380 = vst.msk [vmem:[#allocation3 + $0x50] sm:$0xff] %vm1374_vm7, %v1361_v9  ;;  %2243 = vperm.xlu0 %6240, %v5637_v52   ;;  %v1471_v48 = vld [vmem:[#allocation3 + $0x78] sm:$0xff] }
 0x1be   : > { %v1151_v23 = vpop.permute.xlu1 %1150  ;;  %v729_v16 = vpop.permute.xlu0 %728 }
 0x1bf   : > { %1169 = vst.msk [vmem:[#allocation3 + $0x60] sm:$0xff] %vm1162_vm5, %v1151_v23  ;;  %2038 = vperm.xlu1 %6241, %v5622_v2  }
 0x1c0   : > { %746 = vst.msk [vmem:[#allocation3 + $0x70] sm:$0xff] %vm738_vm1, %v729_v16  ;;  %1938 = vperm.xlu0 %6240, %v5615_v8   ;;  %vm6364_vm1 = vmmov 1  }
 0x1c2   : > { %v1257_v38 = vpop.permute.xlu1 %1256  ;;  %v835_v39 = vpop.permute.xlu0 %834 }
 0x1c3   : > { %v1466_v42 = vld [vmem:[#allocation3 + $0x50] sm:$0xff]  ;;  %1275 = vst.msk [vmem:[#allocation3 + $0x60] sm:$0xff] %vm1268_vm6, %v1257_v38  ;;  %2448 = vperm.xlu1 %6241, %v5652_v11  }
 0x1c4   : > { %852 = vst.msk [vmem:[#allocation3 + $0x70] sm:$0xff] %vm844_vm2, %v835_v39  ;;  %1611 = vmatmul.mubr.f32.gmra.mrb[10].mxu0 %v1466_v42  ;;  %2348 = vperm.xlu0 %6240, %v5645_v40   ;;  %vm7570_vm2 = vmpackc.low %vm2674_vm15, %vm6364_vm1  ;;  %vm2611_vm15 = vcmask 884480   ;;  %vm2649_vm1 = vcmask 883712  }
 0x1c5   : > { %5598 = vmatprep.mubr.msk.f32.mxu0 %vm540_vm0, %v1469_v24 }
 0x1c6   : > { %v1363_v25 = vpop.permute.xlu1 %1362  ;;  %v941_v13 = vpop.permute.xlu0 %940 }
 0x1c7   : > { %1381 = vst.msk [vmem:[#allocation3 + $0x60] sm:$0xff] %vm1374_vm7, %v1363_v25  ;;  %2143 = vperm.xlu1 %6241, %v5630_v19  }
 0x1c8   : > { %958 = vst.msk [vmem:[#allocation3 + $0x70] sm:$0xff] %vm950_vm3, %v941_v13  ;;  %2043 = vperm.xlu0 %6240, %v5623_v36  }
 0x1ca   : > { %v1153_v0 = vpop.permute.xlu1 %1152  ;;  %v1047_v54 = vpop.permute.xlu0 %1046 }
 0x1cb   : > { %1064 = vst.msk [vmem:[#allocation3 + $0x70] sm:$0xff] %vm1056_vm4, %v1047_v54  ;;  %2553 = vperm.xlu1 %6241, %v5660_v47  }
 0x1cc   : > { %1170 = vst.msk [vmem:[#allocation3 + $0x70] sm:$0xff] %vm1162_vm5, %v1153_v0  ;;  %2453 = vperm.xlu0 %6240, %v5653_v51  }
 0x1ce   : > { %v1365_v58 = vpop.permute.xlu1 %1364  ;;  %v1259_v60 = vpop.permute.xlu0 %1258  ;;  %v1468_v61 = vld [vmem:[#allocation3 + $0x60] sm:$0xff] }
 0x1cf   : > { %1276 = vst.msk [vmem:[#allocation3 + $0x70] sm:$0xff] %vm1268_vm6, %v1259_v60  ;;  %2248 = vperm.xlu1 %6241, %v5638_v35   ;;  %1616 = vmatmul.mubr.f32.gmra.mrb[12].mxu0 %v1468_v61 }
 0x1d0   : > { %1382 = vst.msk [vmem:[#allocation3 + $0x70] sm:$0xff] %vm1374_vm7, %v1365_v58  ;;  %2148 = vperm.xlu0 %6240, %v5631_v27   ;;  %5599 = vmatprep.mubr.msk.f32.mxu0 %vm540_vm0, %v1471_v48  ;;  %v7424_v27 = vld [vmem:[%s9471_s3] ss:$0 sm:$0xff]  ;;  %vm1981_vm7 = vcmask 294080  }
 0x1d2   : > { %v1699_v4 = vpop.permute.xlu1 %1698 }
 0x1d3   : > { %v1694_v49 = vpop.permute.xlu0 %1693  ;;  %2253 = vperm.xlu1 %6241, %v5639_v41  }
 0x1d4   : > { %2558 = vperm.xlu0 %6240, %v6988_v45   ;;  %v5654_v45 = vld [vmem:[%s9377_s1 + $0x1f0] sm:$0xff]  ;;  %v1731_v12 = vmul.f32 %v1694_v49, %v7051_v22 }
 0x1d7   : > { %v1799_v17 = vpop.permute.xlu0 %1798  ;;  %2358 = vperm.xlu1 %6241, %v5647_v56   ;;  %v1470_v62 = vld [vmem:[#allocation3 + $0x70] sm:$0xff] }
 0x1d8   : > { %2353 = vperm.xlu0 %6240, %v5646_v63   ;;  %1621 = vmatmul.mubr.f32.gmra.mrb[14].mxu0 %v1470_v62  ;;  %v1836_v34 = vmul.f32 %v1799_v17, %v1780_v32 }
 0x1db   : > { %v7344_v59 = vpop.permute.xlu0 %1903  ;;  %2463 = vperm.xlu1 %6241, %v5655_v26  }
 0x1dc   : > { %2458 = vperm.xlu0 %6240, %v5654_v45  }
 0x1df   : > { %v7346_v44 = vpop.permute.xlu0 %2008  ;;  %2568 = vperm.xlu1 %6241, %v7038_v55  }
 0x1e0   : > { %2563 = vperm.xlu0 %6240, %v7017_v28   ;;  %v1804_v28 = vpop.permute.xlu1 %1803 }
 0x1e3   : > { %v7351_v29 = vpop.permute.xlu0 %2013 }
 0x1e4   : > { %1747 = vrot.lane.b32.xlu0 %v1731_v12, %s9430_s15  ;;  %v7363_v22 = vpop.permute.xlu1 %1908 }
 0x1e7   : > { %v7354_v57 = vpop.permute.xlu0 %1708 }
 0x1e8   : > { %1852 = vrot.lane.b32.xlu0 %v1836_v34, %s9428_s23  ;;  %v7369_v20 = vpop.permute.xlu1 %1703 }
 0x1eb   : > { %v7357_v50 = vpop.permute.xlu0 %2118 }
 0x1ec   : > { %v2114_v3 = vpop.permute.xlu1 %2113 }
 0x1ef   : > { %v7359_v55 = vpop.permute.xlu0 %1813 }
 0x1f0   : > { %v7377_v52 = vpop.permute.xlu1 %1808 }
 0x1f3   : > { %v7361_v1 = vpop.permute.xlu0 %2223 }
 0x1f4   : > { %v7381_v9 = vpop.permute.xlu1 %2218 }
 0x1f7   : > { %v7365_v6 = vpop.permute.xlu0 %1918 }
 0x1f8   : > { %v7387_v23 = vpop.permute.xlu1 %1913 }
 0x1fb   : > { %v7367_v31 = vpop.permute.xlu0 %2328 }
 0x1fc   : > { %v7391_v11 = vpop.permute.xlu1 %2323 }
 0x1ff   : > { %v7371_v7 = vpop.permute.xlu0 %1713 }
 0x200   : > { %v7397_v39 = vpop.permute.xlu1 %2018 }
 0x203   : > { %v7373_v10 = vpop.permute.xlu0 %2123 }
 0x204   : > { %v7401_v24 = vpop.permute.xlu1 %2428 }
 0x207   : > { %v7375_v43 = vpop.permute.xlu0 %2533 }
 0x208   : > { %v7407_v25 = vpop.permute.xlu1 %2023 }
 0x20b   : > { %v7379_v5 = vpop.permute.xlu0 %1818 }
 0x20c   : > { %v7411_v47 = vpop.permute.xlu1 %2433 }
 0x20f   : > { %v7383_v2 = vpop.permute.xlu0 %2228 }
 0x210   : > { %v7417_v54 = vpop.permute.xlu1 %1718 }
 0x213   : > { %v7385_v8 = vpop.permute.xlu0 %1823 }
 0x214   : > { %v7426_v58 = vpop.permute.xlu1 %2128 }
 0x217   : > { %v7389_v16 = vpop.permute.xlu0 %2233 }
 0x218   : > { %v7433_v17 = vpop.permute.xlu1 %2538 }
 0x21b   : > { %v7393_v40 = vpop.permute.xlu0 %1928 }
 0x21c   : > { %v7438_v26 = vpop.permute.xlu1 %1923 }
 0x21f   : > { %v7395_v38 = vpop.permute.xlu0 %2338 }
 0x223   : > { %v7399_v42 = vpop.permute.xlu0 %1723 }
 0x227   : > { %v7403_v19 = vpop.permute.xlu0 %2133 }
 0x22b   : > { %v7405_v36 = vpop.permute.xlu0 %2543 }
 0x22f   : > { %v7409_v13 = vpop.permute.xlu0 %1828 }
 0x233   : > { %v7413_v51 = vpop.permute.xlu0 %2238 }
 0x237   : > { %v7415_v0 = vpop.permute.xlu0 %1833 }
 0x23b   : > { %v7419_v35 = vpop.permute.xlu0 %2243 }
 0x23e   : > { %v1587_v60 = vpop.f32.mrb[0].mxu0 }
 0x23f   : > { %v7428_v61 = vpop.permute.xlu0 %1938  ;;  %v1588_v48 = vadd.f32 %v7424_v27, %v1587_v60  ;;  %v1589_v41 = vpop.f32.mrb[1].mxu0 }
 0x241   : > { %vm1626_vm8 = vcmp.ge.f32.partialorder %v1588_v48, 0.0  ;;  %v1634_v49 = vmul.f32 0.05, %v1588_v48 }
 0x243   : > { %v1642_v56 = vsel %vm1626_vm8, %v1588_v48, %v1634_v49  ;;  %v7431_v63 = vpop.permute.xlu0 %2348  ;;  %v7448_v49 = vpop.permute.xlu1 %2333  ;;  %vm2086_vm8 = vcmask 392480  }
 0x244   : > { %1650 = vst.msk [vmem:[#allocation2 + $0x10] sm:$0xff] %vm540_vm0, %v1642_v56 }
 0x247   : > { %v7436_v62 = vpop.permute.xlu0 %2043  ;;  %v7456_v30 = vpop.permute.xlu1 %2028 }
 0x24b   : > { %v1658_v45 = vld [vmem:[#allocation2 + $0x10] sm:$0xff]  ;;  %v7440_v12 = vpop.permute.xlu0 %2453 }
 0x24c   : > { %v1885_v32 = vld [vmem:[#allocation2 + $0x9] sm:$0xff]  ;;  %1667 = vst.msk [vmem:[#allocation4] sm:$0xff] %vm1666_vm9, %v1658_v45  ;;  %v1837_v46 = vmul.f32 %v1804_v28, %v1658_v45 }
 0x24d   : > { %v1676_v34 = vld [vmem:[#allocation2 + $0xf] sm:$0xff]  ;;  %v1941_v60 = vmul.f32 %v7344_v59, %v1885_v32 }
 0x24e   : > { %v1732_v41 = vmul.f32 %v1699_v4, %v1676_v34  ;;  %v2046_v56 = vmul.f32 %v7346_v44, %v1676_v34 }
 0x24f   : > { %1957 = vrot.lane.b32.xlu0 %v1941_v60, %s9423_s29  ;;  %v7446_v48 = vpop.permute.xlu0 %2148  ;;  %v2151_v60 = vmul.f32 %v2114_v3, %v1658_v45 }
 0x250   : > { %1749 = vrot.lane.b32.xlu1 %v1732_v41, %s9430_s15 }
 0x253   : > { %v1592_v53 = vpop.f32.mrb[2].mxu0  ;;  %2062 = vrot.lane.b32.xlu0 %v2046_v56, %s9417_s20  ;;  %v7453_v59 = vpop.permute.xlu0 %2558 }
 0x254   : > { %1854 = vrot.lane.b32.xlu1 %v1837_v46, %s9428_s23  ;;  %v1593_v4 = vadd.f32 %v7424_v27, %v1592_v53  ;;  %v1594_v32 = vpop.f32.mrb[3].mxu0  ;;  %v7464_v46 = vpop.permute.xlu1 %2438 }
 0x256   : > { %vm1627_vm10 = vcmp.ge.f32.partialorder %v1593_v4, 0.0  ;;  %v1635_v41 = vmul.f32 0.05, %v1593_v4 }
 0x257   : > { %v7459_v28 = vpop.permute.xlu0 %2353 }
 0x258   : > { %2167 = vrot.lane.b32.xlu1 %v2151_v60, %s9426_s26  ;;  %v1643_v44 = vsel %vm1627_vm10, %v1593_v4, %v1635_v41  ;;  %v7471_v4 = vpop.permute.xlu1 %2033  ;;  %vm2296_vm10 = vcmask 589280  }
 0x259   : > { %1651 = vst.msk [vmem:[#allocation2 + $0x18] sm:$0xff] %vm540_vm0, %v1643_v44 }
 0x25b   : > { %v7462_v34 = vpop.permute.xlu0 %2458 }
 0x25f   : > { %v7466_v53 = vpop.permute.xlu0 %2563 }
 0x260   : > { %v1659_v56 = vld [vmem:[#allocation2 + $0x18] sm:$0xff] }
 0x261   : > { %v1991_v3 = vld [vmem:[#allocation2 + $0x17] sm:$0xff]  ;;  %1668 = vst.msk [vmem:[#allocation4 + $0x8] sm:$0xff] %vm1666_vm9, %v1659_v56 }
 0x262   : > { %v1886_v45 = vld [vmem:[#allocation2 + $0x11] sm:$0xff]  ;;  %v2047_v32 = vmul.f32 %v7351_v29, %v1991_v3  ;;  %v1597_v60 = vpop.f32.mrb[4].mxu0  ;;  %v2152_v29 = vmul.f32 %v7357_v50, %v1659_v56 }
 0x263   : > { %v1942_v37 = vmul.f32 %v7363_v22, %v1886_v45  ;;  %v1748_v41 = vpop.permute.xlu0 %1747  ;;  %v1598_v44 = vadd.f32 %v7424_v27, %v1597_v60  ;;  %v1599_v18 = vpop.f32.mrb[5].mxu0  ;;  %v1733_v22 = vmul.f32 %v1991_v3, %v7369_v20  ;;  %v2256_v50 = vmul.f32 %v7381_v9, %v1886_v45  ;;  %v2628_v20 = vld [vmem:[%s9472_s4] sm:$0xff]  ;;  %v2630_v45 = vld [vmem:[%s9472_s4 + $0x10] sm:$0xff] }
 0x264   : > { %2064 = vrot.lane.b32.xlu0 %v2047_v32, %s9417_s20  ;;  %1772 = vst.msk [vmem:[#allocation3] sm:$0xff] %vm1771_vm11, %v1748_v41  ;;  %v1838_v18 = vmul.f32 %v7377_v52, %v1659_v56  ;;  %v2361_v9 = vmul.f32 %v7391_v11, %v1991_v3  ;;  %v2466_v3 = vmul.f32 %v7401_v24, %v1659_v56 }
 0x265   : > { %1959 = vrot.lane.b32.xlu1 %v1942_v37, %s9423_s29  ;;  %vm1628_vm12 = vcmp.ge.f32.partialorder %v1598_v44, 0.0  ;;  %v1636_v21 = vmul.f32 0.05, %v1598_v44  ;;  %v7481_v37 = vpop.permute.xlu1 %2443 }
 0x267   : > { %v1644_v32 = vsel %vm1628_vm12, %v1598_v44, %v1636_v21  ;;  %v1853_v14 = vpop.permute.xlu0 %1852  ;;  %v2629_v21 = vld [vmem:[%s9472_s4 + $0x8] sm:$0xff]  ;;  %vm2401_vm12 = vcmask 687680  }
 0x268   : > { %2169 = vrot.lane.b32.xlu0 %v2152_v29, %s9426_s26  ;;  %1652 = vst.msk [vmem:[#allocation2 + $0x20] sm:$0xff] %vm540_vm0, %v1644_v32  ;;  %v6077_v60 = vpack.c.bf16 %v2629_v21, %v2628_v20  ;;  %v2631_v29 = vld [vmem:[%s9472_s4 + $0x18] sm:$0xff]  ;;  %v2632_v32 = vld [vmem:[%s9472_s4 + $0x20] sm:$0xff] }
 0x269   : > { %1751 = vrot.lane.b32.xlu1 %v1733_v22, %s9430_s15  ;;  %1877 = vst.msk [vmem:[#allocation3] sm:$0xff] %vm1876_vm13, %v1853_v14  ;;  %v7494_v41 = vpop.permute.xlu1 %1728  ;;  %v6081_v22 = vpack.c.bf16 %v2631_v29, %v2630_v45 }
 0x26a   : > { %6078 = vmatprep.subr.bf16.mxu1 %v6077_v60 }
 0x26b   : > { %6080 = vmatpush3.bf16.msra.mxu1 %v6077_v60 }
 0x26c   : > { %6082 = vmatprep.subr.bf16.mxu1 %v6081_v22 }
 0x26d   : > { %1856 = vrot.lane.b32.xlu1 %v1838_v18, %s9428_s23  ;;  %v2633_v18 = vld [vmem:[%s9472_s4 + $0x28] sm:$0xff] }
 0x26e   : > { %v6085_v20 = vpack.c.bf16 %v2633_v18, %v2632_v32  ;;  %v2637_v32 = vld [vmem:[%s9472_s4 + $0x48] sm:$0xff] }
 0x26f   : > { %v1660_v14 = vld [vmem:[#allocation2 + $0x20] sm:$0xff]  ;;  %6084 = vmatpush3.bf16.msra.mxu1 %v6081_v22 }
 0x270   : > { %v1678_v52 = vld [vmem:[#allocation2 + $0x1f] sm:$0xff]  ;;  %1669 = vst.msk [vmem:[#allocation4 + $0x10] sm:$0xff] %vm1666_vm9, %v1660_v14  ;;  %v1839_v11 = vmul.f32 %v7359_v55, %v1660_v14  ;;  %6086 = vmatprep.subr.bf16.mxu1 %v6085_v20 }
 0x271   : > { %2272 = vrot.lane.b32.xlu1 %v2256_v50, %s9413_s17  ;;  %v1734_v44 = vmul.f32 %v7354_v57, %v1678_v52  ;;  %v7508_v57 = vpop.permute.xlu1 %2138  ;;  %v2201_v50 = vld [vmem:[#allocation2 + $0x19] sm:$0xff] }
 0x272   : > { %v2257_v56 = vmul.f32 %v7361_v1, %v2201_v50  ;;  %v1943_v60 = vmul.f32 %v2201_v50, %v7387_v23  ;;  %v2362_v23 = vmul.f32 %v7367_v31, %v1678_v52  ;;  %v2153_v31 = vmul.f32 %v7373_v10, %v1660_v14 }
 0x273   : > { %1753 = vrot.lane.b32.xlu0 %v1734_v44, %s9430_s15  ;;  %v2634_v44 = vld [vmem:[%s9472_s4 + $0x30] sm:$0xff]  ;;  %6088 = vmatpush3.bf16.msra.mxu1 %v6085_v20  ;;  %v2571_v10 = vmul.f32 %v7375_v43, %v2201_v50 }
 0x275   : > { %2377 = vrot.lane.b32.xlu1 %v2361_v9, %s9415_s27  ;;  %v2635_v9 = vld [vmem:[%s9472_s4 + $0x38] sm:$0xff]  ;;  %v7529_v22 = vpop.permute.xlu1 %2548 }
 0x276   : > { %v6089_v29 = vpack.c.bf16 %v2635_v9, %v2634_v44 }
 0x277   : > { %v1602_v21 = vpop.f32.mrb[6].mxu0  ;;  %1858 = vrot.lane.b32.xlu0 %v1839_v11, %s9428_s23  ;;  %v2048_v11 = vmul.f32 %v7397_v39, %v1678_v52  ;;  %v2467_v39 = vmul.f32 %v7411_v47, %v1660_v14  ;;  %v2638_v52 = vld [vmem:[%s9472_s4 + $0x50] sm:$0xff]  ;;  %v2640_v14 = vld [vmem:[%s9472_s4 + $0x60] sm:$0xff] }
 0x278   : > { %v1603_v55 = vadd.f32 %v7424_v27, %v1602_v21  ;;  %v1604_v24 = vpop.f32.mrb[7].mxu0  ;;  %6090 = vmatprep.subr.bf16.mxu1 %v6089_v29  ;;  %v2639_v21 = vld [vmem:[%s9472_s4 + $0x58] sm:$0xff] }
 0x279   : > { %2482 = vrot.lane.b32.xlu1 %v2466_v3, %s9419_s18  ;;  %v2636_v3 = vld [vmem:[%s9472_s4 + $0x40] sm:$0xff]  ;;  %6092 = vmatpush3.bf16.msra.mxu1 %v6089_v29  ;;  %v7544_v20 = vpop.permute.xlu1 %1933 }
 0x27a   : > { %vm1629_vm14 = vcmp.ge.f32.partialorder %v1603_v55, 0.0  ;;  %v1637_v45 = vmul.f32 0.05, %v1603_v55  ;;  %v6093_v18 = vpack.c.bf16 %v2637_v32, %v2636_v3 }
 0x27b   : > { %2274 = vrot.lane.b32.xlu0 %v2257_v56, %s9413_s17  ;;  %s5432_s17 = scalar_lea.sflag [#allocation7], %s6558_s28 }
 0x27c   : > { %v1645_v1 = vsel %vm1629_vm14, %v1603_v55, %v1637_v45  ;;  %6094 = vmatprep.subr.bf16.mxu1 %v6093_v18  ;;  %v6097_v55 = vpack.c.bf16 %v2639_v21, %v2638_v52  ;;  %vm2506_vm14 = vcmask 786080  }
 0x27d   : > { %1961 = vrot.lane.b32.xlu1 %v1943_v60, %s9423_s29  ;;  %1653 = vst.msk [vmem:[#allocation2 + $0x28] sm:$0xff] %vm540_vm0, %v1645_v1  ;;  %6096 = vmatpush3.bf16.msra.mxu1 %v6093_v18  ;;  %v2641_v60 = vld [vmem:[%s9472_s4 + $0x68] sm:$0xf]  ;;  %v7565_v9 = vpop.permute.xlu1 %2343 }
 0x27e   : > { %6098 = vmatprep.subr.bf16.mxu1 %v6097_v55  ;;  %v6101_v43 = vpack.c.bf16 %v2641_v60, %v2640_v14 }
 0x27f   : > { %2379 = vrot.lane.b32.xlu0 %v2362_v23, %s9415_s27 }
 0x281   : > { %2066 = vrot.lane.b32.xlu1 %v2048_v11, %s9417_s20  ;;  %6100 = vmatpush3.bf16.msra.mxu1 %v6097_v55  ;;  %v7582_v32 = vpop.permute.xlu1 %2038 }
 0x282   : > { %6103 = vmatprep.subr.msk.bf16.mxu1 %vm7570_vm2, %v6101_v43 }
 0x283   : > { %2171 = vrot.lane.b32.xlu0 %v2153_v31, %s9426_s26 }
 0x284   : > { %v1661_v24 = vld [vmem:[#allocation2 + $0x28] sm:$0xff] }
 0x285   : > { %2484 = vrot.lane.b32.xlu1 %v2467_v39, %s9419_s18  ;;  %v1993_v56 = vld [vmem:[#allocation2 + $0x27] sm:$0xff]  ;;  %1670 = vst.msk [vmem:[#allocation4 + $0x18] sm:$0xff] %vm1666_vm9, %v1661_v24  ;;  %v2154_v23 = vmul.f32 %v7426_v58, %v1661_v24  ;;  %6106 = vmatpush3.bf16.msk.msra.mxu1 %vm7570_vm2, %v6101_v43  ;;  %v1840_v18 = vmul.f32 %v7379_v5, %v1661_v24  ;;  %v7591_v39 = vpop.permute.xlu1 %2448 }
 0x286   : > { %v2049_v47 = vmul.f32 %v7407_v25, %v1993_v56  ;;  %v1888_v44 = vld [vmem:[#allocation2 + $0x21] sm:$0xff]  ;;  %v2363_v31 = vmul.f32 %v7448_v49, %v1993_v56 }
 0x287   : > { %v1607_v45 = vpop.f32.mrb[8].mxu0  ;;  %2587 = vrot.lane.b32.xlu0 %v2571_v10, %s9421_s21  ;;  %v1944_v1 = vmul.f32 %v7365_v6, %v1888_v44  ;;  %v1735_v6 = vmul.f32 %v1993_v56, %v7371_v7  ;;  %v2572_v58 = vmul.f32 %v7433_v17, %v1888_v44  ;;  %v2258_v21 = vmul.f32 %v7383_v2, %v1888_v44 }
 0x288   : > { %v1608_v25 = vadd.f32 %v7424_v27, %v1607_v45  ;;  %v1609_v50 = vpop.f32.mrb[9].mxu0  ;;  %v2468_v7 = vmul.f32 %v7464_v46, %v1661_v24 }
 0x289   : > { %2068 = vrot.lane.b32.xlu1 %v2049_v47, %s9417_s20  ;;  %v7601_v56 = vpop.permute.xlu1 %2143 }
 0x28a   : > { %vm1630_vm3 = vcmp.ge.f32.partialorder %v1608_v25, 0.0  ;;  %v1638_v11 = vmul.f32 0.05, %v1608_v25 }
 0x28b   : > { %1963 = vrot.lane.b32.xlu0 %v1944_v1, %s9423_s29 }
 0x28c   : > { %v1646_v3 = vsel %vm1630_vm3, %v1608_v25, %v1638_v11 }
 0x28d   : > { %2173 = vrot.lane.b32.xlu1 %v2154_v23, %s9426_s26  ;;  %1654 = vst.msk [vmem:[#allocation2 + $0x30] sm:$0xff] %vm540_vm0, %v1646_v3  ;;  %v7610_v44 = vpop.permute.xlu1 %2553 }
 0x28f   : > { %1755 = vrot.lane.b32.xlu0 %v1735_v6, %s9430_s15 }
 0x291   : > { %2589 = vrot.lane.b32.xlu1 %v2572_v58, %s9421_s21 }
 0x293   : > { %1860 = vrot.lane.b32.xlu0 %v1840_v18, %s9428_s23 }
 0x294   : > { %v1662_v52 = vld [vmem:[#allocation2 + $0x30] sm:$0xff] }
 0x295   : > { %2381 = vrot.lane.b32.xlu1 %v2363_v31, %s9415_s27  ;;  %1671 = vst.msk [vmem:[#allocation4 + $0x20] sm:$0xff] %vm1666_vm9, %v1662_v52  ;;  %v1680_v17 = vld [vmem:[#allocation2 + $0x2f] sm:$0xff]  ;;  %v1841_v10 = vmul.f32 %v7385_v8, %v1662_v52  ;;  %v2155_v50 = vmul.f32 %v7403_v19, %v1662_v52  ;;  %v2469_v1 = vmul.f32 %v7481_v37, %v1662_v52 }
 0x296   : > { %v1736_v47 = vmul.f32 %v7417_v54, %v1680_v17  ;;  %v2203_v46 = vld [vmem:[#allocation2 + $0x29] sm:$0xff]  ;;  %v2364_v8 = vmul.f32 %v7395_v38, %v1680_v17  ;;  %v2050_v54 = vmul.f32 %v7456_v30, %v1680_v17 }
 0x297   : > { %v1612_v55 = vpop.f32.mrb[10].mxu0  ;;  %2276 = vrot.lane.b32.xlu0 %v2258_v21, %s9475_s25  ;;  %v2259_v14 = vmul.f32 %v7389_v16, %v2203_v46  ;;  %v1945_v60 = vmul.f32 %v2203_v46, %v7438_v26  ;;  %v7619_v26 = vpop.permute.xlu1 %2248  ;;  %v2573_v11 = vmul.f32 %v7405_v36, %v2203_v46 }
 0x298   : > { %v1613_v5 = vadd.f32 %v7424_v27, %v1612_v55  ;;  %v1614_v49 = vpop.f32.mrb[11].mxu0 }
 0x299   : > { %2486 = vrot.lane.b32.xlu1 %v2468_v7, %s9419_s18 }
 0x29a   : > { %vm1631_vm4 = vcmp.ge.f32.partialorder %v1613_v5, 0.0  ;;  %v1639_v2 = vmul.f32 0.05, %v1613_v5 }
 0x29b   : > { %1862 = vrot.lane.b32.xlu0 %v1841_v10, %s9428_s23  ;;  %v7629_v19 = vpop.permute.xlu1 %2253 }
 0x29c   : > { %v1647_v24 = vsel %vm1631_vm4, %v1613_v5, %v1639_v2 }
 0x29d   : > { %1757 = vrot.lane.b32.xlu1 %v1736_v47, %s9430_s15  ;;  %1655 = vst.msk [vmem:[#allocation2 + $0x38] sm:$0xff] %vm540_vm0, %v1647_v24 }
 0x29f   : > { %2278 = vrot.lane.b32.xlu0 %v2259_v14, %s9475_s25 }
 0x2a1   : > { %1965 = vrot.lane.b32.xlu1 %v1945_v60, %s9423_s29 }
 0x2a2   : > { %v1617_v45 = vpop.f32.mrb[12].mxu0 }
 0x2a3   : > { %2383 = vrot.lane.b32.xlu0 %v2364_v8, %s9415_s27  ;;  %v1618_v16 = vadd.f32 %v7424_v27, %v1617_v45  ;;  %v1619_v25 = vpop.f32.mrb[13].mxu0 }
 0x2a4   : > { %v1663_v43 = vld [vmem:[#allocation2 + $0x38] sm:$0xff] }
 0x2a5   : > { %2070 = vrot.lane.b32.xlu1 %v2050_v54, %s9417_s20  ;;  %1672 = vst.msk [vmem:[#allocation4 + $0x28] sm:$0xff] %vm1666_vm9, %v1663_v43  ;;  %vm1632_vm5 = vcmp.ge.f32.partialorder %v1618_v16, 0.0  ;;  %v1640_v38 = vmul.f32 0.05, %v1618_v16  ;;  %v1995_v30 = vld [vmem:[#allocation2 + $0x37] sm:$0xff]  ;;  %v2156_v52 = vmul.f32 %v7508_v57, %v1663_v43  ;;  %v2470_v5 = vmul.f32 %v7591_v39, %v1663_v43 }
 0x2a6   : > { %v2051_v3 = vmul.f32 %v7471_v4, %v1995_v30  ;;  %v1890_v6 = vld [vmem:[#allocation2 + $0x31] sm:$0xff]  ;;  %v7638_v4 = vpop.permute.xlu1 %2358  ;;  %v1737_v17 = vmul.f32 %v1995_v30, %v7399_v42 }
 0x2a7   : > { %2175 = vrot.lane.b32.xlu0 %v2155_v50, %s9426_s26  ;;  %v1648_v23 = vsel %vm1632_vm5, %v1618_v16, %v1640_v38  ;;  %v1946_v31 = vmul.f32 %v7393_v40, %v1890_v6  ;;  %v2574_v55 = vmul.f32 %v7529_v22, %v1890_v6  ;;  %v1842_v40 = vmul.f32 %v7409_v13, %v1663_v43  ;;  %v2417_v38 = vld [vmem:[#allocation2 + $0x50] sm:$0xff] }
 0x2a8   : > { %1656 = vst.msk [vmem:[#allocation2 + $0x40] sm:$0xff] %vm540_vm0, %v1648_v23  ;;  %v2260_v22 = vmul.f32 %v7413_v51, %v1890_v6 }
 0x2a9   : > { %2488 = vrot.lane.b32.xlu1 %v2469_v1, %s9419_s18 }
 0x2aa   : > { %v7648_v57 = vpop.permute.xlu1 %2463 }
 0x2ab   : > { %2591 = vrot.lane.b32.xlu0 %v2573_v11, %s9421_s21  ;;  %v1622_v37 = vpop.f32.mrb[14].mxu0 }
 0x2ac   : > { %v1623_v58 = vadd.f32 %v7424_v27, %v1622_v37  ;;  %v1624_v18 = vpop.f32.mrb[15].mxu0  ;;  %v2365_v27 = vmul.f32 %v7565_v9, %v1995_v30 }
 0x2ad   : > { %2072 = vrot.lane.b32.xlu1 %v2051_v3, %s9417_s20 }
 0x2ae   : > { %vm1633_vm6 = vcmp.ge.f32.partialorder %v1623_v58, 0.0  ;;  %v1641_v21 = vmul.f32 0.05, %v1623_v58  ;;  %v7660_v13 = vpop.permute.xlu1 %2568 }
 0x2af   : > { %1967 = vrot.lane.b32.xlu0 %v1946_v31, %s9423_s29  ;;  %v1664_v36 = vld [vmem:[#allocation2 + $0x40] sm:$0xff]  ;;  %v5683_v31 = vld [vmem:[%s9377_s1 + $0x88] sm:$0xff] }
 0x2b0   : > { %v1649_v7 = vsel %vm1633_vm6, %v1623_v58, %v1641_v21  ;;  %1673 = vst.msk [vmem:[#allocation4 + $0x30] sm:$0xff] %vm1666_vm9, %v1664_v36  ;;  %v1682_v49 = vld [vmem:[#allocation2 + $0x3f] sm:$0xff]  ;;  %v1843_v9 = vmul.f32 %v7415_v0, %v1664_v36  ;;  %v2157_v60 = vmul.f32 %v7601_v56, %v1664_v36 }
 0x2b1   : > { %2177 = vrot.lane.b32.xlu1 %v2156_v52, %s9426_s26  ;;  %1657 = vst.msk [vmem:[#allocation2 + $0x48] sm:$0xff] %vm540_vm0, %v1649_v7  ;;  %v1738_v10 = vmul.f32 %v7494_v41, %v1682_v49  ;;  %v2205_v47 = vld [vmem:[#allocation2 + $0x39] sm:$0xff]  ;;  %v2366_v24 = vmul.f32 %v7431_v63, %v1682_v49  ;;  %v2052_v14 = vmul.f32 %v7582_v32, %v1682_v49 }
 0x2b2   : > { %v2261_v2 = vmul.f32 %v7419_v35, %v2205_v47  ;;  %v1947_v46 = vmul.f32 %v2205_v47, %v7544_v20  ;;  %v2471_v20 = vmul.f32 %v7440_v12, %v1664_v36  ;;  %v2575_v32 = vmul.f32 %v7610_v44, %v2205_v47  ;;  %v5682_v36 = vld [vmem:[%s9377_s1 + $0x80] sm:$0xff] }
 0x2b3   : > { %1759 = vrot.lane.b32.xlu0 %v1737_v17, %s9430_s15 }
 0x2b5   : > { %2593 = vrot.lane.b32.xlu1 %v2574_v55, %s9421_s21  ;;  %v5690_v55 = vld [vmem:[%s9377_s1 + $0xc0] sm:$0xff] }
 0x2b7   : > { %1864 = vrot.lane.b32.xlu0 %v1842_v40, %s9428_s23  ;;  %v5698_v40 = vld [vmem:[%s9377_s1 + $0x100] sm:$0xff] }
 0x2b8   : > { %v7652_v42 = vld [vmem:[#allocation2 + $0x48] sm:$0xff] }
 0x2b9   : > { %2385 = vrot.lane.b32.xlu1 %v2365_v27, %s9415_s27  ;;  %1674 = vst.msk [vmem:[#allocation4 + $0x38] sm:$0xff] %vm1666_vm9, %v7652_v42  ;;  %vm2191_vm9 = vcmask 490880   ;;  %v1892_v8 = vld [vmem:[#allocation2 + $0x41] sm:$0xff]  ;;  %v2207_v45 = vld [vmem:[#allocation2 + $0x49] sm:$0xff]  ;;  %v2472_v3 = vmul.f32 %v7462_v34, %v7652_v42 }
 0x2ba   : > { %v1948_v63 = vmul.f32 %v7428_v61, %v1892_v8  ;;  %v1997_v54 = vld [vmem:[#allocation2 + $0x47] sm:$0xff]  ;;  %v2262_v56 = vmul.f32 %v7619_v26, %v1892_v8  ;;  %v2158_v61 = vmul.f32 %v7446_v48, %v7652_v42  ;;  %v2263_v44 = vmul.f32 %v7629_v19, %v2207_v45  ;;  %v2312_v25 = vld [vmem:[#allocation2 + $0x4f] sm:$0xff] }
 0x2bb   : > { %2280 = vrot.lane.b32.xlu0 %v2260_v22, %s9475_s25  ;;  %v2053_v12 = vmul.f32 %v7436_v62, %v1997_v54  ;;  %v2576_v50 = vmul.f32 %v7453_v59, %v1892_v8  ;;  %v2368_v1 = vmul.f32 %v7638_v4, %v2312_v25  ;;  %v2473_v48 = vmul.f32 %v7648_v57, %v2417_v38  ;;  %v5675_v34 = vld [vmem:[%s9377_s1 + $0x48] sm:$0xff]  ;;  %v2874_v4 = vld [vmem:[%s9377_s1 + $0x10] sm:$0xff]  ;;  %v2876_v25 = vld [vmem:[%s9377_s1 + $0x20] sm:$0xff] }
 0x2bc   : > { %v2367_v23 = vmul.f32 %v7459_v28, %v1997_v54  ;;  %v2578_v59 = vmul.f32 %v7660_v13, %v7260_v33  ;;  %v2873_v28 = vld [vmem:[%s9377_s1 + $0x8] sm:$0xff]  ;;  %v2577_v37 = vmul.f32 %v7466_v53, %v2207_v45  ;;  %v2872_v33 = vld [vmem:[%s9377_s1] sm:$0xff]  ;;  %v5676_v22 = vld [vmem:[%s9377_s1 + $0x50] sm:$0xff] }
 0x2bd   : > { %2490 = vrot.lane.b32.xlu1 %v2470_v5, %s9419_s18  ;;  %v5674_v53 = vld [vmem:[%s9377_s1 + $0x40] sm:$0xff]  ;;  %v5691_v42 = vld [vmem:[%s9377_s1 + $0xc8] sm:$0xff]  ;;  %v2875_v13 = vld [vmem:[%s9377_s1 + $0x18] sm:$0xff] }
 0x2be   : > { %v5685_v54 = vld [vmem:[%s9377_s1 + $0x98] sm:$0xff]  ;;  %v2877_v38 = vld [vmem:[%s9377_s1 + $0x28] sm:$0xff] }
 0x2bf   : > { %1866 = vrot.lane.b32.xlu0 %v1843_v9, %s9428_s23  ;;  %v5706_v9 = vld [vmem:[%s9377_s1 + $0x140] sm:$0xff] }
 0x2c1   : > { %1761 = vrot.lane.b32.xlu1 %v1738_v10, %s9430_s15  ;;  %v1958_v51 = vpop.permute.xlu0 %1957 }
 0x2c2   : > { %v1750_v39 = vpop.permute.xlu1 %1749  ;;  %1982 = vst.msk [vmem:[#allocation3] sm:$0xff] %vm1981_vm7, %v1958_v51  ;;  %v5699_v51 = vld [vmem:[%s9377_s1 + $0x108] sm:$0xff] }
 0x2c3   : > { %1773 = vst.msk [vmem:[#allocation3 + $0x10] sm:$0xff] %vm1771_vm11, %v1750_v39  ;;  %2282 = vrot.lane.b32.xlu0 %v2261_v2, %s9475_s25  ;;  %v5684_v39 = vld [vmem:[%s9377_s1 + $0x90] sm:$0xff] }
 0x2c5   : > { %1969 = vrot.lane.b32.xlu1 %v1947_v46, %s9423_s29  ;;  %v2063_v0 = vpop.permute.xlu0 %2062 }
 0x2c6   : > { %v1855_v41 = vpop.permute.xlu1 %1854  ;;  %2087 = vst.msk [vmem:[#allocation3] sm:$0xff] %vm2086_vm8, %v2063_v0 }
 0x2c7   : > { %1878 = vst.msk [vmem:[#allocation3 + $0x10] sm:$0xff] %vm1876_vm13, %v1855_v41  ;;  %2387 = vrot.lane.b32.xlu0 %v2366_v24, %s9415_s27  ;;  %v5677_v41 = vld [vmem:[%s9377_s1 + $0x58] sm:$0xff]  ;;  %v5714_v24 = vld [vmem:[%s9377_s1 + $0x180] sm:$0xff] }
 0x2c9   : > { %2074 = vrot.lane.b32.xlu1 %v2052_v14, %s9417_s20 }
 0x2ca   : > { %v2168_v35 = vpop.permute.xlu1 %2167 }
 0x2cb   : > { %2192 = vst.msk [vmem:[#allocation3] sm:$0xff] %vm2191_vm9, %v2168_v35  ;;  %2492 = vrot.lane.b32.xlu0 %v2471_v20, %s9419_s18  ;;  %v5707_v20 = vld [vmem:[%s9377_s1 + $0x148] sm:$0xff] }
 0x2cd   : > { %2179 = vrot.lane.b32.xlu1 %v2157_v60, %s9426_s26  ;;  %v5692_v60 = vld [vmem:[%s9377_s1 + $0xd0] sm:$0xff] }
 0x2cf   : > { %1971 = vrot.lane.b32.xlu0 %v1948_v63, %s9423_s29  ;;  %s9501_s29 = smov 44  }
 0x2d1   : > { %2595 = vrot.lane.b32.xlu1 %v2575_v32, %s9421_s21 }
 0x2d3   : > { %2076 = vrot.lane.b32.xlu0 %v2053_v12, %s9417_s20  ;;  %v5722_v12 = vld [vmem:[%s9377_s1 + $0x1c0] sm:$0xff]  ;;  %s9493_s20 = smov 20  }
 0x2d5   : > { %2284 = vrot.lane.b32.xlu1 %v2262_v56, %s9475_s25 }
 0x2d6   : > { %v2065_v43 = vpop.permute.xlu0 %2064 }
 0x2d7   : > { %v1960_v16 = vpop.permute.xlu1 %1959  ;;  %2181 = vrot.lane.b32.xlu0 %v2158_v61, %s9426_s26 }
 0x2d8   : > { %1983 = vst.msk [vmem:[#allocation3 + $0x10] sm:$0xff] %vm1981_vm7, %v1960_v16  ;;  %v5693_v16 = vld [vmem:[%s9377_s1 + $0xd8] sm:$0xff] }
 0x2d9   : > { %2088 = vst.msk [vmem:[#allocation3 + $0x10] sm:$0xff] %vm2086_vm8, %v2065_v43  ;;  %2286 = vrot.lane.b32.xlu1 %v2263_v44, %s9475_s25  ;;  %v5715_v43 = vld [vmem:[%s9377_s1 + $0x188] sm:$0xff] }
 0x2da   : > { %v2170_v62 = vpop.permute.xlu0 %2169 }
 0x2db   : > { %v1752_v26 = vpop.permute.xlu1 %1751  ;;  %2193 = vst.msk [vmem:[#allocation3 + $0x10] sm:$0xff] %vm2191_vm9, %v2170_v62  ;;  %2597 = vrot.lane.b32.xlu0 %v2576_v50, %s9421_s21  ;;  %v5723_v62 = vld [vmem:[%s9377_s1 + $0x1c8] sm:$0xff] }
 0x2dc   : > { %1774 = vst.msk [vmem:[#allocation3 + $0x20] sm:$0xff] %vm1771_vm11, %v1752_v26 }
 0x2dd   : > { %2391 = vrot.lane.b32.xlu1 %v2368_v1, %s9415_s27  ;;  %v5700_v1 = vld [vmem:[%s9377_s1 + $0x110] sm:$0xff] }
 0x2df   : > { %v1857_v30 = vpop.permute.xlu1 %1856  ;;  %2389 = vrot.lane.b32.xlu0 %v2367_v23, %s9415_s27  ;;  %v5730_v23 = vld [vmem:[%s9377_s1 + $0x200] sm:$0xff]  ;;  %s9495_s27 = smov 32  }
 0x2e0   : > { %1879 = vst.msk [vmem:[#allocation3 + $0x20] sm:$0xff] %vm1876_vm13, %v1857_v30 }
 0x2e1   : > { %2496 = vrot.lane.b32.xlu1 %v2473_v48, %s9419_s18 }
 0x2e3   : > { %v2273_v11 = vpop.permute.xlu1 %2272  ;;  %2494 = vrot.lane.b32.xlu0 %v2472_v3, %s9419_s18  ;;  %s9494_s18 = smov 80  }
 0x2e4   : > { %2297 = vst.msk [vmem:[#allocation3] sm:$0xff] %vm2296_vm10, %v2273_v11 }
 0x2e5   : > { %2601 = vrot.lane.b32.xlu1 %v2578_v59, %s9421_s21  ;;  %v1754_v6 = vpop.permute.xlu0 %1753  ;;  %v5701_v59 = vld [vmem:[%s9377_s1 + $0x118] sm:$0xff] }
 0x2e6   : > { %1775 = vst.msk [vmem:[#allocation3 + $0x30] sm:$0xff] %vm1771_vm11, %v1754_v6  ;;  %v5731_v6 = vld [vmem:[%s9377_s1 + $0x208] sm:$0xff] }
 0x2e7   : > { %v2378_v19 = vpop.permute.xlu1 %2377  ;;  %2599 = vrot.lane.b32.xlu0 %v2577_v37, %s9421_s21  ;;  %s9500_s21 = smov 68  }
 0x2e8   : > { %2402 = vst.msk [vmem:[#allocation3] sm:$0xff] %vm2401_vm12, %v2378_v19 }
 0x2e9   : > { %2887 = vperm.xlu1 %6241, %v2873_v28   ;;  %v1859_v58 = vpop.permute.xlu0 %1858  ;;  %v5678_v28 = vld [vmem:[%s9377_s1 + $0x60] sm:$0xff] }
 0x2ea   : > { %1880 = vst.msk [vmem:[#allocation3 + $0x30] sm:$0xff] %vm1876_vm13, %v1859_v58 }
 0x2eb   : > { %v2483_v18 = vpop.permute.xlu1 %2482  ;;  %2882 = vperm.xlu0 %6240, %v2872_v33   ;;  %v5708_v33 = vld [vmem:[%s9377_s1 + $0x150] sm:$0xff] }
 0x2ec   : > { %2507 = vst.msk [vmem:[#allocation3] sm:$0xff] %vm2506_vm14, %v2483_v18 }
 0x2ed   : > { %2991 = vperm.xlu1 %6241, %v5675_v34   ;;  %v2275_v52 = vpop.permute.xlu0 %2274  ;;  %v5686_v34 = vld [vmem:[%s9377_s1 + $0xa0] sm:$0xff] }
 0x2ee   : > { %2298 = vst.msk [vmem:[#allocation3 + $0x10] sm:$0xff] %vm2296_vm10, %v2275_v52  ;;  %v5716_v52 = vld [vmem:[%s9377_s1 + $0x190] sm:$0xff] }
 0x2ef   : > { %v1962_v21 = vpop.permute.xlu1 %1961  ;;  %2986 = vperm.xlu0 %6240, %v5674_v53  }
 0x2f0   : > { %1984 = vst.msk [vmem:[#allocation3 + $0x20] sm:$0xff] %vm1981_vm7, %v1962_v21 }
 0x2f1   : > { %3095 = vperm.xlu1 %6241, %v5683_v31   ;;  %v2380_v7 = vpop.permute.xlu0 %2379  ;;  %v5679_v31 = vld [vmem:[%s9377_s1 + $0x68] sm:$0xff] }
 0x2f2   : > { %2403 = vst.msk [vmem:[#allocation3 + $0x10] sm:$0xff] %vm2401_vm12, %v2380_v7  ;;  %v5694_v7 = vld [vmem:[%s9377_s1 + $0xe0] sm:$0xff] }
 0x2f3   : > { %v2067_v17 = vpop.permute.xlu1 %2066  ;;  %3090 = vperm.xlu0 %6240, %v5682_v36  }
 0x2f4   : > { %2089 = vst.msk [vmem:[#allocation3 + $0x20] sm:$0xff] %vm2086_vm8, %v2067_v17 }
 0x2f5   : > { %2892 = vperm.xlu1 %6241, %v2874_v4   ;;  %v2172_v27 = vpop.permute.xlu0 %2171  ;;  %v5709_v4 = vld [vmem:[%s9377_s1 + $0x158] sm:$0xff] }
 0x2f6   : > { %2194 = vst.msk [vmem:[#allocation3 + $0x20] sm:$0xff] %vm2191_vm9, %v2172_v27  ;;  %v5687_v27 = vld [vmem:[%s9377_s1 + $0xa8] sm:$0xff] }
 0x2f7   : > { %v2485_v57 = vpop.permute.xlu1 %2484  ;;  %3194 = vperm.xlu0 %6240, %v5690_v55  }
 0x2f8   : > { %2508 = vst.msk [vmem:[#allocation3 + $0x10] sm:$0xff] %vm2506_vm14, %v2485_v57  ;;  %v5724_v57 = vld [vmem:[%s9377_s1 + $0x1d0] sm:$0xff] }
 0x2f9   : > { %3298 = vperm.xlu1 %6241, %v5698_v40   ;;  %v2588_v5 = vpop.permute.xlu0 %2587 }
 0x2fa   : > { %2612 = vst.msk [vmem:[#allocation3] sm:$0xff] %vm2611_vm15, %v2588_v5  ;;  %v5717_v5 = vld [vmem:[%s9377_s1 + $0x198] sm:$0xff] }
 0x2fb   : > { %v2069_v49 = vpop.permute.xlu1 %2068  ;;  %3199 = vperm.xlu0 %6240, %v5691_v42  }
 0x2fd   : > { %2996 = vperm.xlu1 %6241, %v5676_v22   ;;  %v1964_v10 = vpop.permute.xlu0 %1963 }
 0x2fe   : > { %1985 = vst.msk [vmem:[#allocation3 + $0x30] sm:$0xff] %vm1981_vm7, %v1964_v10  ;;  %v2878_v10 = vld [vmem:[%s9377_s1 + $0x30] sm:$0xff] }
 0x2ff   : > { %v2174_v47 = vpop.permute.xlu1 %2173  ;;  %2090 = vst.msk [vmem:[#allocation3 + $0x30] sm:$0xff] %vm2086_vm8, %v2069_v49  ;;  %2897 = vperm.xlu0 %6240, %v2875_v13   ;;  %v5695_v49 = vld [vmem:[%s9377_s1 + $0xe8] sm:$0xff] }
 0x300   : > { %2195 = vst.msk [vmem:[#allocation3 + $0x30] sm:$0xff] %vm2191_vm9, %v2174_v47  ;;  %v5725_v47 = vld [vmem:[%s9377_s1 + $0x1d8] sm:$0xff] }
 0x301   : > { %3402 = vperm.xlu1 %6241, %v5706_v9   ;;  %v1756_v2 = vpop.permute.xlu0 %1755  ;;  %v2620_v0 = vld [vmem:[#allocation3] sm:$0xff] }
 0x302   : > { %1776 = vst.msk [vmem:[#allocation3 + $0x40] sm:$0xff] %vm1771_vm11, %v1756_v2  ;;  %5942 = vmatprep.mubr.msk.f32.mxu1 %vm2649_vm1, %v2620_v0  ;;  %v5702_v2 = vld [vmem:[%s9377_s1 + $0x120] sm:$0xff] }
 0x303   : > { %v2590_v46 = vpop.permute.xlu1 %2589  ;;  %3303 = vperm.xlu0 %6240, %v5699_v51  }
 0x304   : > { %2613 = vst.msk [vmem:[#allocation3 + $0x10] sm:$0xff] %vm2611_vm15, %v2590_v46  ;;  %v2879_v46 = vld [vmem:[%s9377_s1 + $0x38] sm:$0xff] }
 0x305   : > { %3100 = vperm.xlu1 %6241, %v5684_v39   ;;  %v1861_v14 = vpop.permute.xlu0 %1860 }
 0x306   : > { %1881 = vst.msk [vmem:[#allocation3 + $0x40] sm:$0xff] %vm1876_vm13, %v1861_v14  ;;  %v5703_v14 = vld [vmem:[%s9377_s1 + $0x128] sm:$0xff] }
 0x307   : > { %v2382_v35 = vpop.permute.xlu1 %2381  ;;  %3001 = vperm.xlu0 %6240, %v5677_v41  }
 0x309   : > { %3506 = vperm.xlu1 %6241, %v5714_v24   ;;  %v2277_v8 = vpop.permute.xlu0 %2276  ;;  %v5732_v24 = vld [vmem:[%s9377_s1 + $0x210] sm:$0xff] }
 0x30a   : > { %2299 = vst.msk [vmem:[#allocation3 + $0x20] sm:$0xff] %vm2296_vm10, %v2277_v8  ;;  %v5733_v8 = vld [vmem:[%s9377_s1 + $0x218] sm:$0xff] }
 0x30b   : > { %v2487_v63 = vpop.permute.xlu1 %2486  ;;  %v2621_v32 = vld [vmem:[#allocation3 + $0x10] sm:$0xff]  ;;  %2404 = vst.msk [vmem:[#allocation3 + $0x20] sm:$0xff] %vm2401_vm12, %v2382_v35  ;;  %3407 = vperm.xlu0 %6240, %v5707_v20  }
 0x30c   : > { %5943 = vmatmul.mubr.msk.f32.vlgmr.msra.gmra.mrb[0].mxu1 %vm2649_vm1, %v2621_v32  ;;  %2509 = vst.msk [vmem:[#allocation3 + $0x20] sm:$0xff] %vm2506_vm14, %v2487_v63 }
 0x30d   : > { %3204 = vperm.xlu1 %6241, %v5692_v60   ;;  %v1863_v56 = vpop.permute.xlu0 %1862  ;;  %v5680_v60 = vld [vmem:[%s9377_s1 + $0x70] sm:$0xff] }
 0x30f   : > { %v1758_v45 = vpop.permute.xlu1 %1757  ;;  %3105 = vperm.xlu0 %6240, %v5685_v54   ;;  %v5710_v54 = vld [vmem:[%s9377_s1 + $0x160] sm:$0xff] }
 0x310   : > { %1777 = vst.msk [vmem:[#allocation3 + $0x50] sm:$0xff] %vm1771_vm11, %v1758_v45 }
 0x311   : > { %1882 = vst.msk [vmem:[#allocation3 + $0x50] sm:$0xff] %vm1876_vm13, %v1863_v56  ;;  %3610 = vperm.xlu1 %6241, %v5722_v12   ;;  %v2279_v61 = vpop.permute.xlu0 %2278  ;;  %v5688_v12 = vld [vmem:[%s9377_s1 + $0xb0] sm:$0xff] }
 0x312   : > { %2300 = vst.msk [vmem:[#allocation3 + $0x30] sm:$0xff] %vm2296_vm10, %v2279_v61  ;;  %v5718_v61 = vld [vmem:[%s9377_s1 + $0x1a0] sm:$0xff] }
 0x313   : > { %v1966_v44 = vpop.permute.xlu1 %1965  ;;  %3511 = vperm.xlu0 %6240, %v5715_v43  }
 0x314   : > { %1986 = vst.msk [vmem:[#allocation3 + $0x40] sm:$0xff] %vm1981_vm7, %v1966_v44 }
 0x315   : > { %3209 = vperm.xlu1 %6241, %v5693_v16   ;;  %v2384_v26 = vpop.permute.xlu0 %2383  ;;  %v5681_v16 = vld [vmem:[%s9377_s1 + $0x78] sm:$0xff] }
 0x316   : > { %2405 = vst.msk [vmem:[#allocation3 + $0x30] sm:$0xff] %vm2401_vm12, %v2384_v26  ;;  %v5696_v26 = vld [vmem:[%s9377_s1 + $0xf0] sm:$0xff] }
 0x317   : > { %v2071_v50 = vpop.permute.xlu1 %2070  ;;  %2902 = vperm.xlu0 %6240, %v2876_v25  }
 0x318   : > { %2091 = vst.msk [vmem:[#allocation3 + $0x40] sm:$0xff] %vm2086_vm8, %v2071_v50 }
 0x319   : > { %3615 = vperm.xlu1 %6241, %v5723_v62   ;;  %v2176_v48 = vpop.permute.xlu0 %2175  ;;  %v5711_v62 = vld [vmem:[%s9377_s1 + $0x168] sm:$0xff] }
 0x31a   : > { %2196 = vst.msk [vmem:[#allocation3 + $0x40] sm:$0xff] %vm2191_vm9, %v2176_v48  ;;  %v5726_v48 = vld [vmem:[%s9377_s1 + $0x1e0] sm:$0xff] }
 0x31b   : > { %v2489_v30 = vpop.permute.xlu1 %2488  ;;  %3308 = vperm.xlu0 %6240, %v5700_v1  }
 0x31c   : > { %2510 = vst.msk [vmem:[#allocation3 + $0x30] sm:$0xff] %vm2506_vm14, %v2489_v30 }
 0x31d   : > { %2907 = vperm.xlu1 %6241, %v2877_v38   ;;  %v2592_v11 = vpop.permute.xlu0 %2591  ;;  %v5689_v38 = vld [vmem:[%s9377_s1 + $0xb8] sm:$0xff] }
 0x31e   : > { %2614 = vst.msk [vmem:[#allocation3 + $0x20] sm:$0xff] %vm2611_vm15, %v2592_v11  ;;  %v5719_v11 = vld [vmem:[%s9377_s1 + $0x1a8] sm:$0xff] }
 0x31f   : > { %v2073_v3 = vpop.permute.xlu1 %2072  ;;  %3714 = vperm.xlu0 %6240, %v5730_v23  }
 0x321   : > { %3313 = vperm.xlu1 %6241, %v5701_v59   ;;  %v1968_v19 = vpop.permute.xlu0 %1967 }
 0x322   : > { %1987 = vst.msk [vmem:[#allocation3 + $0x50] sm:$0xff] %vm1981_vm7, %v1968_v19  ;;  %v5734_v19 = vld [vmem:[%s9377_s1 + $0x220] sm:$0xff] }
 0x323   : > { %v2178_v37 = vpop.permute.xlu1 %2177  ;;  %2092 = vst.msk [vmem:[#allocation3 + $0x50] sm:$0xff] %vm2086_vm8, %v2073_v3  ;;  %3006 = vperm.xlu0 %6240, %v5678_v28   ;;  %v5704_v3 = vld [vmem:[%s9377_s1 + $0x130] sm:$0xff] }
 0x324   : > { %2197 = vst.msk [vmem:[#allocation3 + $0x50] sm:$0xff] %vm2191_vm9, %v2178_v37  ;;  %v5727_v37 = vld [vmem:[%s9377_s1 + $0x1e8] sm:$0xff] }
 0x325   : > { %3719 = vperm.xlu1 %6241, %v5731_v6   ;;  %v1760_v58 = vpop.permute.xlu0 %1759  ;;  %v2622_v53 = vld [vmem:[#allocation3 + $0x20] sm:$0xff]  ;;  %v5697_v6 = vld [vmem:[%s9377_s1 + $0xf8] sm:$0xff] }
 0x326   : > { %1778 = vst.msk [vmem:[#allocation3 + $0x60] sm:$0xff] %vm1771_vm11, %v1760_v58  ;;  %5945 = vmatprep.mubr.msk.f32.mxu1 %vm2649_vm1, %v2622_v53  ;;  %v5713_v53 = vld [vmem:[%s9377_s1 + $0x178] sm:$0xff] }
 0x327   : > { %v2594_v18 = vpop.permute.xlu1 %2593  ;;  %3412 = vperm.xlu0 %6240, %v5708_v33   ;;  %v5712_v33 = vld [vmem:[%s9377_s1 + $0x170] sm:$0xff] }
 0x328   : > { %2615 = vst.msk [vmem:[#allocation3 + $0x30] sm:$0xff] %vm2611_vm15, %v2594_v18  ;;  %v5705_v18 = vld [vmem:[%s9377_s1 + $0x138] sm:$0xff] }
 0x329   : > { %3110 = vperm.xlu1 %6241, %v5686_v34   ;;  %v1865_v21 = vpop.permute.xlu0 %1864 }
 0x32a   : > { %1883 = vst.msk [vmem:[#allocation3 + $0x60] sm:$0xff] %vm1876_vm13, %v1865_v21  ;;  %v5721_v21 = vld [vmem:[%s9377_s1 + $0x1b8] sm:$0xff] }
 0x32b   : > { %v2386_v36 = vpop.permute.xlu1 %2385  ;;  %3011 = vperm.xlu0 %6240, %v5679_v31  }
 0x32d   : > { %3516 = vperm.xlu1 %6241, %v5716_v52   ;;  %v2281_v17 = vpop.permute.xlu0 %2280  ;;  %v5735_v52 = vld [vmem:[%s9377_s1 + $0x228] sm:$0xff] }
 0x32e   : > { %2301 = vst.msk [vmem:[#allocation3 + $0x40] sm:$0xff] %vm2296_vm10, %v2281_v17  ;;  %v5729_v17 = vld [vmem:[%s9377_s1 + $0x1f8] sm:$0xff] }
 0x32f   : > { %v2491_v55 = vpop.permute.xlu1 %2490  ;;  %v2623_v40 = vld [vmem:[#allocation3 + $0x30] sm:$0xff]  ;;  %2406 = vst.msk [vmem:[#allocation3 + $0x40] sm:$0xff] %vm2401_vm12, %v2386_v36  ;;  %3417 = vperm.xlu0 %6240, %v5709_v4  }
 0x330   : > { %5946 = vmatmul.mubr.msk.f32.gmra.mrb[2].mxu1 %vm2649_vm1, %v2623_v40  ;;  %2511 = vst.msk [vmem:[#allocation3 + $0x40] sm:$0xff] %vm2506_vm14, %v2491_v55 }
 0x331   : > { %3214 = vperm.xlu1 %6241, %v5694_v7   ;;  %v1867_v42 = vpop.permute.xlu0 %1866  ;;  %v5720_v7 = vld [vmem:[%s9377_s1 + $0x1b0] sm:$0xff] }
 0x333   : > { %v1762_v22 = vpop.permute.xlu1 %1761  ;;  %3115 = vperm.xlu0 %6240, %v5687_v27   ;;  %v5728_v27 = vld [vmem:[%s9377_s1 + $0x1f0] sm:$0xff] }
 0x334   : > { %1779 = vst.msk [vmem:[#allocation3 + $0x70] sm:$0xff] %vm1771_vm11, %v1762_v22 }
 0x335   : > { %1884 = vst.msk [vmem:[#allocation3 + $0x70] sm:$0xff] %vm1876_vm13, %v1867_v42  ;;  %3620 = vperm.xlu1 %6241, %v5724_v57   ;;  %v2283_v13 = vpop.permute.xlu0 %2282  ;;  %v5737_v57 = vld [vmem:[%s9377_s1 + $0x238] sm:$0xff] }
 0x336   : > { %2302 = vst.msk [vmem:[#allocation3 + $0x50] sm:$0xff] %vm2296_vm10, %v2283_v13 }
 0x337   : > { %v1970_v9 = vpop.permute.xlu1 %1969  ;;  %3521 = vperm.xlu0 %6240, %v5717_v5   ;;  %v5736_v5 = vld [vmem:[%s9377_s1 + $0x230] sm:$0xff] }
 0x338   : > { %1988 = vst.msk [vmem:[#allocation3 + $0x60] sm:$0xff] %vm1981_vm7, %v1970_v9 }
 0x339   : > { %3219 = vperm.xlu1 %6241, %v5695_v49   ;;  %v2388_v51 = vpop.permute.xlu0 %2387  ;;  %v2864_v49 = vld [vmem:[#allocation2 + $0x7] sm:$0xff] }
 0x33a   : > { %2407 = vst.msk [vmem:[#allocation3 + $0x50] sm:$0xff] %vm2401_vm12, %v2388_v51 }
 0x33b   : > { %v2075_v39 = vpop.permute.xlu1 %2074  ;;  %2912 = vperm.xlu0 %6240, %v2878_v10  }
 0x33c   : > { %2093 = vst.msk [vmem:[#allocation3 + $0x60] sm:$0xff] %vm2086_vm8, %v2075_v39 }
 0x33d   : > { %3625 = vperm.xlu1 %6241, %v5725_v47   ;;  %v2493_v0 = vpop.permute.xlu0 %2492  ;;  %v2968_v47 = vld [vmem:[#allocation2 + $0x8] sm:$0xff] }
 0x33e   : > { %2512 = vst.msk [vmem:[#allocation3 + $0x50] sm:$0xff] %vm2506_vm14, %v2493_v0 }
 0x33f   : > { %v2180_v41 = vpop.permute.xlu1 %2179  ;;  %3318 = vperm.xlu0 %6240, %v5702_v2  }
 0x340   : > { %2198 = vst.msk [vmem:[#allocation3 + $0x60] sm:$0xff] %vm2191_vm9, %v2180_v41 }
 0x341   : > { %2917 = vperm.xlu1 %6241, %v2879_v46   ;;  %v1972_v35 = vpop.permute.xlu0 %1971 }
 0x342   : > { %1989 = vst.msk [vmem:[#allocation3 + $0x70] sm:$0xff] %vm1981_vm7, %v1972_v35 }
 0x343   : > { %v2596_v20 = vpop.permute.xlu1 %2595  ;;  %3724 = vperm.xlu0 %6240, %v5732_v24  }
 0x344   : > { %2616 = vst.msk [vmem:[#allocation3 + $0x40] sm:$0xff] %vm2611_vm15, %v2596_v20 }
 0x345   : > { %3323 = vperm.xlu1 %6241, %v5703_v14   ;;  %v2077_v63 = vpop.permute.xlu0 %2076 }
 0x346   : > { %2094 = vst.msk [vmem:[#allocation3 + $0x70] sm:$0xff] %vm2086_vm8, %v2077_v63 }
 0x347   : > { %v2285_v32 = vpop.permute.xlu1 %2284  ;;  %3016 = vperm.xlu0 %6240, %v5680_v60  }
 0x348   : > { %2303 = vst.msk [vmem:[#allocation3 + $0x60] sm:$0xff] %vm2296_vm10, %v2285_v32 }
 0x349   : > { %3729 = vperm.xlu1 %6241, %v5733_v8   ;;  %v2182_v56 = vpop.permute.xlu0 %2181 }
 0x34a   : > { %2199 = vst.msk [vmem:[#allocation3 + $0x70] sm:$0xff] %vm2191_vm9, %v2182_v56 }
 0x34b   : > { %v2287_v45 = vpop.permute.xlu1 %2286  ;;  %v2624_v43 = vld [vmem:[#allocation3 + $0x40] sm:$0xff]  ;;  %3422 = vperm.xlu0 %6240, %v5710_v54  }
 0x34c   : > { %5948 = vmatprep.mubr.msk.f32.mxu1 %vm2649_vm1, %v2624_v43  ;;  %2304 = vst.msk [vmem:[#allocation3 + $0x70] sm:$0xff] %vm2296_vm10, %v2287_v45 }
 0x34d   : > { %3120 = vperm.xlu1 %6241, %v5688_v12   ;;  %v2598_v44 = vpop.permute.xlu0 %2597 }
 0x34e   : > { %2617 = vst.msk [vmem:[#allocation3 + $0x50] sm:$0xff] %vm2611_vm15, %v2598_v44 }
 0x34f   : > { %v2392_v25 = vpop.permute.xlu1 %2391  ;;  %3021 = vperm.xlu0 %6240, %v5681_v16  }
 0x350   : > { %2409 = vst.msk [vmem:[#allocation3 + $0x70] sm:$0xff] %vm2401_vm12, %v2392_v25 }
 0x351   : > { %3526 = vperm.xlu1 %6241, %v5718_v61   ;;  %v2390_v50 = vpop.permute.xlu0 %2389 }
 0x352   : > { %2408 = vst.msk [vmem:[#allocation3 + $0x60] sm:$0xff] %vm2401_vm12, %v2390_v50 }
 0x353   : > { %v2497_v1 = vpop.permute.xlu1 %2496  ;;  %3427 = vperm.xlu0 %6240, %v5711_v62  }
 0x354   : > { %2514 = vst.msk [vmem:[#allocation3 + $0x70] sm:$0xff] %vm2506_vm14, %v2497_v1 }
 0x355   : > { %3224 = vperm.xlu1 %6241, %v5696_v26   ;;  %v2495_v30 = vpop.permute.xlu0 %2494  ;;  %v2625_v59 = vld [vmem:[#allocation3 + $0x50] sm:$0xff] }
 0x356   : > { %2513 = vst.msk [vmem:[#allocation3 + $0x60] sm:$0xff] %vm2506_vm14, %v2495_v30  ;;  %5949 = vmatmul.mubr.msk.f32.gmra.mrb[4].mxu1 %vm2649_vm1, %v2625_v59 }
 0x357   : > { %v2602_v23 = vpop.permute.xlu1 %2601  ;;  %3125 = vperm.xlu0 %6240, %v5689_v38  }
 0x358   : > { %2619 = vst.msk [vmem:[#allocation3 + $0x70] sm:$0xff] %vm2611_vm15, %v2602_v23 }
 0x359   : > { %3630 = vperm.xlu1 %6241, %v5726_v48   ;;  %v2600_v28 = vpop.permute.xlu0 %2599 }
 0x35a   : > { %2618 = vst.msk [vmem:[#allocation3 + $0x60] sm:$0xff] %vm2611_vm15, %v2600_v28 }
 0x35b   : > { %3531 = vperm.xlu0 %6240, %v5719_v11  }
 0x35d   : > { %3328 = vperm.xlu1 %6241, %v5704_v3  }
 0x35f   : > { %3229 = vperm.xlu0 %6240, %v5697_v6   ;;  %v2627_v58 = vld [vmem:[#allocation3 + $0x70] sm:$0xff] }
 0x361   : > { %3734 = vperm.xlu1 %6241, %v5734_v19   ;;  %v2626_v34 = vld [vmem:[#allocation3 + $0x60] sm:$0xff] }
 0x362   : > { %5951 = vmatprep.mubr.msk.f32.mxu1 %vm2649_vm1, %v2626_v34 }
 0x363   : > { %3635 = vperm.xlu0 %6240, %v5727_v37   ;;  %5952 = vmatmul.mubr.msk.f32.gmra.mrb[6].mxu1 %vm2649_vm1, %v2627_v58 }
 0x365   : > { %3432 = vperm.xlu1 %6241, %v5712_v33  }
 0x367   : > { %3333 = vperm.xlu0 %6240, %v5705_v18  }
 0x368   : > { %v7980_v31 = vpop.permute.xlu1 %2887 }
 0x369   : > { %3437 = vperm.xlu1 %6241, %v5713_v53  }
 0x36a   : > { %v2883_v36 = vpop.permute.xlu0 %2882 }
 0x36b   : > { %3739 = vperm.xlu0 %6240, %v5735_v52   ;;  %v2920_v10 = vmul.f32 %v2883_v36, %v2864_v49 }
 0x36c   : > { %v7988_v4 = vpop.permute.xlu1 %2991 }
 0x36d   : > { %3541 = vperm.xlu1 %6241, %v5721_v21  }
 0x36e   : > { %v2987_v55 = vpop.permute.xlu0 %2986 }
 0x36f   : > { %3536 = vperm.xlu0 %6240, %v5720_v7   ;;  %v3024_v2 = vmul.f32 %v2987_v55, %v2968_v47 }
 0x370   : > { %v7996_v40 = vpop.permute.xlu1 %3095 }
 0x371   : > { %3645 = vperm.xlu1 %6241, %v5729_v17  }
 0x372   : > { %v8004_v42 = vpop.permute.xlu0 %3090 }
 0x373   : > { %3640 = vperm.xlu0 %6240, %v5728_v27  }
 0x374   : > { %v8006_v22 = vpop.permute.xlu1 %2892 }
 0x375   : > { %3749 = vperm.xlu1 %6241, %v5737_v57  }
 0x376   : > { %v8011_v13 = vpop.permute.xlu0 %3194 }
 0x377   : > { %3744 = vperm.xlu0 %6240, %v5736_v5   ;;  %v8120_v5 = vld [vmem:[%s9484_s5] ss:$0 sm:$0xff] }
 0x378   : > { %v8013_v9 = vpop.permute.xlu1 %3298 }
 0x37a   : > { %v8015_v51 = vpop.permute.xlu0 %3199 }
 0x37b   : > { %2936 = vrot.lane.b32.xlu0 %v2920_v10, %s9430_s15 }
 0x37c   : > { %v8017_v39 = vpop.permute.xlu1 %2996 }
 0x37e   : > { %v8020_v46 = vpop.permute.xlu0 %2897 }
 0x37f   : > { %3040 = vrot.lane.b32.xlu0 %v3024_v2, %s9428_s23 }
 0x380   : > { %v8022_v0 = vpop.permute.xlu1 %3402 }
 0x382   : > { %v8025_v41 = vpop.permute.xlu0 %3303 }
 0x384   : > { %v8027_v24 = vpop.permute.xlu1 %3100 }
 0x386   : > { %v8029_v14 = vpop.permute.xlu0 %3001 }
 0x388   : > { %v8031_v35 = vpop.permute.xlu1 %3506 }
 0x38a   : > { %v8033_v20 = vpop.permute.xlu0 %3407 }
 0x38c   : > { %v8035_v60 = vpop.permute.xlu1 %3204 }
 0x38e   : > { %v8037_v8 = vpop.permute.xlu0 %3105 }
 0x390   : > { %v8039_v63 = vpop.permute.xlu1 %3610 }
 0x392   : > { %v8041_v32 = vpop.permute.xlu0 %3511 }
 0x394   : > { %v8043_v54 = vpop.permute.xlu1 %3209 }
 0x396   : > { %v8045_v12 = vpop.permute.xlu0 %2902 }
 0x398   : > { %v8047_v56 = vpop.permute.xlu1 %3615 }
 0x39a   : > { %v8049_v45 = vpop.permute.xlu0 %3308 }
 0x39c   : > { %v8051_v43 = vpop.permute.xlu1 %2907 }
 0x39e   : > { %v8053_v16 = vpop.permute.xlu0 %3714 }
 0x3a0   : > { %v8055_v61 = vpop.permute.xlu1 %3313 }
 0x3a2   : > { %v8057_v44 = vpop.permute.xlu0 %3006 }
 0x3a4   : > { %v8059_v25 = vpop.permute.xlu1 %3719 }
 0x3a6   : > { %v8061_v62 = vpop.permute.xlu0 %3412 }
 0x3a8   : > { %v8063_v26 = vpop.permute.xlu1 %3110 }
 0x3aa   : > { %v8065_v50 = vpop.permute.xlu0 %3011 }
 0x3ac   : > { %v8067_v1 = vpop.permute.xlu1 %3516 }
 0x3ae   : > { %v8069_v38 = vpop.permute.xlu0 %3417 }
 0x3b0   : > { %v8071_v48 = vpop.permute.xlu1 %3214 }
 0x3b2   : > { %v8073_v30 = vpop.permute.xlu0 %3115 }
 0x3b4   : > { %v8075_v23 = vpop.permute.xlu1 %3620 }
 0x3b6   : > { %v8077_v59 = vpop.permute.xlu0 %3521 }
 0x3b8   : > { %v8079_v11 = vpop.permute.xlu1 %3219 }
 0x3ba   : > { %v8081_v3 = vpop.permute.xlu0 %2912 }
 0x3bc   : > { %v8083_v28 = vpop.permute.xlu1 %3625 }
 0x3be   : > { %v8085_v6 = vpop.permute.xlu0 %3318 }
 0x3c0   : > { %v8087_v19 = vpop.permute.xlu1 %2917 }
 0x3c1   : > { %9476 = vst [vmem:[#allocation25_spill] sm:$0xff] %v8087_v19 }
 0x3c2   : > { %v8089_v37 = vpop.permute.xlu0 %3724 }
 0x3c4   : > { %v8091_v33 = vpop.permute.xlu1 %3323 }
 0x3c6   : > { %v8093_v34 = vpop.permute.xlu0 %3016 }
 0x3c8   : > { %v8095_v58 = vpop.permute.xlu1 %3729 }
 0x3ca   : > { %v8097_v18 = vpop.permute.xlu0 %3422 }
 0x3cc   : > { %v8099_v53 = vpop.permute.xlu1 %3120 }
 0x3cd   : > { %9477 = vst [vmem:[#allocation26_spill] sm:$0xff] %v8099_v53 }
 0x3ce   : > { %v8101_v52 = vpop.permute.xlu0 %3021 }
 0x3cf   : > { %9478 = vst [vmem:[#allocation27_spill] sm:$0xff] %v8101_v52 }
 0x3d0   : > { %v8103_v21 = vpop.permute.xlu1 %3526 }
 0x3d2   : > { %v8105_v36 = vpop.permute.xlu0 %3427 }
 0x3d3   : > { %9479 = vst [vmem:[#allocation28_spill] sm:$0xff] %v8105_v36 }
 0x3d4   : > { %v8107_v7 = vpop.permute.xlu1 %3224 }
 0x3d5   : > { %9480 = vst [vmem:[#allocation29_spill] sm:$0xff] %v8107_v7 }
 0x3d6   : > { %v8109_v17 = vpop.permute.xlu0 %3125 }
 0x3d7   : > { %9481 = vst [vmem:[#allocation30_spill] sm:$0xff] %v8109_v17 }
 0x3d8   : > { %v8111_v55 = vpop.permute.xlu1 %3630 }
 0x3da   : > { %v8113_v27 = vpop.permute.xlu0 %3531 }
 0x3db   : > { %9482 = vst [vmem:[#allocation31_spill] sm:$0xff] %v8113_v27 }
 0x3dc   : > { %v8115_v57 = vpop.permute.xlu1 %3328 }
 0x3dd   : > { %9483 = vst [vmem:[#allocation32_spill] sm:$0xff] %v8115_v57 }
 0x3de   : > { %v8123_v47 = vpop.permute.xlu0 %3229 }
 0x3df   : > { %v5944_v49 = vpop.f32.mrb[0].mxu1  ;;  %9485 = vst [vmem:[#allocation33_spill] sm:$0xff] %v8123_v47 }
 0x3e0   : > { %v2750_v10 = vadd.f32 %v5944_v49, %v8120_v5  ;;  %v2744_v2 = vpop.f32.mrb[1].mxu1  ;;  %v8126_v7 = vpop.permute.xlu1 %3734 }
 0x3e1   : > { %v2745_v15 = vadd.f32 %v8120_v5, %v2744_v2  ;;  %9486 = vst [vmem:[#allocation34_spill] sm:$0xff] %v8126_v7 }
 0x3e2   : > { %vm2784_vm3 = vcmp.ge.f32.partialorder %v2750_v10, 0.0  ;;  %v2792_v17 = vmul.f32 0.05, %v2750_v10  ;;  %v8128_v53 = vpop.permute.xlu0 %3635 }
 0x3e3   : > { %vm2783_vm4 = vcmp.ge.f32.partialorder %v2745_v15, 0.0  ;;  %v2791_v27 = vmul.f32 0.05, %v2745_v15  ;;  %9487 = vst [vmem:[#allocation35_spill] sm:$0xff] %v8128_v53 }
 0x3e4   : > { %v2800_v57 = vsel %vm2784_vm3, %v2750_v10, %v2792_v17  ;;  %v8131_v19 = vpop.permute.xlu1 %3432 }
 0x3e5   : > { %2808 = vst.msk [vmem:[#allocation2 + $0x18] sm:$0xff] %vm540_vm0, %v2800_v57  ;;  %v2799_v36 = vsel %vm2783_vm4, %v2745_v15, %v2791_v27  ;;  %9488 = vst [vmem:[#allocation36_spill] sm:$0xff] %v8131_v19  ;;  %v3599_v15 = vld [vmem:[#allocation2 + $0x50] sm:$0xff] }
 0x3e6   : > { %2807 = vst.msk [vmem:[#allocation2 + $0x10] sm:$0xff] %vm540_vm0, %v2799_v36  ;;  %v8134_v49 = vpop.permute.xlu0 %3333 }
 0x3e8   : > { %v8136_v47 = vpop.permute.xlu1 %3437 }
 0x3ea   : > { %v8140_v7 = vpop.permute.xlu0 %3739 }
 0x3eb   : > { %9490 = vst [vmem:[#allocation38_spill] sm:$0xff] %v8140_v7 }
 0x3ec   : > { %v8138_v2 = vld [vmem:[#allocation2 + $0x18] sm:$0xff]  ;;  %v8142_v52 = vpop.permute.xlu1 %3541 }
 0x3ed   : > { %9489 = vst [vmem:[#allocation37_spill] sm:$0xff] %v8138_v2  ;;  %9491 = vst [vmem:[#allocation39_spill] sm:$0xff] %v8142_v52  ;;  %v3337_v17 = vmul.f32 %v8025_v41, %v8138_v2  ;;  %v3072_v10 = vld [vmem:[#allocation2 + $0x9] sm:$0xff]  ;;  %v3026_v41 = vmul.f32 %v8017_v39, %v8138_v2 }
 0x3ee   : > { %v8147_v27 = vpop.permute.xlu0 %3536  ;;  %v3128_v57 = vmul.f32 %v8004_v42, %v3072_v10  ;;  %v3176_v53 = vld [vmem:[#allocation2 + $0xf] sm:$0xff]  ;;  %v3648_v10 = vmul.f32 %v8039_v63, %v8138_v2 }
 0x3ef   : > { %3354 = vrot.lane.b32.xlu0 %v3337_v17, %s9426_s26  ;;  %9492 = vst [vmem:[#allocation40_spill] sm:$0xff] %v8147_v27  ;;  %v3232_v52 = vmul.f32 %v8011_v13, %v3176_v53  ;;  %v3177_v17 = vld [vmem:[#allocation2 + $0x17] sm:$0xff]  ;;  %v2921_v39 = vmul.f32 %v3176_v53, %v7980_v31 }
 0x3f0   : > { %v3646_v36 = vpop.permute.xlu1 %3645  ;;  %v3233_v42 = vmul.f32 %v8015_v51, %v3177_v17 }
 0x3f1   : > { %v3655_v19 = vmul.f32 %v3646_v36, %v3599_v15  ;;  %v3073_v15 = vld [vmem:[#allocation2 + $0x11] sm:$0xff] }
 0x3f2   : > { %v8152_v7 = vpop.permute.xlu0 %3640  ;;  %v3129_v53 = vmul.f32 %v7996_v40, %v3073_v15 }
 0x3f3   : > { %3144 = vrot.lane.b32.xlu0 %v3128_v57, %s9493_s20  ;;  %3678 = vrot.lane.b32.xlu1 %v3655_v19, %s9494_s18  ;;  %v8168_v19 = vld [vmem:[#allocation2 + $0x10] sm:$0xff] }
 0x3f4   : > { %9496 = vst [vmem:[#allocation41_spill] sm:$0xff] %v8168_v19  ;;  %v3025_v51 = vmul.f32 %v7988_v4, %v8168_v19 }
 0x3f6   : > { %v8159_v27 = vpop.permute.xlu0 %3744 }
 0x3f7   : > { %3248 = vrot.lane.b32.xlu0 %v3232_v52, %s9495_s27  ;;  %3044 = vrot.lane.b32.xlu1 %v3026_v41, %s9428_s23 }
 0x3fa   : > { %v2937_v13 = vpop.permute.xlu0 %2936 }
 0x3fb   : > { %3250 = vrot.lane.b32.xlu0 %v3233_v42, %s9495_s27  ;;  %3664 = vrot.lane.b32.xlu1 %v3648_v10, %s9494_s18  ;;  %2960 = vst.msk [vmem:[#allocation3] sm:$0xff] %vm1771_vm11, %v2937_v13  ;;  %v2922_v13 = vmul.f32 %v3177_v17, %v8006_v22  ;;  %v3809_v22 = vld [vmem:[%s9498_s6 + $0x8] sm:$0xff] }
 0x3fe   : > { %v3041_v52 = vpop.permute.xlu0 %3040 }
 0x3ff   : > { %2938 = vrot.lane.b32.xlu1 %v2921_v39, %s9430_s15  ;;  %3064 = vst.msk [vmem:[#allocation3] sm:$0xff] %vm1876_vm13, %v3041_v52  ;;  %v3336_v39 = vmul.f32 %v8013_v9, %v8168_v19 }
 0x403   : > { %v5947_v63 = vpop.f32.mrb[2].mxu1  ;;  %3042 = vrot.lane.b32.xlu1 %v3025_v51, %s9428_s23  ;;  %v3440_v51 = vmul.f32 %v8022_v0, %v3073_v15  ;;  %v3544_v0 = vmul.f32 %v8031_v35, %v3177_v17  ;;  %v3811_v15 = vld [vmem:[%s9498_s6 + $0x18] sm:$0xff] }
 0x404   : > { %v2760_v36 = vadd.f32 %v5947_v63, %v8120_v5  ;;  %v2754_v57 = vpop.f32.mrb[3].mxu1 }
 0x405   : > { %v2755_v41 = vadd.f32 %v8120_v5, %v2754_v57 }
 0x406   : > { %vm2786_vm5 = vcmp.ge.f32.partialorder %v2760_v36, 0.0  ;;  %v2794_v31 = vmul.f32 0.05, %v2760_v36 }
 0x407   : > { %vm2785_vm6 = vcmp.ge.f32.partialorder %v2755_v41, 0.0  ;;  %v2793_v42 = vmul.f32 0.05, %v2755_v41  ;;  %3146 = vrot.lane.b32.xlu1 %v3129_v53, %s9493_s20  ;;  %v3812_v53 = vld [vmem:[%s9498_s6 + $0x20] sm:$0xff] }
 0x408   : > { %v2802_v10 = vsel %vm2786_vm5, %v2760_v36, %v2794_v31  ;;  %v3808_v36 = vld [vmem:[%s9498_s6] sm:$0xff] }
 0x409   : > { %2810 = vst.msk [vmem:[#allocation2 + $0x28] sm:$0xff] %vm540_vm0, %v2802_v10  ;;  %v2801_v4 = vsel %vm2785_vm6, %v2755_v41, %v2793_v42  ;;  %v6107_v57 = vpack.c.bf16 %v3809_v22, %v3808_v36  ;;  %v3813_v42 = vld [vmem:[%s9498_s6 + $0x28] sm:$0xff] }
 0x40a   : > { %2809 = vst.msk [vmem:[#allocation2 + $0x20] sm:$0xff] %vm540_vm0, %v2801_v4  ;;  %v3817_v36 = vld [vmem:[%s9498_s6 + $0x48] sm:$0xff] }
 0x40b   : > { %2940 = vrot.lane.b32.xlu1 %v2922_v13, %s9430_s15  ;;  %6108 = vmatprep.subr.bf16.mxu1 %v6107_v57  ;;  %v3814_v13 = vld [vmem:[%s9498_s6 + $0x30] sm:$0xff] }
 0x40c   : > { %6110 = vmatpush3.bf16.msra.mxu1 %v6107_v57  ;;  %v3818_v57 = vld [vmem:[%s9498_s6 + $0x50] sm:$0xff] }
 0x40f   : > { %3352 = vrot.lane.b32.xlu1 %v3336_v39, %s9426_s26  ;;  %v3815_v39 = vld [vmem:[%s9498_s6 + $0x38] sm:$0xff]  ;;  %s9571_s26 = sld [smem:[#allocation55_spill]] }
 0x410   : > { %v8185_v52 = vld [vmem:[#allocation2 + $0x28] sm:$0xff] }
 0x411   : > { %9497 = vst [vmem:[#allocation42_spill] sm:$0xff] %v8185_v52  ;;  %v3028_v40 = vmul.f32 %v8057_v44, %v8185_v52  ;;  %v2867_v63 = vld [vmem:[#allocation2 + $0x1f] sm:$0xff]  ;;  %v3810_v44 = vld [vmem:[%s9498_s6 + $0x10] sm:$0xff]  ;;  %v3339_v35 = vmul.f32 %v8055_v61, %v8185_v52  ;;  %v3650_v10 = vmul.f32 %v8075_v23, %v8185_v52 }
 0x412   : > { %v2923_v9 = vmul.f32 %v8020_v46, %v2867_v63  ;;  %v8200_v41 = vld [vmem:[#allocation2 + $0x20] sm:$0xff]  ;;  %v6111_v46 = vpack.c.bf16 %v3811_v15, %v3810_v44 }
 0x413   : > { %3048 = vrot.lane.b32.xlu0 %v3028_v40, %s9428_s23  ;;  %3456 = vrot.lane.b32.xlu1 %v3440_v51, %s9475_s25  ;;  %9499 = vst [vmem:[#allocation43_spill] sm:$0xff] %v8200_v41  ;;  %v3027_v31 = vmul.f32 %v8029_v14, %v8200_v41  ;;  %v8215_v17 = vld [vmem:[#allocation2 + $0x19] sm:$0xff]  ;;  %v6115_v14 = vpack.c.bf16 %v3813_v42, %v3812_v53  ;;  %v3075_v4 = vld [vmem:[#allocation2 + $0x21] sm:$0xff] }
 0x414   : > { %6112 = vmatprep.subr.bf16.mxu1 %v6111_v46  ;;  %v3441_v61 = vmul.f32 %v8033_v20, %v8215_v17  ;;  %v3131_v20 = vmul.f32 %v8037_v8, %v3075_v4  ;;  %v6119_v40 = vpack.c.bf16 %v3815_v39, %v3814_v13  ;;  %v3130_v23 = vmul.f32 %v8215_v17, %v8027_v24  ;;  %v3816_v51 = vld [vmem:[%s9498_s6 + $0x40] sm:$0xff] }
 0x415   : > { %6114 = vmatpush3.bf16.msra.mxu1 %v6111_v46  ;;  %v6123_v22 = vpack.c.bf16 %v3817_v36, %v3816_v51  ;;  %v3545_v8 = vmul.f32 %v8041_v32, %v2867_v63  ;;  %v2868_v24 = vld [vmem:[#allocation2 + $0x27] sm:$0xff]  ;;  %v3752_v13 = vmul.f32 %v8053_v16, %v8215_v17  ;;  %v3442_v39 = vmul.f32 %v8061_v62, %v3075_v4 }
 0x416   : > { %6116 = vmatprep.subr.bf16.mxu1 %v6115_v14  ;;  %v2924_v32 = vmul.f32 %v8045_v12, %v2868_v24  ;;  %v3821_v12 = vld [vmem:[%s9498_s6 + $0x68] sm:$0xf] }
 0x417   : > { %2942 = vrot.lane.b32.xlu0 %v2923_v9, %s9430_s15  ;;  %3560 = vrot.lane.b32.xlu1 %v3544_v0, %s9500_s21  ;;  %v3234_v9 = vmul.f32 %v8035_v60, %v2867_v63  ;;  %v3819_v0 = vld [vmem:[%s9498_s6 + $0x58] sm:$0xff]  ;;  %v3235_v60 = vmul.f32 %v8043_v54, %v2868_v24  ;;  %s9503_s15 = smov 92  }
 0x418   : > { %v6127_v44 = vpack.c.bf16 %v3819_v0, %v3818_v57 }
 0x419   : > { %6118 = vmatpush3.bf16.msra.mxu1 %v6115_v14  ;;  %v3649_v14 = vmul.f32 %v8047_v56, %v8200_v41  ;;  %v3753_v56 = vmul.f32 %v8059_v25, %v3075_v4 }
 0x41a   : > { %6120 = vmatprep.subr.bf16.mxu1 %v6119_v40 }
 0x41b   : > { %3046 = vrot.lane.b32.xlu0 %v3027_v31, %s9428_s23  ;;  %3358 = vrot.lane.b32.xlu1 %v3339_v35, %s9501_s29  ;;  %v3820_v31 = vld [vmem:[%s9498_s6 + $0x60] sm:$0xff]  ;;  %v3338_v35 = vmul.f32 %v8049_v45, %v8200_v41  ;;  %s9506_s23 = smov 8   ;;  %s6367_s6 = smov [#allocation8]  }
 0x41c   : > { %v6131_v53 = vpack.c.bf16 %v3821_v12, %v3820_v31  ;;  %v9509_v31 = vld [vmem:[#allocation39_spill] sm:$0xff] }
 0x41d   : > { %6122 = vmatpush3.bf16.msra.mxu1 %v6119_v40 }
 0x41e   : > { %6124 = vmatprep.subr.bf16.mxu1 %v6123_v22 }
 0x41f   : > { %3458 = vrot.lane.b32.xlu0 %v3441_v61, %s9475_s25  ;;  %3668 = vrot.lane.b32.xlu1 %v3650_v10, %s9494_s18 }
 0x421   : > { %6126 = vmatpush3.bf16.msra.mxu1 %v6123_v22 }
 0x422   : > { %6128 = vmatprep.subr.bf16.mxu1 %v6127_v44 }
 0x423   : > { %3150 = vrot.lane.b32.xlu0 %v3131_v20, %s9493_s20  ;;  %3148 = vrot.lane.b32.xlu1 %v3130_v23, %s9493_s20  ;;  %v3546_v20 = vmul.f32 %v8067_v1, %v2868_v24 }
 0x425   : > { %6130 = vmatpush3.bf16.msra.mxu1 %v6127_v44 }
 0x426   : > { %6133 = vmatprep.subr.msk.bf16.mxu1 %vm7570_vm2, %v6131_v53 }
 0x427   : > { %3562 = vrot.lane.b32.xlu0 %v3545_v8, %s9500_s21  ;;  %3252 = vrot.lane.b32.xlu1 %v3234_v9, %s9495_s27 }
 0x429   : > { %v5950_v63 = vpop.f32.mrb[4].mxu1  ;;  %6136 = vmatpush3.bf16.msk.msra.mxu1 %vm7570_vm2, %v6131_v53 }
 0x42a   : > { %v2770_v15 = vadd.f32 %v5950_v63, %v8120_v5  ;;  %v2764_v46 = vpop.f32.mrb[5].mxu1 }
 0x42b   : > { %2944 = vrot.lane.b32.xlu0 %v2924_v32, %s9502_s2  ;;  %3254 = vrot.lane.b32.xlu1 %v3235_v60, %s9495_s27  ;;  %v2765_v54 = vadd.f32 %v8120_v5, %v2764_v46 }
 0x42c   : > { %vm2788_vm3 = vcmp.ge.f32.partialorder %v2770_v15, 0.0  ;;  %v2796_v42 = vmul.f32 0.05, %v2770_v15 }
 0x42d   : > { %vm2787_vm4 = vcmp.ge.f32.partialorder %v2765_v54, 0.0  ;;  %v2795_v61 = vmul.f32 0.05, %v2765_v54 }
 0x42e   : > { %v2804_v10 = vsel %vm2788_vm3, %v2770_v15, %v2796_v42  ;;  %v3750_v15 = vpop.permute.xlu1 %3749  ;;  %v9511_v42 = vld [vmem:[#allocation25_spill] sm:$0xff] }
 0x42f   : > { %3356 = vrot.lane.b32.xlu0 %v3338_v35, %s9501_s29  ;;  %3666 = vrot.lane.b32.xlu1 %v3649_v14, %s9494_s18  ;;  %2812 = vst.msk [vmem:[#allocation2 + $0x38] sm:$0xff] %vm540_vm0, %v2804_v10  ;;  %v2803_v45 = vsel %vm2787_vm4, %v2765_v54, %v2795_v61  ;;  %v9510_v54 = vld [vmem:[#allocation27_spill] sm:$0xff]  ;;  %v9512_v10 = vld [vmem:[#allocation28_spill] sm:$0xff] }
 0x430   : > { %2811 = vst.msk [vmem:[#allocation2 + $0x30] sm:$0xff] %vm540_vm0, %v2803_v45 }
 0x433   : > { %3768 = vrot.lane.b32.xlu0 %v3752_v13, %s9503_s15  ;;  %3770 = vrot.lane.b32.xlu1 %v3753_v56, %s9503_s15  ;;  %v9513_v56 = vld [vmem:[#allocation26_spill] sm:$0xff] }
 0x436   : > { %v8290_v40 = vld [vmem:[#allocation2 + $0x38] sm:$0xff]  ;;  %v5953_v23 = vpop.f32.mrb[6].mxu1 }
 0x437   : > { %3460 = vrot.lane.b32.xlu0 %v3442_v39, %s9475_s25  ;;  %9504 = vst [vmem:[#allocation44_spill] sm:$0xff] %v8290_v40  ;;  %3564 = vrot.lane.b32.xlu1 %v3546_v20, %s9500_s21  ;;  %v3030_v16 = vmul.f32 %v8093_v34, %v8290_v40  ;;  %v3341_v25 = vmul.f32 %v8091_v33, %v8290_v40  ;;  %v8297_v17 = vld [vmem:[#allocation2 + $0x30] sm:$0xff]  ;;  %v2774_v62 = vpop.f32.mrb[7].mxu1 }
 0x438   : > { %9505 = vst [vmem:[#allocation45_spill] sm:$0xff] %v8297_v17  ;;  %v2780_v51 = vadd.f32 %v5953_v23, %v8120_v5  ;;  %v2775_v1 = vadd.f32 %v8120_v5, %v2774_v62  ;;  %v3029_v34 = vmul.f32 %v8065_v50, %v8297_v17  ;;  %v3652_v33 = vmul.f32 %v8111_v55, %v8290_v40  ;;  %v3387_v8 = vld [vmem:[#allocation2 + $0x29] sm:$0xff]  ;;  %v3077_v50 = vld [vmem:[#allocation2 + $0x31] sm:$0xff] }
 0x439   : > { %v2869_v5 = vld [vmem:[#allocation2 + $0x2f] sm:$0xff]  ;;  %v3443_v24 = vmul.f32 %v8069_v38, %v3387_v8  ;;  %v3133_v55 = vmul.f32 %v8073_v30, %v3077_v50  ;;  %v3132_v0 = vmul.f32 %v3387_v8, %v8063_v26  ;;  %v2870_v38 = vld [vmem:[#allocation2 + $0x37] sm:$0xff]  ;;  %v3340_v26 = vmul.f32 %v8085_v6, %v8297_v17 }
 0x43a   : > { %vm2790_vm5 = vcmp.ge.f32.partialorder %v2780_v51, 0.0  ;;  %v2798_v4 = vmul.f32 0.05, %v2780_v51  ;;  %vm2789_vm6 = vcmp.ge.f32.partialorder %v2775_v1, 0.0  ;;  %v2797_v36 = vmul.f32 0.05, %v2775_v1 }
 0x43b   : > { %3052 = vrot.lane.b32.xlu0 %v3030_v16, %s9506_s23  ;;  %3362 = vrot.lane.b32.xlu1 %v3341_v25, %s9501_s29  ;;  %v2925_v57 = vmul.f32 %v8051_v43, %v2869_v5  ;;  %v3547_v44 = vmul.f32 %v8077_v59, %v2869_v5  ;;  %v3236_v32 = vmul.f32 %v8071_v48, %v2869_v5  ;;  %v9514_v23 = vld [vmem:[#allocation30_spill] sm:$0xff] }
 0x43c   : > { %v2806_v22 = vsel %vm2790_vm5, %v2780_v51, %v2798_v4  ;;  %v2805_v9 = vsel %vm2789_vm6, %v2775_v1, %v2797_v36  ;;  %v2926_v43 = vmul.f32 %v8081_v3, %v2870_v38  ;;  %v3237_v60 = vmul.f32 %v8079_v11, %v2870_v38  ;;  %v9515_v51 = vld [vmem:[#allocation29_spill] sm:$0xff]  ;;  %v9516_v1 = vld [vmem:[#allocation31_spill] sm:$0xff] }
 0x43d   : > { %2814 = vst.msk [vmem:[#allocation2 + $0x48] sm:$0xff] %vm540_vm0, %v2806_v22  ;;  %2813 = vst.msk [vmem:[#allocation2 + $0x40] sm:$0xff] %vm540_vm0, %v2805_v9  ;;  %v3651_v30 = vmul.f32 %v8083_v28, %v8297_v17  ;;  %v3754_v48 = vmul.f32 %v8089_v37, %v3387_v8  ;;  %v3755_v59 = vmul.f32 %v8095_v58, %v3077_v50  ;;  %v9518_v8 = vld [vmem:[#allocation33_spill] sm:$0xff] }
 0x43e   : > { %v3444_v11 = vmul.f32 %v8097_v18, %v3077_v50  ;;  %v3548_v6 = vmul.f32 %v8103_v21, %v2870_v38  ;;  %v9520_v50 = vld [vmem:[#allocation35_spill] sm:$0xff]  ;;  %v8818_v17 = vld [vmem:[%s9383_s7] ss:$0 sm:$0xff] }
 0x43f   : > { %3050 = vrot.lane.b32.xlu0 %v3029_v34, %s9506_s23  ;;  %3672 = vrot.lane.b32.xlu1 %v3652_v33, %s9494_s18  ;;  %v9517_v34 = vld [vmem:[#allocation32_spill] sm:$0xff] }
 0x440   : > { %v3703_v38 = vld [vmem:[#allocation2 + $0x51] sm:$0xff] }
 0x443   : > { %3462 = vrot.lane.b32.xlu0 %v3443_v24, %s9475_s25  ;;  %2946 = vrot.lane.b32.xlu1 %v2925_v57, %s9502_s2  ;;  %v9519_v24 = vld [vmem:[#allocation34_spill] sm:$0xff] }
 0x444   : > { %v8338_v3 = vld [vmem:[#allocation2 + $0x48] sm:$0xff]  ;;  %v8353_v46 = vld [vmem:[#allocation2 + $0x40] sm:$0xff] }
 0x445   : > { %9507 = vst [vmem:[#allocation46_spill] sm:$0xff] %v8338_v3  ;;  %v8342_v28 = vld [vmem:[#allocation2 + $0x49] sm:$0xff]  ;;  %v3343_v37 = vmul.f32 %v8134_v49, %v8338_v3  ;;  %v3654_v21 = vmul.f32 %v8152_v7, %v8338_v3  ;;  %9508 = vst [vmem:[#allocation47_spill] sm:$0xff] %v8353_v46  ;;  %v2871_v49 = vld [vmem:[#allocation2 + $0x3f] sm:$0xff]  ;;  %v3031_v35 = vmul.f32 %v9510_v54, %v8353_v46 }
 0x446   : > { %v3447_v58 = vmul.f32 %v8136_v47, %v8342_v28  ;;  %v3495_v63 = vld [vmem:[#allocation2 + $0x4f] sm:$0xff]  ;;  %v2927_v7 = vmul.f32 %v9511_v42, %v2871_v49  ;;  %v3389_v14 = vld [vmem:[#allocation2 + $0x39] sm:$0xff]  ;;  %v3079_v20 = vld [vmem:[#allocation2 + $0x41] sm:$0xff]  ;;  %v3238_v62 = vmul.f32 %v9515_v51, %v2871_v49  ;;  %v3549_v4 = vmul.f32 %v9516_v1, %v2871_v49 }
 0x447   : > { %3154 = vrot.lane.b32.xlu0 %v3133_v55, %s9493_s20  ;;  %3152 = vrot.lane.b32.xlu1 %v3132_v0, %s9493_s20  ;;  %v3551_v12 = vmul.f32 %v9509_v31, %v3495_v63  ;;  %v3445_v45 = vmul.f32 %v9512_v10, %v3389_v14  ;;  %v3134_v39 = vmul.f32 %v3389_v14, %v9513_v56  ;;  %v3183_v33 = vld [vmem:[#allocation2 + $0x47] sm:$0xff]  ;;  %v5758_v51 = vld [vmem:[%s9377_s1 + $0x90] sm:$0xff] }
 0x448   : > { %v3135_v16 = vmul.f32 %v9514_v23, %v3079_v20  ;;  %v3342_v22 = vmul.f32 %v9517_v34, %v8353_v46  ;;  %v3239_v9 = vmul.f32 %v9518_v8, %v3183_v33  ;;  %v3756_v57 = vmul.f32 %v9519_v24, %v3389_v14  ;;  %v5765_v56 = vld [vmem:[%s9377_s1 + $0xc8] sm:$0xff]  ;;  %v5766_v8 = vld [vmem:[%s9377_s1 + $0xd0] sm:$0xff] }
 0x449   : > { %v3653_v55 = vmul.f32 %v9520_v50, %v8353_v46  ;;  %v3758_v63 = vmul.f32 %v8159_v27, %v8342_v28  ;;  %v5748_v28 = vld [vmem:[%s9377_s1 + $0x40] sm:$0xff]  ;;  %v5773_v1 = vld [vmem:[%s9377_s1 + $0x108] sm:$0xff] }
 0x44b   : > { %3566 = vrot.lane.b32.xlu0 %v3547_v44, %s9500_s21  ;;  %3256 = vrot.lane.b32.xlu1 %v3236_v32, %s9495_s27  ;;  %v9521_v44 = vld [vmem:[#allocation36_spill] sm:$0xff] }
 0x44c   : > { %v3446_v32 = vmul.f32 %v9521_v44, %v3079_v20 }
 0x44f   : > { %2948 = vrot.lane.b32.xlu0 %v2926_v43, %s9502_s2  ;;  %3258 = vrot.lane.b32.xlu1 %v3237_v60, %s9495_s27  ;;  %v9522_v60 = vld [vmem:[#allocation38_spill] sm:$0xff] }
 0x453   : > { %3360 = vrot.lane.b32.xlu0 %v3340_v26, %s9501_s29  ;;  %3670 = vrot.lane.b32.xlu1 %v3651_v30, %s9494_s18  ;;  %v3757_v26 = vmul.f32 %v9522_v60, %v3079_v20  ;;  %v3759_v30 = vmul.f32 %v3750_v15, %v3703_v38  ;;  %v4050_v15 = vld [vmem:[%s9377_s1] sm:$0xff]  ;;  %v5789_v60 = vld [vmem:[%s9377_s1 + $0x188] sm:$0xff] }
 0x454   : > { %v5780_v20 = vld [vmem:[%s9377_s1 + $0x140] sm:$0xff] }
 0x457   : > { %3772 = vrot.lane.b32.xlu0 %v3754_v48, %s9503_s15  ;;  %3774 = vrot.lane.b32.xlu1 %v3755_v59, %s9503_s15  ;;  %v9523_v59 = vld [vmem:[#allocation40_spill] sm:$0xff] }
 0x45b   : > { %3464 = vrot.lane.b32.xlu0 %v3444_v11, %s9475_s25  ;;  %3568 = vrot.lane.b32.xlu1 %v3548_v6, %s9500_s21  ;;  %v3550_v11 = vmul.f32 %v9523_v59, %v3183_v33  ;;  %v4051_v6 = vld [vmem:[%s9377_s1 + $0x8] sm:$0xff]  ;;  %v4054_v59 = vld [vmem:[%s9377_s1 + $0x20] sm:$0xff] }
 0x45f   : > { %3366 = vrot.lane.b32.xlu0 %v3343_v37, %s9501_s29  ;;  %3470 = vrot.lane.b32.xlu1 %v3447_v58, %s9475_s25 }
 0x461   : > { %v3355_v18 = vpop.permute.xlu0 %3354 }
 0x463   : > { %3676 = vrot.lane.b32.xlu0 %v3654_v21, %s9494_s18  ;;  %3574 = vrot.lane.b32.xlu1 %v3551_v12, %s9500_s21  ;;  %v5757_v12 = vld [vmem:[%s9377_s1 + $0x88] sm:$0xff] }
 0x465   : > { %v3145_v47 = vpop.permute.xlu0 %3144  ;;  %v8360_v53 = vpop.permute.xlu1 %3678 }
 0x466   : > { %3168 = vst.msk [vmem:[#allocation3] sm:$0xff] %vm1981_vm7, %v3145_v47  ;;  %v4052_v47 = vld [vmem:[%s9377_s1 + $0x10] sm:$0xff] }
 0x467   : > { %3054 = vrot.lane.b32.xlu0 %v3031_v35, %s9506_s23  ;;  %2950 = vrot.lane.b32.xlu1 %v2927_v7, %s9502_s2  ;;  %v5756_v35 = vld [vmem:[%s9377_s1 + $0x80] sm:$0xff] }
 0x468   : > { %v5772_v7 = vld [vmem:[%s9377_s1 + $0x100] sm:$0xff] }
 0x469   : > { %v3249_v61 = vpop.permute.xlu0 %3248  ;;  %v3045_v13 = vpop.permute.xlu1 %3044 }
 0x46a   : > { %3272 = vst.msk [vmem:[#allocation3] sm:$0xff] %vm2086_vm8, %v3249_v61  ;;  %v5764_v61 = vld [vmem:[%s9377_s1 + $0xc0] sm:$0xff] }
 0x46b   : > { %3466 = vrot.lane.b32.xlu0 %v3445_v45, %s9475_s25  ;;  %3156 = vrot.lane.b32.xlu1 %v3134_v39, %s9493_s20  ;;  %v5750_v45 = vld [vmem:[%s9377_s1 + $0x50] sm:$0xff] }
 0x46d   : > { %v3665_v25 = vpop.permute.xlu1 %3664  ;;  %v3251_v43 = vpop.permute.xlu0 %3250 }
 0x46f   : > { %3158 = vrot.lane.b32.xlu0 %v3135_v16, %s9493_s20  ;;  %3260 = vrot.lane.b32.xlu1 %v3238_v62, %s9495_s27  ;;  %v4053_v16 = vld [vmem:[%s9377_s1 + $0x18] sm:$0xff] }
 0x471   : > { %v2939_v36 = vpop.permute.xlu1 %2938 }
 0x472   : > { %2961 = vst.msk [vmem:[#allocation3 + $0x10] sm:$0xff] %vm1771_vm11, %v2939_v36  ;;  %v5788_v36 = vld [vmem:[%s9377_s1 + $0x180] sm:$0xff] }
 0x473   : > { %3570 = vrot.lane.b32.xlu0 %v3549_v4, %s9500_s21  ;;  %3364 = vrot.lane.b32.xlu1 %v3342_v22, %s9501_s29  ;;  %v5751_v22 = vld [vmem:[%s9377_s1 + $0x58] sm:$0xff] }
 0x475   : > { %v3043_v5 = vpop.permute.xlu1 %3042 }
 0x476   : > { %3065 = vst.msk [vmem:[#allocation3 + $0x10] sm:$0xff] %vm1876_vm13, %v3043_v5  ;;  %v5781_v5 = vld [vmem:[%s9377_s1 + $0x148] sm:$0xff] }
 0x477   : > { %3262 = vrot.lane.b32.xlu0 %v3239_v9, %s9495_s27  ;;  %3776 = vrot.lane.b32.xlu1 %v3756_v57, %s9503_s15  ;;  %v5796_v57 = vld [vmem:[%s9377_s1 + $0x1c0] sm:$0xff] }
 0x479   : > { %v3147_v0 = vpop.permute.xlu1 %3146 }
 0x47a   : > { %3169 = vst.msk [vmem:[#allocation3 + $0x10] sm:$0xff] %vm1981_vm7, %v3147_v0 }
 0x47b   : > { %3674 = vrot.lane.b32.xlu0 %v3653_v55, %s9494_s18  ;;  %3273 = vst.msk [vmem:[#allocation3 + $0x10] sm:$0xff] %vm2086_vm8, %v3251_v43  ;;  %3468 = vrot.lane.b32.xlu1 %v3446_v32, %s9475_s25  ;;  %v5759_v55 = vld [vmem:[%s9377_s1 + $0x98] sm:$0xff] }
 0x47c   : > { %3377 = vst.msk [vmem:[#allocation3 + $0x10] sm:$0xff] %vm2191_vm9, %v3355_v18  ;;  %v5749_v18 = vld [vmem:[%s9377_s1 + $0x48] sm:$0xff]  ;;  %v5767_v32 = vld [vmem:[%s9377_s1 + $0xd8] sm:$0xff] }
 0x47d   : > { %v2941_v48 = vpop.permute.xlu1 %2940 }
 0x47e   : > { %2962 = vst.msk [vmem:[#allocation3 + $0x20] sm:$0xff] %vm1771_vm11, %v2941_v48 }
 0x47f   : > { %3778 = vrot.lane.b32.xlu0 %v3757_v26, %s9503_s15  ;;  %3066 = vst.msk [vmem:[#allocation3 + $0x20] sm:$0xff] %vm1876_vm13, %v3045_v13  ;;  %3782 = vrot.lane.b32.xlu1 %v3759_v30, %s9503_s15  ;;  %v5797_v30 = vld [vmem:[%s9377_s1 + $0x1c8] sm:$0xff] }
 0x481   : > { %v3353_v37 = vpop.permute.xlu1 %3352 }
 0x482   : > { %3376 = vst.msk [vmem:[#allocation3] sm:$0xff] %vm2191_vm9, %v3353_v37 }
 0x483   : > { %3572 = vrot.lane.b32.xlu0 %v3550_v11, %s9500_s21  ;;  %4065 = vperm.xlu1 %6241, %v4051_v6   ;;  %v4055_v6 = vld [vmem:[%s9377_s1 + $0x28] sm:$0xff] }
 0x485   : > { %v3049_v58 = vpop.permute.xlu0 %3048  ;;  %v3457_v21 = vpop.permute.xlu1 %3456 }
 0x486   : > { %3480 = vst.msk [vmem:[#allocation3] sm:$0xff] %vm2296_vm10, %v3457_v21 }
 0x487   : > { %3780 = vrot.lane.b32.xlu0 %v3758_v63, %s9503_s15  ;;  %4169 = vperm.xlu1 %6241, %v5749_v18   ;;  %v5775_v18 = vld [vmem:[%s9377_s1 + $0x118] sm:$0xff] }
 0x489   : > { %v2943_v31 = vpop.permute.xlu0 %2942  ;;  %v3561_v27 = vpop.permute.xlu1 %3560 }
 0x48a   : > { %2963 = vst.msk [vmem:[#allocation3 + $0x30] sm:$0xff] %vm1771_vm11, %v2943_v31 }
 0x48b   : > { %3584 = vst.msk [vmem:[#allocation3] sm:$0xff] %vm2401_vm12, %v3561_v27  ;;  %4060 = vperm.xlu0 %6240, %v4050_v15   ;;  %4273 = vperm.xlu1 %6241, %v5757_v12   ;;  %v5804_v15 = vld [vmem:[%s9377_s1 + $0x200] sm:$0xff]  ;;  %v5805_v12 = vld [vmem:[%s9377_s1 + $0x208] sm:$0xff] }
 0x48c   : > { %3688 = vst.msk [vmem:[#allocation3] sm:$0xff] %vm2506_vm14, %v3665_v25 }
 0x48d   : > { %v3047_v49 = vpop.permute.xlu0 %3046  ;;  %v3359_v54 = vpop.permute.xlu1 %3358 }
 0x48e   : > { %3067 = vst.msk [vmem:[#allocation3 + $0x30] sm:$0xff] %vm1876_vm13, %v3047_v49 }
 0x48f   : > { %4164 = vperm.xlu0 %6240, %v5748_v28   ;;  %4070 = vperm.xlu1 %6241, %v4052_v47   ;;  %v5752_v28 = vld [vmem:[%s9377_s1 + $0x60] sm:$0xff] }
 0x490   : > { %v5760_v47 = vld [vmem:[%s9377_s1 + $0xa0] sm:$0xff] }
 0x491   : > { %v3459_v42 = vpop.permute.xlu0 %3458  ;;  %v3669_v14 = vpop.permute.xlu1 %3668 }
 0x492   : > { %3481 = vst.msk [vmem:[#allocation3 + $0x10] sm:$0xff] %vm2296_vm10, %v3459_v42 }
 0x493   : > { %4268 = vperm.xlu0 %6240, %v5756_v35   ;;  %4476 = vperm.xlu1 %6241, %v5772_v7   ;;  %v5782_v35 = vld [vmem:[%s9377_s1 + $0x150] sm:$0xff] }
 0x494   : > { %v5790_v7 = vld [vmem:[%s9377_s1 + $0x190] sm:$0xff] }
 0x495   : > { %v3151_v10 = vpop.permute.xlu0 %3150  ;;  %v3149_v13 = vpop.permute.xlu1 %3148 }
 0x496   : > { %3171 = vst.msk [vmem:[#allocation3 + $0x30] sm:$0xff] %vm1981_vm7, %v3151_v10  ;;  %3170 = vst.msk [vmem:[#allocation3 + $0x20] sm:$0xff] %vm1981_vm7, %v3149_v13 }
 0x497   : > { %4372 = vperm.xlu0 %6240, %v5764_v61   ;;  %4174 = vperm.xlu1 %6241, %v5750_v45   ;;  %v5753_v61 = vld [vmem:[%s9377_s1 + $0x68] sm:$0xff]  ;;  %v5768_v45 = vld [vmem:[%s9377_s1 + $0xe0] sm:$0xff] }
 0x499   : > { %v3563_v39 = vpop.permute.xlu0 %3562  ;;  %v3253_v23 = vpop.permute.xlu1 %3252 }
 0x49a   : > { %3585 = vst.msk [vmem:[#allocation3 + $0x10] sm:$0xff] %vm2401_vm12, %v3563_v39 }
 0x49b   : > { %3274 = vst.msk [vmem:[#allocation3 + $0x20] sm:$0xff] %vm2086_vm8, %v3253_v23  ;;  %4377 = vperm.xlu0 %6240, %v5765_v56   ;;  %4580 = vperm.xlu1 %6241, %v5780_v20   ;;  %v5783_v56 = vld [vmem:[%s9377_s1 + $0x158] sm:$0xff]  ;;  %v5798_v20 = vld [vmem:[%s9377_s1 + $0x1d0] sm:$0xff] }
 0x49d   : > { %v2945_v25 = vpop.permute.xlu0 %2944  ;;  %v3255_v62 = vpop.permute.xlu1 %3254 }
 0x49e   : > { %2964 = vst.msk [vmem:[#allocation3 + $0x40] sm:$0xff] %vm1771_vm11, %v2945_v25 }
 0x49f   : > { %3068 = vst.msk [vmem:[#allocation3 + $0x40] sm:$0xff] %vm1876_vm13, %v3049_v58  ;;  %4075 = vperm.xlu0 %6240, %v4053_v16   ;;  %4278 = vperm.xlu1 %6241, %v5758_v51   ;;  %v5774_v58 = vld [vmem:[%s9377_s1 + $0x110] sm:$0xff]  ;;  %v5761_v16 = vld [vmem:[%s9377_s1 + $0xa8] sm:$0xff] }
 0x4a0   : > { %3275 = vst.msk [vmem:[#allocation3 + $0x30] sm:$0xff] %vm2086_vm8, %v3255_v62  ;;  %v5769_v62 = vld [vmem:[%s9377_s1 + $0xe8] sm:$0xff] }
 0x4a1   : > { %3379 = vst.msk [vmem:[#allocation3 + $0x30] sm:$0xff] %vm2191_vm9, %v3359_v54  ;;  %v3357_v4 = vpop.permute.xlu0 %3356  ;;  %v3667_v34 = vpop.permute.xlu1 %3666 }
 0x4a2   : > { %3378 = vst.msk [vmem:[#allocation3 + $0x20] sm:$0xff] %vm2191_vm9, %v3357_v4 }
 0x4a3   : > { %3689 = vst.msk [vmem:[#allocation3 + $0x10] sm:$0xff] %vm2506_vm14, %v3667_v34  ;;  %4481 = vperm.xlu0 %6240, %v5773_v1   ;;  %4684 = vperm.xlu1 %6241, %v5788_v36   ;;  %v5791_v36 = vld [vmem:[%s9377_s1 + $0x198] sm:$0xff] }
 0x4a5   : > { %v3769_v33 = vpop.permute.xlu0 %3768  ;;  %v3771_v9 = vpop.permute.xlu1 %3770 }
 0x4a6   : > { %3792 = vst.msk [vmem:[#allocation3] sm:$0xff] %vm2611_vm15, %v3769_v33  ;;  %3793 = vst.msk [vmem:[#allocation3 + $0x10] sm:$0xff] %vm2611_vm15, %v3771_v9 }
 0x4a7   : > { %4179 = vperm.xlu0 %6240, %v5751_v22   ;;  %4382 = vperm.xlu1 %6241, %v5766_v8   ;;  %v5799_v22 = vld [vmem:[%s9377_s1 + $0x1d8] sm:$0xff]  ;;  %v4056_v8 = vld [vmem:[%s9377_s1 + $0x30] sm:$0xff] }
 0x4a9   : > { %v3461_v24 = vpop.permute.xlu0 %3460  ;;  %v3565_v50 = vpop.permute.xlu1 %3564 }
 0x4aa   : > { %3482 = vst.msk [vmem:[#allocation3 + $0x20] sm:$0xff] %vm2296_vm10, %v3461_v24 }
 0x4ab   : > { %3586 = vst.msk [vmem:[#allocation3 + $0x20] sm:$0xff] %vm2401_vm12, %v3565_v50  ;;  %4585 = vperm.xlu0 %6240, %v5781_v5   ;;  %4788 = vperm.xlu1 %6241, %v5796_v57   ;;  %v4057_v5 = vld [vmem:[%s9377_s1 + $0x38] sm:$0xff]  ;;  %v5776_v57 = vld [vmem:[%s9377_s1 + $0x120] sm:$0xff] }
 0x4ac   : > { %3690 = vst.msk [vmem:[#allocation3 + $0x20] sm:$0xff] %vm2506_vm14, %v3669_v14 }
 0x4ad   : > { %v3053_v0 = vpop.permute.xlu0 %3052  ;;  %v3800_v44 = vld [vmem:[#allocation3] sm:$0xff]  ;;  %v3363_v38 = vpop.permute.xlu1 %3362  ;;  %v3801_v43 = vld [vmem:[#allocation3 + $0x10] sm:$0xff] }
 0x4ae   : > { %5982 = vmatprep.mubr.msk.f32.mxu1 %vm2649_vm1, %v3800_v44  ;;  %v5806_v44 = vld [vmem:[%s9377_s1 + $0x210] sm:$0xff] }
 0x4af   : > { %4283 = vperm.xlu0 %6240, %v5759_v55   ;;  %5983 = vmatmul.mubr.msk.f32.vlgmr.msra.gmra.mrb[8].mxu1 %vm2649_vm1, %v3801_v43  ;;  %v5777_v55 = vld [vmem:[%s9377_s1 + $0x128] sm:$0xff] }
 0x4b0   : > { %4387 = vperm.xlu1 %6241, %v5767_v32  }
 0x4b1   : > { %v3051_v26 = vpop.permute.xlu0 %3050  ;;  %v3673_v48 = vpop.permute.xlu1 %3672 }
 0x4b3   : > { %4689 = vperm.xlu0 %6240, %v5789_v60   ;;  %v5754_v60 = vld [vmem:[%s9377_s1 + $0x70] sm:$0xff] }
 0x4b4   : > { %4793 = vperm.xlu1 %6241, %v5797_v30   ;;  %v5762_v30 = vld [vmem:[%s9377_s1 + $0xb0] sm:$0xff] }
 0x4b5   : > { %v3463_v11 = vpop.permute.xlu0 %3462  ;;  %v2947_v37 = vpop.permute.xlu1 %2946 }
 0x4b6   : > { %3483 = vst.msk [vmem:[#allocation3 + $0x30] sm:$0xff] %vm2296_vm10, %v3463_v11 }
 0x4b7   : > { %2965 = vst.msk [vmem:[#allocation3 + $0x50] sm:$0xff] %vm1771_vm11, %v2947_v37  ;;  %4080 = vperm.xlu0 %6240, %v4054_v59   ;;  %v5784_v59 = vld [vmem:[%s9377_s1 + $0x160] sm:$0xff] }
 0x4b8   : > { %3069 = vst.msk [vmem:[#allocation3 + $0x50] sm:$0xff] %vm1876_vm13, %v3051_v26  ;;  %4085 = vperm.xlu1 %6241, %v4055_v6   ;;  %v5792_v6 = vld [vmem:[%s9377_s1 + $0x1a0] sm:$0xff] }
 0x4b9   : > { %v3155_v63 = vpop.permute.xlu0 %3154  ;;  %v3153_v21 = vpop.permute.xlu1 %3152 }
 0x4ba   : > { %3173 = vst.msk [vmem:[#allocation3 + $0x50] sm:$0xff] %vm1981_vm7, %v3155_v63  ;;  %3172 = vst.msk [vmem:[#allocation3 + $0x40] sm:$0xff] %vm1981_vm7, %v3153_v21 }
 0x4bb   : > { %4486 = vperm.xlu0 %6240, %v5774_v58   ;;  %v5755_v58 = vld [vmem:[%s9377_s1 + $0x78] sm:$0xff] }
 0x4bc   : > { %4491 = vperm.xlu1 %6241, %v5775_v18   ;;  %v5770_v18 = vld [vmem:[%s9377_s1 + $0xf0] sm:$0xff] }
 0x4bd   : > { %v3567_v31 = vpop.permute.xlu0 %3566  ;;  %v3257_v27 = vpop.permute.xlu1 %3256 }
 0x4be   : > { %3587 = vst.msk [vmem:[#allocation3 + $0x30] sm:$0xff] %vm2401_vm12, %v3567_v31 }
 0x4bf   : > { %3276 = vst.msk [vmem:[#allocation3 + $0x40] sm:$0xff] %vm2086_vm8, %v3257_v27  ;;  %4892 = vperm.xlu0 %6240, %v5804_v15   ;;  %v5785_v15 = vld [vmem:[%s9377_s1 + $0x168] sm:$0xff] }
 0x4c0   : > { %4897 = vperm.xlu1 %6241, %v5805_v12   ;;  %v5800_v12 = vld [vmem:[%s9377_s1 + $0x1e0] sm:$0xff] }
 0x4c1   : > { %v2949_v49 = vpop.permute.xlu0 %2948  ;;  %v3259_v54 = vpop.permute.xlu1 %3258 }
 0x4c2   : > { %2966 = vst.msk [vmem:[#allocation3 + $0x60] sm:$0xff] %vm1771_vm11, %v2949_v49 }
 0x4c3   : > { %3070 = vst.msk [vmem:[#allocation3 + $0x60] sm:$0xff] %vm1876_vm13, %v3053_v0  ;;  %4184 = vperm.xlu0 %6240, %v5752_v28   ;;  %v5763_v28 = vld [vmem:[%s9377_s1 + $0xb8] sm:$0xff] }
 0x4c4   : > { %3277 = vst.msk [vmem:[#allocation3 + $0x50] sm:$0xff] %vm2086_vm8, %v3259_v54  ;;  %4288 = vperm.xlu1 %6241, %v5760_v47   ;;  %v5778_v47 = vld [vmem:[%s9377_s1 + $0x130] sm:$0xff]  ;;  %v5793_v54 = vld [vmem:[%s9377_s1 + $0x1a8] sm:$0xff] }
 0x4c5   : > { %3381 = vst.msk [vmem:[#allocation3 + $0x50] sm:$0xff] %vm2191_vm9, %v3363_v38  ;;  %v3361_v42 = vpop.permute.xlu0 %3360  ;;  %v3671_v14 = vpop.permute.xlu1 %3670  ;;  %v5807_v38 = vld [vmem:[%s9377_s1 + $0x218] sm:$0xff] }
 0x4c6   : > { %3380 = vst.msk [vmem:[#allocation3 + $0x40] sm:$0xff] %vm2191_vm9, %v3361_v42 }
 0x4c7   : > { %3691 = vst.msk [vmem:[#allocation3 + $0x30] sm:$0xff] %vm2506_vm14, %v3671_v14  ;;  %4590 = vperm.xlu0 %6240, %v5782_v35   ;;  %v5771_v14 = vld [vmem:[%s9377_s1 + $0xf8] sm:$0xff] }
 0x4c8   : > { %4694 = vperm.xlu1 %6241, %v5790_v7   ;;  %v5808_v7 = vld [vmem:[%s9377_s1 + $0x220] sm:$0xff] }
 0x4c9   : > { %v3773_v10 = vpop.permute.xlu0 %3772  ;;  %v3775_v13 = vpop.permute.xlu1 %3774 }
 0x4ca   : > { %3794 = vst.msk [vmem:[#allocation3 + $0x20] sm:$0xff] %vm2611_vm15, %v3773_v10  ;;  %3795 = vst.msk [vmem:[#allocation3 + $0x30] sm:$0xff] %vm2611_vm15, %v3775_v13  ;;  %v5801_v10 = vld [vmem:[%s9377_s1 + $0x1e8] sm:$0xff]  ;;  %v5787_v13 = vld [vmem:[%s9377_s1 + $0x178] sm:$0xff] }
 0x4cb   : > { %4189 = vperm.xlu0 %6240, %v5753_v61   ;;  %v5786_v61 = vld [vmem:[%s9377_s1 + $0x170] sm:$0xff] }
 0x4cc   : > { %4392 = vperm.xlu1 %6241, %v5768_v45  }
 0x4cd   : > { %v3465_v39 = vpop.permute.xlu0 %3464  ;;  %v3569_v23 = vpop.permute.xlu1 %3568 }
 0x4ce   : > { %3484 = vst.msk [vmem:[#allocation3 + $0x40] sm:$0xff] %vm2296_vm10, %v3465_v39 }
 0x4cf   : > { %3588 = vst.msk [vmem:[#allocation3 + $0x40] sm:$0xff] %vm2401_vm12, %v3569_v23  ;;  %4595 = vperm.xlu0 %6240, %v5783_v56   ;;  %v5795_v23 = vld [vmem:[%s9377_s1 + $0x1b8] sm:$0xff] }
 0x4d0   : > { %3692 = vst.msk [vmem:[#allocation3 + $0x40] sm:$0xff] %vm2506_vm14, %v3673_v48  ;;  %4798 = vperm.xlu1 %6241, %v5798_v20   ;;  %v5779_v20 = vld [vmem:[%s9377_s1 + $0x138] sm:$0xff] }
 0x4d1   : > { %v3367_v25 = vpop.permute.xlu0 %3366  ;;  %v3802_v51 = vld [vmem:[#allocation3 + $0x20] sm:$0xff]  ;;  %v3471_v1 = vpop.permute.xlu1 %3470  ;;  %v3803_v4 = vld [vmem:[#allocation3 + $0x30] sm:$0xff] }
 0x4d2   : > { %5985 = vmatprep.mubr.msk.f32.mxu1 %vm2649_vm1, %v3802_v51  ;;  %v5803_v51 = vld [vmem:[%s9377_s1 + $0x1f8] sm:$0xff] }
 0x4d3   : > { %4293 = vperm.xlu0 %6240, %v5761_v16   ;;  %5986 = vmatmul.mubr.msk.f32.gmra.mrb[10].mxu1 %vm2649_vm1, %v3803_v4  ;;  %v5794_v4 = vld [vmem:[%s9377_s1 + $0x1b0] sm:$0xff] }
 0x4d4   : > { %4397 = vperm.xlu1 %6241, %v5769_v62  }
 0x4d5   : > { %v8571_v34 = vpop.permute.xlu0 %3676  ;;  %v3575_v33 = vpop.permute.xlu1 %3574 }
 0x4d7   : > { %4699 = vperm.xlu0 %6240, %v5791_v36   ;;  %v5811_v36 = vld [vmem:[%s9377_s1 + $0x238] sm:$0xff] }
 0x4d8   : > { %4803 = vperm.xlu1 %6241, %v5799_v22  }
 0x4d9   : > { %v3055_v9 = vpop.permute.xlu0 %3054  ;;  %v2951_v24 = vpop.permute.xlu1 %2950 }
 0x4da   : > { %2967 = vst.msk [vmem:[#allocation3 + $0x70] sm:$0xff] %vm1771_vm11, %v2951_v24  ;;  %v4042_v24 = vld [vmem:[#allocation2 + $0x7] sm:$0xff] }
 0x4db   : > { %4090 = vperm.xlu0 %6240, %v4056_v8   ;;  %3071 = vst.msk [vmem:[#allocation3 + $0x70] sm:$0xff] %vm1876_vm13, %v3055_v9 }
 0x4dc   : > { %4095 = vperm.xlu1 %6241, %v4057_v5   ;;  %v5810_v5 = vld [vmem:[%s9377_s1 + $0x230] sm:$0xff] }
 0x4dd   : > { %v3467_v50 = vpop.permute.xlu0 %3466  ;;  %v3157_v0 = vpop.permute.xlu1 %3156 }
 0x4de   : > { %3485 = vst.msk [vmem:[#allocation3 + $0x50] sm:$0xff] %vm2296_vm10, %v3467_v50 }
 0x4df   : > { %3174 = vst.msk [vmem:[#allocation3 + $0x60] sm:$0xff] %vm1981_vm7, %v3157_v0  ;;  %4496 = vperm.xlu0 %6240, %v5776_v57   ;;  %v4146_v0 = vld [vmem:[#allocation2 + $0x8] sm:$0xff] }
 0x4e0   : > { %4501 = vperm.xlu1 %6241, %v5777_v55  }
 0x4e1   : > { %v3159_v32 = vpop.permute.xlu0 %3158  ;;  %v3261_v43 = vpop.permute.xlu1 %3260 }
 0x4e2   : > { %3175 = vst.msk [vmem:[#allocation3 + $0x70] sm:$0xff] %vm1981_vm7, %v3159_v32 }
 0x4e3   : > { %3278 = vst.msk [vmem:[#allocation3 + $0x60] sm:$0xff] %vm2086_vm8, %v3261_v43  ;;  %4902 = vperm.xlu0 %6240, %v5806_v44  }
 0x4e4   : > { %4907 = vperm.xlu1 %6241, %v5807_v38  }
 0x4e5   : > { %v3571_v26 = vpop.permute.xlu0 %3570  ;;  %v3365_v48 = vpop.permute.xlu1 %3364 }
 0x4e6   : > { %3589 = vst.msk [vmem:[#allocation3 + $0x50] sm:$0xff] %vm2401_vm12, %v3571_v26 }
 0x4e7   : > { %3382 = vst.msk [vmem:[#allocation3 + $0x60] sm:$0xff] %vm2191_vm9, %v3365_v48  ;;  %4194 = vperm.xlu0 %6240, %v5754_v60  }
 0x4e8   : > { %4298 = vperm.xlu1 %6241, %v5762_v30  }
 0x4e9   : > { %v3263_v11 = vpop.permute.xlu0 %3262  ;;  %v3777_v37 = vpop.permute.xlu1 %3776 }
 0x4ea   : > { %3279 = vst.msk [vmem:[#allocation3 + $0x70] sm:$0xff] %vm2086_vm8, %v3263_v11 }
 0x4eb   : > { %3383 = vst.msk [vmem:[#allocation3 + $0x70] sm:$0xff] %vm2191_vm9, %v3367_v25  ;;  %4600 = vperm.xlu0 %6240, %v5784_v59   ;;  %v5809_v25 = vld [vmem:[%s9377_s1 + $0x228] sm:$0xff] }
 0x4ec   : > { %3796 = vst.msk [vmem:[#allocation3 + $0x40] sm:$0xff] %vm2611_vm15, %v3777_v37  ;;  %4704 = vperm.xlu1 %6241, %v5792_v6  }
 0x4ed   : > { %3487 = vst.msk [vmem:[#allocation3 + $0x70] sm:$0xff] %vm2296_vm10, %v3471_v1  ;;  %v3675_v63 = vpop.permute.xlu0 %3674  ;;  %v3469_v21 = vpop.permute.xlu1 %3468 }
 0x4ee   : > { %3591 = vst.msk [vmem:[#allocation3 + $0x70] sm:$0xff] %vm2401_vm12, %v3575_v33  ;;  %v5802_v33 = vld [vmem:[%s9377_s1 + $0x1f0] sm:$0xff] }
 0x4ef   : > { %3695 = vst.msk [vmem:[#allocation3 + $0x70] sm:$0xff] %vm2506_vm14, %v8360_v53  ;;  %3693 = vst.msk [vmem:[#allocation3 + $0x50] sm:$0xff] %vm2506_vm14, %v3675_v63  ;;  %4199 = vperm.xlu0 %6240, %v5755_v58  }
 0x4f0   : > { %3486 = vst.msk [vmem:[#allocation3 + $0x60] sm:$0xff] %vm2296_vm10, %v3469_v21  ;;  %4402 = vperm.xlu1 %6241, %v5770_v18  }
 0x4f1   : > { %v3779_v31 = vpop.permute.xlu0 %3778  ;;  %v3783_v27 = vpop.permute.xlu1 %3782 }
 0x4f2   : > { %3797 = vst.msk [vmem:[#allocation3 + $0x50] sm:$0xff] %vm2611_vm15, %v3779_v31  ;;  %3799 = vst.msk [vmem:[#allocation3 + $0x70] sm:$0xff] %vm2611_vm15, %v3783_v27 }
 0x4f3   : > { %v3804_v53 = vld [vmem:[#allocation3 + $0x40] sm:$0xff]  ;;  %4605 = vperm.xlu0 %6240, %v5785_v15  }
 0x4f4   : > { %5988 = vmatprep.mubr.msk.f32.mxu1 %vm2649_vm1, %v3804_v53  ;;  %4808 = vperm.xlu1 %6241, %v5800_v12  }
 0x4f5   : > { %v3573_v49 = vpop.permute.xlu0 %3572 }
 0x4f6   : > { %3590 = vst.msk [vmem:[#allocation3 + $0x60] sm:$0xff] %vm2401_vm12, %v3573_v49 }
 0x4f7   : > { %3694 = vst.msk [vmem:[#allocation3 + $0x60] sm:$0xff] %vm2506_vm14, %v8571_v34  ;;  %4303 = vperm.xlu0 %6240, %v5763_v28  }
 0x4f8   : > { %4506 = vperm.xlu1 %6241, %v5778_v47  }
 0x4f9   : > { %v3781_v35 = vpop.permute.xlu0 %3780  ;;  %v3805_v42 = vld [vmem:[#allocation3 + $0x50] sm:$0xff] }
 0x4fa   : > { %3798 = vst.msk [vmem:[#allocation3 + $0x60] sm:$0xff] %vm2611_vm15, %v3781_v35  ;;  %5989 = vmatmul.mubr.msk.f32.gmra.mrb[12].mxu1 %vm2649_vm1, %v3805_v42  ;;  %v3807_v56 = vld [vmem:[#allocation3 + $0x70] sm:$0xff] }
 0x4fb   : > { %4709 = vperm.xlu0 %6240, %v5793_v54  }
 0x4fc   : > { %4912 = vperm.xlu1 %6241, %v5808_v7  }
 0x4ff   : > { %4407 = vperm.xlu0 %6240, %v5771_v14  }
 0x500   : > { %4610 = vperm.xlu1 %6241, %v5786_v61  }
 0x501   : > { %v3806_v45 = vld [vmem:[#allocation3 + $0x60] sm:$0xff] }
 0x502   : > { %5991 = vmatprep.mubr.msk.f32.mxu1 %vm2649_vm1, %v3806_v45  ;;  %v8668_v39 = vpop.permute.xlu1 %4065 }
 0x503   : > { %4813 = vperm.xlu0 %6240, %v5801_v10   ;;  %5992 = vmatmul.mubr.msk.f32.gmra.mrb[14].mxu1 %vm2649_vm1, %v3807_v56 }
 0x504   : > { %4615 = vperm.xlu1 %6241, %v5787_v13  }
 0x506   : > { %v8677_v16 = vpop.permute.xlu1 %4169 }
 0x507   : > { %4511 = vperm.xlu0 %6240, %v5779_v20  }
 0x508   : > { %4719 = vperm.xlu1 %6241, %v5795_v23  }
 0x50a   : > { %v4061_v62 = vpop.permute.xlu0 %4060  ;;  %v8685_v1 = vpop.permute.xlu1 %4273 }
 0x50b   : > { %4917 = vperm.xlu0 %6240, %v5809_v25   ;;  %v4098_v55 = vmul.f32 %v4061_v62, %v4042_v24 }
 0x50c   : > { %4823 = vperm.xlu1 %6241, %v5803_v51  }
 0x50e   : > { %v4165_v34 = vpop.permute.xlu0 %4164  ;;  %v8693_v22 = vpop.permute.xlu1 %4070 }
 0x50f   : > { %4714 = vperm.xlu0 %6240, %v5794_v4   ;;  %v4202_v38 = vmul.f32 %v4165_v34, %v4146_v0 }
 0x510   : > { %4927 = vperm.xlu1 %6241, %v5811_v36  }
 0x512   : > { %v8698_v8 = vpop.permute.xlu0 %4268  ;;  %v8700_v9 = vpop.permute.xlu1 %4476 }
 0x513   : > { %4818 = vperm.xlu0 %6240, %v5802_v33  }
 0x516   : > { %v8705_v57 = vpop.permute.xlu0 %4372  ;;  %v8707_v50 = vpop.permute.xlu1 %4174 }
 0x517   : > { %4922 = vperm.xlu0 %6240, %v5810_v5  }
 0x51a   : > { %v8709_v44 = vpop.permute.xlu0 %4377  ;;  %v8711_v32 = vpop.permute.xlu1 %4580 }
 0x51b   : > { %4114 = vrot.lane.b32.xlu0 %v4098_v55, %s9502_s2 }
 0x51e   : > { %v8714_v43 = vpop.permute.xlu0 %4075  ;;  %v8716_v60 = vpop.permute.xlu1 %4278 }
 0x51f   : > { %4218 = vrot.lane.b32.xlu0 %v4202_v38, %s9506_s23 }
 0x522   : > { %v8719_v26 = vpop.permute.xlu0 %4481  ;;  %v8721_v30 = vpop.permute.xlu1 %4684 }
 0x526   : > { %v8723_v48 = vpop.permute.xlu0 %4179  ;;  %v8725_v59 = vpop.permute.xlu1 %4382 }
 0x52a   : > { %v8727_v11 = vpop.permute.xlu0 %4585  ;;  %v8729_v6 = vpop.permute.xlu1 %4788 }
 0x52e   : > { %v8731_v37 = vpop.permute.xlu0 %4283 }
 0x52f   : > { %v8733_v58 = vpop.permute.xlu1 %4387 }
 0x532   : > { %v8735_v63 = vpop.permute.xlu0 %4689 }
 0x533   : > { %v8737_v18 = vpop.permute.xlu1 %4793 }
 0x536   : > { %v8739_v21 = vpop.permute.xlu0 %4080 }
 0x537   : > { %v8741_v15 = vpop.permute.xlu1 %4085 }
 0x53a   : > { %v8743_v31 = vpop.permute.xlu0 %4486 }
 0x53b   : > { %v8745_v12 = vpop.permute.xlu1 %4491 }
 0x53e   : > { %v8747_v27 = vpop.permute.xlu0 %4892 }
 0x53f   : > { %v8749_v53 = vpop.permute.xlu1 %4897 }
 0x542   : > { %v8751_v28 = vpop.permute.xlu0 %4184 }
 0x543   : > { %v8753_v49 = vpop.permute.xlu1 %4288 }
 0x546   : > { %v8755_v47 = vpop.permute.xlu0 %4590 }
 0x547   : > { %v8757_v54 = vpop.permute.xlu1 %4694 }
 0x54a   : > { %v8759_v35 = vpop.permute.xlu0 %4189 }
 0x54b   : > { %v8761_v42 = vpop.permute.xlu1 %4392 }
 0x54e   : > { %v8763_v7 = vpop.permute.xlu0 %4595 }
 0x54f   : > { %v8765_v14 = vpop.permute.xlu1 %4798 }
 0x552   : > { %v8767_v61 = vpop.permute.xlu0 %4293 }
 0x553   : > { %v8769_v10 = vpop.permute.xlu1 %4397 }
 0x556   : > { %v8771_v45 = vpop.permute.xlu0 %4699 }
 0x557   : > { %v8773_v13 = vpop.permute.xlu1 %4803 }
 0x55a   : > { %v8775_v56 = vpop.permute.xlu0 %4090 }
 0x55b   : > { %v8777_v20 = vpop.permute.xlu1 %4095 }
 0x55c   : > { %9524 = vst [vmem:[#allocation39_spill] sm:$0xff] %v8777_v20 }
 0x55e   : > { %v8779_v23 = vpop.permute.xlu0 %4496 }
 0x55f   : > { %v8781_v25 = vpop.permute.xlu1 %4501 }
 0x562   : > { %v8783_v51 = vpop.permute.xlu0 %4902 }
 0x563   : > { %v8785_v62 = vpop.permute.xlu1 %4907 }
 0x566   : > { %v8787_v4 = vpop.permute.xlu0 %4194 }
 0x567   : > { %v8789_v36 = vpop.permute.xlu1 %4298 }
 0x568   : > { %9525 = vst [vmem:[#allocation27_spill] sm:$0xff] %v8789_v36 }
 0x56a   : > { %v8791_v34 = vpop.permute.xlu0 %4600 }
 0x56b   : > { %9526 = vst [vmem:[#allocation25_spill] sm:$0xff] %v8791_v34  ;;  %v8793_v33 = vpop.permute.xlu1 %4704 }
 0x56e   : > { %v8795_v5 = vpop.permute.xlu0 %4199 }
 0x56f   : > { %9527 = vst [vmem:[#allocation28_spill] sm:$0xff] %v8795_v5  ;;  %v8797_v24 = vpop.permute.xlu1 %4402 }
 0x570   : > { %9528 = vst [vmem:[#allocation26_spill] sm:$0xff] %v8797_v24 }
 0x572   : > { %v8799_v55 = vpop.permute.xlu0 %4605 }
 0x573   : > { %9529 = vst [vmem:[#allocation30_spill] sm:$0xff] %v8799_v55  ;;  %v8801_v0 = vpop.permute.xlu1 %4808 }
 0x576   : > { %v8803_v38 = vpop.permute.xlu0 %4303 }
 0x577   : > { %9530 = vst [vmem:[#allocation29_spill] sm:$0xff] %v8803_v38  ;;  %v8805_v3 = vpop.permute.xlu1 %4506 }
 0x578   : > { %9531 = vst [vmem:[#allocation31_spill] sm:$0xff] %v8805_v3 }
 0x57a   : > { %v8807_v40 = vpop.permute.xlu0 %4709 }
 0x57b   : > { %9532 = vst [vmem:[#allocation32_spill] sm:$0xff] %v8807_v40  ;;  %v8809_v52 = vpop.permute.xlu1 %4912 }
 0x57c   : > { %9533 = vst [vmem:[#allocation33_spill] sm:$0xff] %v8809_v52 }
 0x57e   : > { %v8811_v46 = vpop.permute.xlu0 %4407 }
 0x57f   : > { %9534 = vst [vmem:[#allocation34_spill] sm:$0xff] %v8811_v46  ;;  %v8813_v41 = vpop.permute.xlu1 %4610 }
 0x580   : > { %9535 = vst [vmem:[#allocation35_spill] sm:$0xff] %v8813_v41 }
 0x582   : > { %v8820_v19 = vpop.permute.xlu0 %4813  ;;  %v5984_v2 = vpop.f32.mrb[8].mxu1 }
 0x583   : > { %9536 = vst [vmem:[#allocation36_spill] sm:$0xff] %v8820_v19  ;;  %v3928_v38 = vadd.f32 %v5984_v2, %v8818_v17  ;;  %v8823_v24 = vpop.permute.xlu1 %4615  ;;  %v3922_v3 = vpop.f32.mrb[9].mxu1  ;;  %v4777_v2 = vld [vmem:[#allocation2 + $0x50] sm:$0xff] }
 0x584   : > { %9537 = vst [vmem:[#allocation38_spill] sm:$0xff] %v8823_v24  ;;  %v3923_v40 = vadd.f32 %v8818_v17, %v3922_v3 }
 0x585   : > { %vm3962_vm3 = vcmp.ge.f32.partialorder %v3928_v38, 0.0  ;;  %v3970_v52 = vmul.f32 0.05, %v3928_v38 }
 0x586   : > { %vm3961_vm4 = vcmp.ge.f32.partialorder %v3923_v40, 0.0  ;;  %v3969_v46 = vmul.f32 0.05, %v3923_v40  ;;  %v8826_v41 = vpop.permute.xlu0 %4511 }
 0x587   : > { %v3978_v55 = vsel %vm3962_vm3, %v3928_v38, %v3970_v52  ;;  %v8828_v36 = vpop.permute.xlu1 %4719 }
 0x588   : > { %3986 = vst.msk [vmem:[#allocation2 + $0x18] sm:$0xff] %vm540_vm0, %v3978_v55  ;;  %v3977_v19 = vsel %vm3961_vm4, %v3923_v40, %v3969_v46 }
 0x589   : > { %3985 = vst.msk [vmem:[#allocation2 + $0x10] sm:$0xff] %vm540_vm0, %v3977_v19 }
 0x58a   : > { %v8832_v5 = vpop.permute.xlu0 %4917 }
 0x58b   : > { %v4824_v20 = vpop.permute.xlu1 %4823 }
 0x58c   : > { %v4833_v24 = vmul.f32 %v4824_v20, %v4777_v2 }
 0x58e   : > { %4856 = vrot.lane.b32.xlu1 %v4833_v24, %s9494_s18  ;;  %v8835_v3 = vpop.permute.xlu0 %4714 }
 0x58f   : > { %v8837_v34 = vld [vmem:[#allocation2 + $0x18] sm:$0xff] }
 0x590   : > { %v4515_v52 = vmul.f32 %v8719_v26, %v8837_v34  ;;  %v4204_v55 = vmul.f32 %v8837_v34, %v8707_v50  ;;  %v4250_v40 = vld [vmem:[#allocation2 + $0x9] sm:$0xff]  ;;  %v4826_v19 = vmul.f32 %v8729_v6, %v8837_v34  ;;  %v4355_v2 = vld [vmem:[#allocation2 + $0x17] sm:$0xff] }
 0x591   : > { %v4306_v20 = vmul.f32 %v8698_v8, %v4250_v40  ;;  %v4354_v24 = vld [vmem:[#allocation2 + $0xf] sm:$0xff]  ;;  %v4411_v8 = vmul.f32 %v8709_v44, %v4355_v2 }
 0x592   : > { %v8843_v46 = vpop.permute.xlu0 %4818  ;;  %4532 = vrot.lane.b32.xlu0 %v4515_v52, %s9501_s29  ;;  %4222 = vrot.lane.b32.xlu1 %v4204_v55, %s9506_s23  ;;  %v4410_v50 = vmul.f32 %v8705_v57, %v4354_v24  ;;  %v4099_v26 = vmul.f32 %v4354_v24, %v8668_v39  ;;  %v8856_v52 = vld [vmem:[#allocation2 + $0x10] sm:$0xff]  ;;  %v4100_v57 = vmul.f32 %v4355_v2, %v8693_v22 }
 0x593   : > { %v4203_v6 = vmul.f32 %v8677_v16, %v8856_v52  ;;  %v4251_v40 = vld [vmem:[#allocation2 + $0x11] sm:$0xff] }
 0x594   : > { %v4307_v39 = vmul.f32 %v8685_v1, %v4251_v40 }
 0x596   : > { %v8850_v38 = vpop.permute.xlu0 %4922  ;;  %4842 = vrot.lane.b32.xlu1 %v4826_v19, %s9494_s18  ;;  %4322 = vrot.lane.b32.xlu0 %v4306_v20, %s9493_s20 }
 0x59a   : > { %v4115_v55 = vpop.permute.xlu0 %4114  ;;  %4426 = vrot.lane.b32.xlu0 %v4410_v50, %s9495_s27  ;;  %4116 = vrot.lane.b32.xlu1 %v4099_v26, %s9502_s2  ;;  %v4514_v50 = vmul.f32 %v8700_v9, %v8856_v52 }
 0x59b   : > { %4138 = vst.msk [vmem:[#allocation3] sm:$0xff] %vm1771_vm11, %v4115_v55 }
 0x59e   : > { %v4219_v19 = vpop.permute.xlu0 %4218  ;;  %4428 = vrot.lane.b32.xlu0 %v4411_v8, %s9495_s27  ;;  %4220 = vrot.lane.b32.xlu1 %v4203_v6, %s9506_s23  ;;  %v4618_v8 = vmul.f32 %v8711_v32, %v4251_v40  ;;  %v4722_v6 = vmul.f32 %v8721_v30, %v4355_v2  ;;  %v4986_v32 = vld [vmem:[%s9384_s8] sm:$0xff]  ;;  %v4987_v30 = vld [vmem:[%s9384_s8 + $0x8] sm:$0xff] }
 0x59f   : > { %4242 = vst.msk [vmem:[#allocation3] sm:$0xff] %vm1876_vm13, %v4219_v19 }
 0x5a2   : > { %4324 = vrot.lane.b32.xlu1 %v4307_v39, %s9493_s20 }
 0x5a6   : > { %v5987_v20 = vpop.f32.mrb[10].mxu1  ;;  %4118 = vrot.lane.b32.xlu1 %v4100_v57, %s9502_s2 }
 0x5a7   : > { %v3938_v44 = vadd.f32 %v5987_v20, %v8818_v17  ;;  %v3932_v16 = vpop.f32.mrb[11].mxu1  ;;  %v6137_v20 = vpack.c.bf16 %v4987_v30, %v4986_v32  ;;  %v4995_v32 = vld [vmem:[%s9384_s8 + $0x48] sm:$0xff] }
 0x5a8   : > { %v3933_v24 = vadd.f32 %v8818_v17, %v3932_v16 }
 0x5a9   : > { %vm3964_vm5 = vcmp.ge.f32.partialorder %v3938_v44, 0.0  ;;  %v3972_v26 = vmul.f32 0.05, %v3938_v44  ;;  %6138 = vmatprep.subr.bf16.mxu0 %v6137_v20 }
 0x5aa   : > { %vm3963_vm6 = vcmp.ge.f32.partialorder %v3933_v24, 0.0  ;;  %v3971_v55 = vmul.f32 0.05, %v3933_v24  ;;  %4530 = vrot.lane.b32.xlu1 %v4514_v50, %s9501_s29  ;;  %6140 = vmatpush3.bf16.msra.mxu0 %v6137_v20  ;;  %v4990_v50 = vld [vmem:[%s9384_s8 + $0x20] sm:$0xff] }
 0x5ab   : > { %v3980_v1 = vsel %vm3964_vm5, %v3938_v44, %v3972_v26  ;;  %v4988_v44 = vld [vmem:[%s9384_s8 + $0x10] sm:$0xff]  ;;  %v4991_v26 = vld [vmem:[%s9384_s8 + $0x28] sm:$0xff] }
 0x5ac   : > { %3988 = vst.msk [vmem:[#allocation2 + $0x28] sm:$0xff] %vm540_vm0, %v3980_v1  ;;  %v3979_v22 = vsel %vm3963_vm6, %v3933_v24, %v3971_v55  ;;  %v6145_v55 = vpack.c.bf16 %v4991_v26, %v4990_v50 }
 0x5ad   : > { %3987 = vst.msk [vmem:[#allocation2 + $0x20] sm:$0xff] %vm540_vm0, %v3979_v22 }
 0x5ae   : > { %4634 = vrot.lane.b32.xlu1 %v4618_v8, %s9475_s25  ;;  %v4992_v8 = vld [vmem:[%s9384_s8 + $0x30] sm:$0xff] }
 0x5b2   : > { %4738 = vrot.lane.b32.xlu1 %v4722_v6, %s9500_s21  ;;  %v4993_v6 = vld [vmem:[%s9384_s8 + $0x38] sm:$0xff] }
 0x5b3   : > { %v8882_v9 = vld [vmem:[#allocation2 + $0x28] sm:$0xff] }
 0x5b4   : > { %v4206_v19 = vmul.f32 %v8751_v28, %v8882_v9  ;;  %v4517_v39 = vmul.f32 %v8745_v12, %v8882_v9  ;;  %v4045_v57 = vld [vmem:[#allocation2 + $0x1f] sm:$0xff]  ;;  %v4828_v28 = vmul.f32 %v8765_v14, %v8882_v9  ;;  %v4357_v22 = vld [vmem:[#allocation2 + $0x27] sm:$0xff] }
 0x5b5   : > { %v4101_v2 = vmul.f32 %v8714_v43, %v4045_v57  ;;  %v8899_v40 = vld [vmem:[#allocation2 + $0x20] sm:$0xff]  ;;  %v4989_v43 = vld [vmem:[%s9384_s8 + $0x18] sm:$0xff]  ;;  %v4724_v50 = vmul.f32 %v8757_v54, %v4357_v22 }
 0x5b6   : > { %4226 = vrot.lane.b32.xlu0 %v4206_v19, %s9506_s23  ;;  %4536 = vrot.lane.b32.xlu1 %v4517_v39, %s9501_s29  ;;  %v8901_v12 = vld [vmem:[#allocation2 + $0x19] sm:$0xff]  ;;  %v4205_v14 = vmul.f32 %v8723_v48, %v8899_v40  ;;  %v6141_v24 = vpack.c.bf16 %v4989_v43, %v4988_v44  ;;  %v4253_v1 = vld [vmem:[#allocation2 + $0x21] sm:$0xff]  ;;  %v6149_v19 = vpack.c.bf16 %v4993_v6, %v4992_v8 }
 0x5b7   : > { %v4308_v16 = vmul.f32 %v8716_v60, %v8901_v12  ;;  %v4619_v48 = vmul.f32 %v8727_v11, %v8901_v12  ;;  %v4412_v60 = vmul.f32 %v8725_v59, %v4045_v57  ;;  %v4309_v11 = vmul.f32 %v8731_v37, %v4253_v1  ;;  %v4994_v39 = vld [vmem:[%s9384_s8 + $0x40] sm:$0xff] }
 0x5b8   : > { %6142 = vmatprep.subr.bf16.mxu0 %v6141_v24  ;;  %v4413_v59 = vmul.f32 %v8733_v58, %v4357_v22  ;;  %v6153_v30 = vpack.c.bf16 %v4995_v32, %v4994_v39  ;;  %v4827_v37 = vmul.f32 %v8737_v18, %v8899_v40  ;;  %v4996_v58 = vld [vmem:[%s9384_s8 + $0x50] sm:$0xff]  ;;  %v4930_v54 = vmul.f32 %v8747_v27, %v8901_v12 }
 0x5b9   : > { %6144 = vmatpush3.bf16.msra.mxu0 %v6141_v24 }
 0x5ba   : > { %4120 = vrot.lane.b32.xlu0 %v4101_v2, %s9502_s2  ;;  %4846 = vrot.lane.b32.xlu1 %v4828_v28, %s9494_s18  ;;  %v4723_v2 = vmul.f32 %v8735_v63, %v4045_v57  ;;  %v4997_v28 = vld [vmem:[%s9384_s8 + $0x58] sm:$0xff]  ;;  %v4102_v63 = vmul.f32 %v4357_v22, %v8739_v21  ;;  %v4931_v57 = vmul.f32 %v8749_v53, %v4253_v1  ;;  %v4998_v21 = vld [vmem:[%s9384_s8 + $0x60] sm:$0xff] }
 0x5bb   : > { %6146 = vmatprep.subr.bf16.mxu0 %v6145_v55  ;;  %v6157_v20 = vpack.c.bf16 %v4997_v28, %v4996_v58  ;;  %v4999_v53 = vld [vmem:[%s9384_s8 + $0x68] sm:$0xf] }
 0x5bc   : > { %v6161_v26 = vpack.c.bf16 %v4999_v53, %v4998_v21 }
 0x5bd   : > { %6148 = vmatpush3.bf16.msra.mxu0 %v6145_v55 }
 0x5be   : > { %4224 = vrot.lane.b32.xlu0 %v4205_v14, %s9506_s23  ;;  %4326 = vrot.lane.b32.xlu1 %v4308_v16, %s9493_s20  ;;  %v4516_v16 = vmul.f32 %v8743_v31, %v8899_v40 }
 0x5bf   : > { %6150 = vmatprep.subr.bf16.mxu0 %v6149_v19 }
 0x5c1   : > { %6152 = vmatpush3.bf16.msra.mxu0 %v6149_v19  ;;  %v4620_v19 = vmul.f32 %v8755_v47, %v4253_v1 }
 0x5c2   : > { %4636 = vrot.lane.b32.xlu0 %v4619_v48, %s9475_s25  ;;  %4430 = vrot.lane.b32.xlu1 %v4412_v60, %s9495_s27 }
 0x5c3   : > { %6154 = vmatprep.subr.bf16.mxu0 %v6153_v30 }
 0x5c5   : > { %6156 = vmatpush3.bf16.msra.mxu0 %v6153_v30 }
 0x5c6   : > { %4328 = vrot.lane.b32.xlu0 %v4309_v11, %s9493_s20  ;;  %4432 = vrot.lane.b32.xlu1 %v4413_v59, %s9495_s27 }
 0x5c7   : > { %6158 = vmatprep.subr.bf16.mxu0 %v6157_v20 }
 0x5c9   : > { %6160 = vmatpush3.bf16.msra.mxu0 %v6157_v20 }
 0x5ca   : > { %4740 = vrot.lane.b32.xlu0 %v4723_v2, %s9500_s21  ;;  %4844 = vrot.lane.b32.xlu1 %v4827_v37, %s9494_s18 }
 0x5cb   : > { %6163 = vmatprep.subr.msk.bf16.mxu0 %vm7570_vm2, %v6161_v26 }
 0x5cd   : > { %v5990_v18 = vpop.f32.mrb[12].mxu1  ;;  %6166 = vmatpush3.bf16.msk.msra.mxu0 %vm7570_vm2, %v6161_v26 }
 0x5ce   : > { %v3948_v44 = vadd.f32 %v5990_v18, %v8818_v17  ;;  %v3942_v43 = vpop.f32.mrb[13].mxu1  ;;  %4122 = vrot.lane.b32.xlu0 %v4102_v63, %s9502_s2  ;;  %4948 = vrot.lane.b32.xlu1 %v4931_v57, %s9503_s15 }
 0x5cf   : > { %v3943_v14 = vadd.f32 %v8818_v17, %v3942_v43 }
 0x5d0   : > { %vm3966_vm3 = vcmp.ge.f32.partialorder %v3948_v44, 0.0  ;;  %v3974_v24 = vmul.f32 0.05, %v3948_v44 }
 0x5d1   : > { %vm3965_vm4 = vcmp.ge.f32.partialorder %v3943_v14, 0.0  ;;  %v3973_v55 = vmul.f32 0.05, %v3943_v14 }
 0x5d2   : > { %v3982_v48 = vsel %vm3966_vm3, %v3948_v44, %v3974_v24  ;;  %4534 = vrot.lane.b32.xlu0 %v4516_v16, %s9501_s29  ;;  %4742 = vrot.lane.b32.xlu1 %v4724_v50, %s9500_s21  ;;  %vm5236_vm3 = vcmask 123904  }
 0x5d3   : > { %3990 = vst.msk [vmem:[#allocation2 + $0x38] sm:$0xff] %vm540_vm0, %v3982_v48  ;;  %v3981_v31 = vsel %vm3965_vm4, %v3943_v14, %v3973_v55  ;;  %v9541_v48 = vld [vmem:[#allocation28_spill] sm:$0xff] }
 0x5d4   : > { %3989 = vst.msk [vmem:[#allocation2 + $0x30] sm:$0xff] %vm540_vm0, %v3981_v31 }
 0x5d6   : > { %v5993_v60 = vpop.f32.mrb[14].mxu1  ;;  %4946 = vrot.lane.b32.xlu0 %v4930_v54, %s9503_s15 }
 0x5d7   : > { %v3958_v22 = vadd.f32 %v5993_v60, %v8818_v17  ;;  %v3952_v8 = vpop.f32.mrb[15].mxu1 }
 0x5d8   : > { %v3953_v6 = vadd.f32 %v8818_v17, %v3952_v8  ;;  %v9543_v8 = vld [vmem:[#allocation30_spill] sm:$0xff] }
 0x5d9   : > { %vm3968_vm5 = vcmp.ge.f32.partialorder %v3958_v22, 0.0  ;;  %v3976_v11 = vmul.f32 0.05, %v3958_v22 }
 0x5da   : > { %vm3967_vm6 = vcmp.ge.f32.partialorder %v3953_v6, 0.0  ;;  %v3975_v59 = vmul.f32 0.05, %v3953_v6  ;;  %4638 = vrot.lane.b32.xlu0 %v4620_v19, %s9475_s25  ;;  %v8985_v27 = vld [vmem:[#allocation2 + $0x38] sm:$0xff] }
 0x5db   : > { %v3984_v29 = vsel %vm3968_vm5, %v3958_v22, %v3976_v11  ;;  %v4519_v12 = vmul.f32 %v8781_v25, %v8985_v27  ;;  %v4208_v39 = vmul.f32 %v8985_v27, %v8787_v4  ;;  %v8994_v47 = vld [vmem:[#allocation2 + $0x30] sm:$0xff]  ;;  %v4830_v1 = vmul.f32 %v8801_v0, %v8985_v27  ;;  %v9544_v11 = vld [vmem:[#allocation26_spill] sm:$0xff] }
 0x5dc   : > { %3992 = vst.msk [vmem:[#allocation2 + $0x48] sm:$0xff] %vm540_vm0, %v3984_v29  ;;  %v3983_v17 = vsel %vm3967_vm6, %v3953_v6, %v3975_v59  ;;  %v4207_v25 = vmul.f32 %v8759_v35, %v8994_v47  ;;  %v4047_v32 = vld [vmem:[#allocation2 + $0x2f] sm:$0xff] }
 0x5dd   : > { %3991 = vst.msk [vmem:[#allocation2 + $0x40] sm:$0xff] %vm540_vm0, %v3983_v17  ;;  %4540 = vrot.lane.b32.xlu1 %v4519_v12, %s9501_s29  ;;  %v4565_v4 = vld [vmem:[#allocation2 + $0x29] sm:$0xff]  ;;  %v4103_v30 = vmul.f32 %v8741_v15, %v4047_v32  ;;  %v4255_v37 = vld [vmem:[#allocation2 + $0x31] sm:$0xff]  ;;  %v4414_v35 = vmul.f32 %v8761_v42, %v4047_v32  ;;  %v4725_v28 = vmul.f32 %v8771_v45, %v4047_v32  ;;  %v9545_v12 = vld [vmem:[#allocation29_spill] sm:$0xff] }
 0x5de   : > { %4230 = vrot.lane.b32.xlu0 %v4208_v39, %s9506_s23  ;;  %v4621_v2 = vmul.f32 %v8763_v7, %v4565_v4  ;;  %v4310_v0 = vmul.f32 %v4565_v4, %v8753_v49  ;;  %v4311_v58 = vmul.f32 %v8767_v61, %v4255_v37  ;;  %v4359_v15 = vld [vmem:[#allocation2 + $0x37] sm:$0xff]  ;;  %v4829_v49 = vmul.f32 %v8773_v13, %v8994_v47  ;;  %v9538_v13 = vld [vmem:[#allocation25_spill] sm:$0xff] }
 0x5df   : > { %v4415_v7 = vmul.f32 %v8769_v10, %v4359_v15  ;;  %v4104_v20 = vmul.f32 %v4359_v15, %v8775_v56  ;;  %v4518_v42 = vmul.f32 %v8779_v23, %v8994_v47  ;;  %v4933_v61 = vmul.f32 %v8785_v62, %v4255_v37  ;;  %v9030_v56 = vpop.permute.xlu1 %4927  ;;  %v9546_v17 = vld [vmem:[#allocation31_spill] sm:$0xff]  ;;  %v9547_v32 = vld [vmem:[#allocation32_spill] sm:$0xff] }
 0x5e0   : > { %v4932_v10 = vmul.f32 %v8783_v51, %v4565_v4  ;;  %v4726_v45 = vmul.f32 %v8793_v33, %v4359_v15  ;;  %v4622_v63 = vmul.f32 %v9538_v13, %v4255_v37  ;;  %v9539_v51 = vld [vmem:[#allocation38_spill] sm:$0xff]  ;;  %v9548_v37 = vld [vmem:[#allocation33_spill] sm:$0xff]  ;;  %v9550_v15 = vld [vmem:[#allocation35_spill] sm:$0xff] }
 0x5e1   : > { %4850 = vrot.lane.b32.xlu1 %v4830_v1, %s9494_s18 }
 0x5e2   : > { %4228 = vrot.lane.b32.xlu0 %v4207_v25, %s9506_s23 }
 0x5e3   : > { %v9033_v57 = vld [vmem:[#allocation2 + $0x49] sm:$0xff] }
 0x5e4   : > { %v9036_v23 = vld [vmem:[#allocation2 + $0x48] sm:$0xff]  ;;  %v4625_v62 = vmul.f32 %v9539_v51, %v9033_v57  ;;  %v4049_v53 = vld [vmem:[#allocation2 + $0x3f] sm:$0xff] }
 0x5e5   : > { %4124 = vrot.lane.b32.xlu1 %v4103_v30, %s9502_s2  ;;  %v4521_v33 = vmul.f32 %v8826_v41, %v9036_v23  ;;  %v4673_v44 = vld [vmem:[#allocation2 + $0x4f] sm:$0xff]  ;;  %v4832_v21 = vmul.f32 %v8843_v46, %v9036_v23  ;;  %v9051_v24 = vld [vmem:[#allocation2 + $0x40] sm:$0xff]  ;;  %v4416_v59 = vmul.f32 %v9544_v11, %v4049_v53  ;;  %v4727_v4 = vmul.f32 %v9547_v32, %v4049_v53 }
 0x5e6   : > { %4640 = vrot.lane.b32.xlu0 %v4621_v2, %s9475_s25  ;;  %v4729_v43 = vmul.f32 %v8828_v36, %v4673_v44  ;;  %v9540_v41 = vld [vmem:[#allocation39_spill] sm:$0xff]  ;;  %v4209_v31 = vmul.f32 %v9541_v48, %v9051_v24  ;;  %v4256_v36 = vld [vmem:[#allocation2 + $0x39] sm:$0xff]  ;;  %v4257_v19 = vld [vmem:[#allocation2 + $0x41] sm:$0xff]  ;;  %v4520_v1 = vmul.f32 %v9546_v17, %v9051_v24 }
 0x5e7   : > { %v4105_v50 = vmul.f32 %v9540_v41, %v4049_v53  ;;  %v9542_v46 = vld [vmem:[#allocation27_spill] sm:$0xff]  ;;  %v4623_v6 = vmul.f32 %v9543_v8, %v4256_v36  ;;  %v4313_v39 = vmul.f32 %v9545_v12, %v4257_v19  ;;  %v4361_v2 = vld [vmem:[#allocation2 + $0x47] sm:$0xff]  ;;  %v4935_v13 = vmul.f32 %v8832_v5, %v4257_v19  ;;  %v9558_v48 = vld [vmem:[#allocation44_spill] sm:$0xff] }
 0x5e8   : > { %v4312_v54 = vmul.f32 %v9542_v46, %v4256_v36  ;;  %v4728_v51 = vmul.f32 %v8835_v3, %v4361_v2  ;;  %v9556_v41 = vld [vmem:[#allocation47_spill] sm:$0xff] }
 0x5e9   : > { %4330 = vrot.lane.b32.xlu1 %v4310_v0, %s9493_s20  ;;  %v4934_v0 = vmul.f32 %v9548_v37, %v4256_v36 }
 0x5ea   : > { %4332 = vrot.lane.b32.xlu0 %v4311_v58, %s9493_s20 }
 0x5ed   : > { %4434 = vrot.lane.b32.xlu1 %v4414_v35, %s9495_s27  ;;  %v9549_v35 = vld [vmem:[#allocation34_spill] sm:$0xff] }
 0x5ee   : > { %4744 = vrot.lane.b32.xlu0 %v4725_v28, %s9500_s21  ;;  %v4417_v28 = vmul.f32 %v9549_v35, %v4361_v2 }
 0x5f1   : > { %4436 = vrot.lane.b32.xlu1 %v4415_v7, %s9495_s27  ;;  %v4624_v7 = vmul.f32 %v9550_v15, %v4257_v19 }
 0x5f2   : > { %4126 = vrot.lane.b32.xlu0 %v4104_v20, %s9502_s2  ;;  %v4881_v20 = vld [vmem:[#allocation2 + $0x51] sm:$0xff] }
 0x5f5   : > { %4848 = vrot.lane.b32.xlu1 %v4829_v49, %s9494_s18 }
 0x5f6   : > { %4538 = vrot.lane.b32.xlu0 %v4518_v42, %s9501_s29  ;;  %v9551_v42 = vld [vmem:[#allocation36_spill] sm:$0xff] }
 0x5f9   : > { %4952 = vrot.lane.b32.xlu1 %v4933_v61, %s9503_s15  ;;  %v4831_v61 = vmul.f32 %v9551_v42, %v9051_v24 }
 0x5fa   : > { %4950 = vrot.lane.b32.xlu0 %v4932_v10, %s9503_s15  ;;  %v4937_v10 = vmul.f32 %v9030_v56, %v4881_v20 }
 0x5fd   : > { %4746 = vrot.lane.b32.xlu1 %v4726_v45, %s9500_s21 }
 0x5fe   : > { %4642 = vrot.lane.b32.xlu0 %v4622_v63, %s9475_s25 }
 0x600   : > { %v9041_v18 = vpop.permute.xlu1 %4856 }
 0x601   : > { %4648 = vrot.lane.b32.xlu1 %v4625_v62, %s9475_s25  ;;  %v9552_v62 = vld [vmem:[#allocation37_spill] sm:$0xff] }
 0x602   : > { %4544 = vrot.lane.b32.xlu0 %v4521_v33, %s9501_s29  ;;  %v4936_v33 = vmul.f32 %v8850_v38, %v9033_v57 }
 0x604   : > { %v4533_v14 = vpop.permute.xlu0 %4532  ;;  %v4223_v16 = vpop.permute.xlu1 %4222 }
 0x605   : > { %4752 = vrot.lane.b32.xlu1 %v4729_v43, %s9500_s21  ;;  %v9553_v43 = vld [vmem:[#allocation41_spill] sm:$0xff] }
 0x606   : > { %4854 = vrot.lane.b32.xlu0 %v4832_v21, %s9494_s18 }
 0x608   : > { %v4843_v26 = vpop.permute.xlu1 %4842  ;;  %v4323_v55 = vpop.permute.xlu0 %4322 }
 0x609   : > { %4346 = vst.msk [vmem:[#allocation3] sm:$0xff] %vm1981_vm7, %v4323_v55  ;;  %4128 = vrot.lane.b32.xlu1 %v4105_v50, %s9502_s2 }
 0x60a   : > { %4232 = vrot.lane.b32.xlu0 %v4209_v31, %s9506_s23 }
 0x60c   : > { %v4427_v60 = vpop.permute.xlu0 %4426  ;;  %v4117_v22 = vpop.permute.xlu1 %4116 }
 0x60d   : > { %4450 = vst.msk [vmem:[#allocation3] sm:$0xff] %vm2086_vm8, %v4427_v60  ;;  %4334 = vrot.lane.b32.xlu1 %v4312_v54, %s9493_s20 }
 0x60e   : > { %4139 = vst.msk [vmem:[#allocation3 + $0x10] sm:$0xff] %vm1771_vm11, %v4117_v22  ;;  %4644 = vrot.lane.b32.xlu0 %v4623_v6, %s9475_s25 }
 0x610   : > { %v4221_v29 = vpop.permute.xlu1 %4220  ;;  %v4429_v30 = vpop.permute.xlu0 %4428 }
 0x611   : > { %4243 = vst.msk [vmem:[#allocation3 + $0x10] sm:$0xff] %vm1876_vm13, %v4221_v29  ;;  %4438 = vrot.lane.b32.xlu1 %v4416_v59, %s9495_s27 }
 0x612   : > { %4336 = vrot.lane.b32.xlu0 %v4313_v39, %s9493_s20  ;;  %s6365_s20 = smov 4  }
 0x614   : > { %v4325_v25 = vpop.permute.xlu1 %4324 }
 0x615   : > { %4347 = vst.msk [vmem:[#allocation3 + $0x10] sm:$0xff] %vm1981_vm7, %v4325_v25  ;;  %4542 = vrot.lane.b32.xlu1 %v4520_v1, %s9501_s29  ;;  %s9564_s29 = sld [smem:[#allocation13_spill]] }
 0x616   : > { %4451 = vst.msk [vmem:[#allocation3 + $0x10] sm:$0xff] %vm2086_vm8, %v4429_v30  ;;  %4748 = vrot.lane.b32.xlu0 %v4727_v4, %s9500_s21 }
 0x617   : > { %4555 = vst.msk [vmem:[#allocation3 + $0x10] sm:$0xff] %vm2191_vm9, %v4533_v14 }
 0x618   : > { %v4119_v58 = vpop.permute.xlu1 %4118 }
 0x619   : > { %4140 = vst.msk [vmem:[#allocation3 + $0x20] sm:$0xff] %vm1771_vm11, %v4119_v58  ;;  %4954 = vrot.lane.b32.xlu1 %v4934_v0, %s9503_s15 }
 0x61a   : > { %4244 = vst.msk [vmem:[#allocation3 + $0x20] sm:$0xff] %vm1876_vm13, %v4223_v16  ;;  %4440 = vrot.lane.b32.xlu0 %v4417_v28, %s9495_s27  ;;  %s6366_s27 = smov 12  }
 0x61b   : > { %s5837_s2 = sshll.u32 %s9564_s29, 10 }
 0x61c   : > { %v4531_v49 = vpop.permute.xlu1 %4530  ;;  %s9326_s0 = scalar_lea.hbm %s9571_s26, %s5837_s2 }
 0x61d   : > { %4554 = vst.msk [vmem:[#allocation3] sm:$0xff] %vm2191_vm9, %v4531_v49  ;;  %4646 = vrot.lane.b32.xlu1 %v4624_v7, %s9475_s25 }
 0x61e   : > { %4852 = vrot.lane.b32.xlu0 %v4831_v61, %s9494_s18  ;;  %s9560_s18 = sld [smem:[#allocation54_spill]] }
 0x620   : > { %v4635_v45 = vpop.permute.xlu1 %4634 }
 0x621   : > { %4658 = vst.msk [vmem:[#allocation3] sm:$0xff] %vm2296_vm10, %v4635_v45  ;;  %4960 = vrot.lane.b32.xlu1 %v4937_v10, %s9503_s15 }
 0x622   : > { %4956 = vrot.lane.b32.xlu0 %v4935_v13, %s9503_s15 }
 0x624   : > { %v4739_v63 = vpop.permute.xlu1 %4738 }
 0x625   : > { %4762 = vst.msk [vmem:[#allocation3] sm:$0xff] %vm2401_vm12, %v4739_v63  ;;  %2833 = vrot.lane.b32.xlu1 %v9552_v62, %s6365_s20 }
 0x626   : > { %4866 = vst.msk [vmem:[#allocation3] sm:$0xff] %vm2506_vm14, %v4843_v26  ;;  %4750 = vrot.lane.b32.xlu0 %v4728_v51, %s9500_s21 }
 0x628   : > { %v4227_v5 = vpop.permute.xlu0 %4226  ;;  %v4537_v56 = vpop.permute.xlu1 %4536 }
 0x629   : > { %4011 = vrot.lane.b32.xlu1 %v8837_v34, %s9506_s23  ;;  %v9554_v34 = vld [vmem:[#allocation45_spill] sm:$0xff] }
 0x62a   : > { %4958 = vrot.lane.b32.xlu0 %v4936_v33, %s9503_s15  ;;  %s9569_s15 = sld [smem:[#allocation16_spill]] }
 0x62c   : > { %v4121_v3 = vpop.permute.xlu0 %4120  ;;  %v4847_v44 = vpop.permute.xlu1 %4846 }
 0x62d   : > { %4141 = vst.msk [vmem:[#allocation3 + $0x30] sm:$0xff] %vm1771_vm11, %v4121_v3  ;;  %4013 = vrot.lane.b32.xlu1 %v8899_v40, %s9506_s23  ;;  %v9555_v40 = vld [vmem:[#allocation43_spill] sm:$0xff] }
 0x62e   : > { %2831 = vrot.lane.b32.xlu0 %v9553_v43, %s6365_s20 }
 0x630   : > { %v4225_v14 = vpop.permute.xlu0 %4224  ;;  %v4327_v16 = vpop.permute.xlu1 %4326  ;;  %p9573_p11 = scmp.ne.s32.totalorder %s9569_s15, 0 }
 0x631   : > { %4245 = vst.msk [vmem:[#allocation3 + $0x30] sm:$0xff] %vm1876_vm13, %v4225_v14  ;;  %2839 = vrot.lane.b32.xlu1 %v9554_v34, %s6365_s20 }
 0x632   : > { %4348 = vst.msk [vmem:[#allocation3 + $0x20] sm:$0xff] %vm1981_vm7, %v4327_v16  ;;  %4009 = vrot.lane.b32.xlu0 %v8856_v52, %s9506_s23  ;;  %v9557_v52 = vld [vmem:[#allocation42_spill] sm:$0xff] }
 0x634   : > { %v4637_v38 = vpop.permute.xlu0 %4636  ;;  %v4431_v57 = vpop.permute.xlu1 %4430 }
 0x635   : > { %4659 = vst.msk [vmem:[#allocation3 + $0x10] sm:$0xff] %vm2296_vm10, %v4637_v38  ;;  %4017 = vrot.lane.b32.xlu1 %v8994_v47, %s9506_s23 }
 0x636   : > { %4452 = vst.msk [vmem:[#allocation3 + $0x20] sm:$0xff] %vm2086_vm8, %v4431_v57  ;;  %2835 = vrot.lane.b32.xlu0 %v9555_v40, %s6365_s20 }
 0x638   : > { %v4329_v21 = vpop.permute.xlu0 %4328  ;;  %v4433_v53 = vpop.permute.xlu1 %4432 }
 0x639   : > { %4349 = vst.msk [vmem:[#allocation3 + $0x30] sm:$0xff] %vm1981_vm7, %v4329_v21  ;;  %2843 = vrot.lane.b32.xlu1 %v9556_v41, %s6365_s20 }
 0x63a   : > { %4453 = vst.msk [vmem:[#allocation3 + $0x30] sm:$0xff] %vm2086_vm8, %v4433_v53  ;;  %2837 = vrot.lane.b32.xlu0 %v9557_v52, %s6365_s20 }
 0x63b   : > { %4557 = vst.msk [vmem:[#allocation3 + $0x30] sm:$0xff] %vm2191_vm9, %v4537_v56 }
 0x63c   : > { %v4741_v50 = vpop.permute.xlu0 %4740  ;;  %v4845_v26 = vpop.permute.xlu1 %4844 }
 0x63d   : > { %4763 = vst.msk [vmem:[#allocation3 + $0x10] sm:$0xff] %vm2401_vm12, %v4741_v50  ;;  %4021 = vrot.lane.b32.xlu1 %v9051_v24, %s9506_s23 }
 0x63e   : > { %4867 = vst.msk [vmem:[#allocation3 + $0x10] sm:$0xff] %vm2506_vm14, %v4845_v26  ;;  %4015 = vrot.lane.b32.xlu0 %v8882_v9, %s9506_s23  ;;  %v9559_v9 = vld [vmem:[#allocation46_spill] sm:$0xff] }
 0x640   : > { %v4123_v47 = vpop.permute.xlu0 %4122  ;;  %v4949_v55 = vpop.permute.xlu1 %4948 }
 0x641   : > { %4142 = vst.msk [vmem:[#allocation3 + $0x40] sm:$0xff] %vm1771_vm11, %v4123_v47 }
 0x642   : > { %4971 = vst.msk [vmem:[#allocation3 + $0x10] sm:$0xff] %vm2611_vm15, %v4949_v55  ;;  %2841 = vrot.lane.b32.xlu0 %v9558_v48, %s6365_s20 }
 0x643   : > { %4246 = vst.msk [vmem:[#allocation3 + $0x40] sm:$0xff] %vm1876_vm13, %v4227_v5 }
 0x644   : > { %v4535_v31 = vpop.permute.xlu0 %4534  ;;  %v4743_v36 = vpop.permute.xlu1 %4742 }
 0x645   : > { %4556 = vst.msk [vmem:[#allocation3 + $0x20] sm:$0xff] %vm2191_vm9, %v4535_v31 }
 0x646   : > { %4019 = vrot.lane.b32.xlu0 %v8985_v27, %s9506_s23 }
 0x648   : > { %v4947_v24 = vpop.permute.xlu0 %4946 }
 0x649   : > { %4970 = vst.msk [vmem:[#allocation3] sm:$0xff] %vm2611_vm15, %v4947_v24  ;;  %v4979_v27 = vld [vmem:[#allocation3 + $0x10] sm:$0xff] }
 0x64a   : > { %2845 = vrot.lane.b32.xlu0 %v9559_v9, %s6365_s20  ;;  %s6280_s20 = sshll.u32 %s6367_s6, 4  ;;  %s6281_s20 = int_to_ptr.vmem [resolvable:$false] %s6280_s20 }
 0x64b   : > { %s6282_s25 = scalar_lea.vmem %s6281_s20, 2048 }
 0x64c   : > { %v4639_v46 = vpop.permute.xlu0 %4638 }
 0x64d   : > { %4660 = vst.msk [vmem:[#allocation3 + $0x20] sm:$0xff] %vm2296_vm10, %v4639_v46 }
 0x64e   : > { %4764 = vst.msk [vmem:[#allocation3 + $0x20] sm:$0xff] %vm2401_vm12, %v4743_v36  ;;  %v5812_v36 = vld [vmem:[%s9385_s9] ss:$0 sm:$0xff] }
 0x64f   : > { %4868 = vst.msk [vmem:[#allocation3 + $0x20] sm:$0xff] %vm2506_vm14, %v4847_v44  ;;  %v4541_v54 = vpop.permute.xlu1 %4540 }
 0x650   : > { %v4231_v60 = vpop.permute.xlu0 %4230  ;;  %v4978_v22 = vld [vmem:[#allocation3] sm:$0xff] }
 0x651   : > { %6022 = vmatprep.mubr.msk.f32.mxu0 %vm2649_vm1, %v4978_v22 }
 0x652   : > { %6023 = vmatmul.mubr.msk.f32.vlgmr.msra.gmra.mrb[16].mxu0 %vm2649_vm1, %v4979_v27 }
 0x653   : > { %v4851_v8 = vpop.permute.xlu1 %4850 }
 0x654   : > { %v4229_v6 = vpop.permute.xlu0 %4228 }
 0x657   : > { %v4125_v19 = vpop.permute.xlu1 %4124 }
 0x658   : > { %4143 = vst.msk [vmem:[#allocation3 + $0x50] sm:$0xff] %vm1771_vm11, %v4125_v19  ;;  %v4641_v11 = vpop.permute.xlu0 %4640 }
 0x659   : > { %4247 = vst.msk [vmem:[#allocation3 + $0x50] sm:$0xff] %vm1876_vm13, %v4229_v6 }
 0x65a   : > { %4661 = vst.msk [vmem:[#allocation3 + $0x30] sm:$0xff] %vm2296_vm10, %v4641_v11 }
 0x65b   : > { %v4331_v59 = vpop.permute.xlu1 %4330 }
 0x65c   : > { %4350 = vst.msk [vmem:[#allocation3 + $0x40] sm:$0xff] %vm1981_vm7, %v4331_v59  ;;  %v4333_v29 = vpop.permute.xlu0 %4332 }
 0x65d   : > { %4351 = vst.msk [vmem:[#allocation3 + $0x50] sm:$0xff] %vm1981_vm7, %v4333_v29 }
 0x65f   : > { %v4435_v12 = vpop.permute.xlu1 %4434 }
 0x660   : > { %4454 = vst.msk [vmem:[#allocation3 + $0x40] sm:$0xff] %vm2086_vm8, %v4435_v12  ;;  %v4745_v39 = vpop.permute.xlu0 %4744 }
 0x661   : > { %4765 = vst.msk [vmem:[#allocation3 + $0x30] sm:$0xff] %vm2401_vm12, %v4745_v39 }
 0x663   : > { %v4437_v17 = vpop.permute.xlu1 %4436 }
 0x664   : > { %4455 = vst.msk [vmem:[#allocation3 + $0x50] sm:$0xff] %vm2086_vm8, %v4437_v17  ;;  %v4127_v1 = vpop.permute.xlu0 %4126 }
 0x665   : > { %4559 = vst.msk [vmem:[#allocation3 + $0x50] sm:$0xff] %vm2191_vm9, %v4541_v54 }
 0x666   : > { %4144 = vst.msk [vmem:[#allocation3 + $0x60] sm:$0xff] %vm1771_vm11, %v4127_v1 }
 0x667   : > { %4248 = vst.msk [vmem:[#allocation3 + $0x60] sm:$0xff] %vm1876_vm13, %v4231_v60  ;;  %v4849_v25 = vpop.permute.xlu1 %4848 }
 0x668   : > { %4869 = vst.msk [vmem:[#allocation3 + $0x30] sm:$0xff] %vm2506_vm14, %v4849_v25  ;;  %v4539_v32 = vpop.permute.xlu0 %4538 }
 0x669   : > { %4558 = vst.msk [vmem:[#allocation3 + $0x40] sm:$0xff] %vm2191_vm9, %v4539_v32 }
 0x66b   : > { %v4953_v4 = vpop.permute.xlu1 %4952 }
 0x66c   : > { %4973 = vst.msk [vmem:[#allocation3 + $0x30] sm:$0xff] %vm2611_vm15, %v4953_v4  ;;  %v4951_v30 = vpop.permute.xlu0 %4950 }
 0x66d   : > { %4972 = vst.msk [vmem:[#allocation3 + $0x20] sm:$0xff] %vm2611_vm15, %v4951_v30 }
 0x66f   : > { %v4747_v2 = vpop.permute.xlu1 %4746 }
 0x670   : > { %v4643_v37 = vpop.permute.xlu0 %4642 }
 0x671   : > { %4662 = vst.msk [vmem:[#allocation3 + $0x40] sm:$0xff] %vm2296_vm10, %v4643_v37 }
 0x672   : > { %4766 = vst.msk [vmem:[#allocation3 + $0x40] sm:$0xff] %vm2401_vm12, %v4747_v2 }
 0x673   : > { %4870 = vst.msk [vmem:[#allocation3 + $0x40] sm:$0xff] %vm2506_vm14, %v4851_v8  ;;  %v4649_v0 = vpop.permute.xlu1 %4648  ;;  %v4981_v28 = vld [vmem:[#allocation3 + $0x30] sm:$0xff] }
 0x674   : > { %v4545_v58 = vpop.permute.xlu0 %4544  ;;  %v4980_v35 = vld [vmem:[#allocation3 + $0x20] sm:$0xff] }
 0x675   : > { %6025 = vmatprep.mubr.msk.f32.mxu0 %vm2649_vm1, %v4980_v35 }
 0x676   : > { %6026 = vmatmul.mubr.msk.f32.gmra.mrb[18].mxu0 %vm2649_vm1, %v4981_v28 }
 0x677   : > { %v4753_v15 = vpop.permute.xlu1 %4752 }
 0x678   : > { %v4855_v7 = vpop.permute.xlu0 %4854 }
 0x67b   : > { %v4129_v20 = vpop.permute.xlu1 %4128 }
 0x67c   : > { %4145 = vst.msk [vmem:[#allocation3 + $0x70] sm:$0xff] %vm1771_vm11, %v4129_v20  ;;  %v4233_v49 = vpop.permute.xlu0 %4232  ;;  %vm2855_vm11 = vcmask 64544  }
 0x67d   : > { %4249 = vst.msk [vmem:[#allocation3 + $0x70] sm:$0xff] %vm1876_vm13, %v4233_v49  ;;  %vm4033_vm13 = vcmask 97344  }
 0x67f   : > { %v4335_v42 = vpop.permute.xlu1 %4334 }
 0x680   : > { %4352 = vst.msk [vmem:[#allocation3 + $0x60] sm:$0xff] %vm1981_vm7, %v4335_v42  ;;  %v4645_v61 = vpop.permute.xlu0 %4644 }
 0x681   : > { %4663 = vst.msk [vmem:[#allocation3 + $0x50] sm:$0xff] %vm2296_vm10, %v4645_v61 }
 0x683   : > { %v4439_v10 = vpop.permute.xlu1 %4438 }
 0x684   : > { %4456 = vst.msk [vmem:[#allocation3 + $0x60] sm:$0xff] %vm2086_vm8, %v4439_v10  ;;  %v4337_v45 = vpop.permute.xlu0 %4336 }
 0x685   : > { %4353 = vst.msk [vmem:[#allocation3 + $0x70] sm:$0xff] %vm1981_vm7, %v4337_v45 }
 0x687   : > { %v4543_v13 = vpop.permute.xlu1 %4542 }
 0x688   : > { %4560 = vst.msk [vmem:[#allocation3 + $0x60] sm:$0xff] %vm2191_vm9, %v4543_v13  ;;  %v4749_v63 = vpop.permute.xlu0 %4748 }
 0x689   : > { %4767 = vst.msk [vmem:[#allocation3 + $0x50] sm:$0xff] %vm2401_vm12, %v4749_v63 }
 0x68b   : > { %v4955_v51 = vpop.permute.xlu1 %4954 }
 0x68c   : > { %4974 = vst.msk [vmem:[#allocation3 + $0x40] sm:$0xff] %vm2611_vm15, %v4955_v51  ;;  %v4441_v62 = vpop.permute.xlu0 %4440 }
 0x68d   : > { %4457 = vst.msk [vmem:[#allocation3 + $0x70] sm:$0xff] %vm2086_vm8, %v4441_v62 }
 0x68e   : > { %4561 = vst.msk [vmem:[#allocation3 + $0x70] sm:$0xff] %vm2191_vm9, %v4545_v58 }
 0x68f   : > { %4665 = vst.msk [vmem:[#allocation3 + $0x70] sm:$0xff] %vm2296_vm10, %v4649_v0  ;;  %v4647_v5 = vpop.permute.xlu1 %4646 }
 0x690   : > { %4769 = vst.msk [vmem:[#allocation3 + $0x70] sm:$0xff] %vm2401_vm12, %v4753_v15  ;;  %v4853_v56 = vpop.permute.xlu0 %4852 }
 0x691   : > { %4664 = vst.msk [vmem:[#allocation3 + $0x60] sm:$0xff] %vm2296_vm10, %v4647_v5 }
 0x692   : > { %4873 = vst.msk [vmem:[#allocation3 + $0x70] sm:$0xff] %vm2506_vm14, %v9041_v18  ;;  %4871 = vst.msk [vmem:[#allocation3 + $0x50] sm:$0xff] %vm2506_vm14, %v4853_v56 }
 0x693   : > { %v4961_v33 = vpop.permute.xlu1 %4960  ;;  %v4982_v3 = vld [vmem:[#allocation3 + $0x40] sm:$0xff] }
 0x694   : > { %4977 = vst.msk [vmem:[#allocation3 + $0x70] sm:$0xff] %vm2611_vm15, %v4961_v33  ;;  %v4957_v44 = vpop.permute.xlu0 %4956  ;;  %6028 = vmatprep.mubr.msk.f32.mxu0 %vm2649_vm1, %v4982_v3 }
 0x695   : > { %4975 = vst.msk [vmem:[#allocation3 + $0x50] sm:$0xff] %vm2611_vm15, %v4957_v44 }
 0x697   : > { %v2834_v43 = vpop.permute.xlu1 %2833 }
 0x698   : > { %2857 = vst.msk [vmem:[#allocation4 + $0x8] sm:$0xff] %vm2855_vm11, %v2834_v43  ;;  %v4751_v14 = vpop.permute.xlu0 %4750 }
 0x699   : > { %4768 = vst.msk [vmem:[#allocation3 + $0x60] sm:$0xff] %vm2401_vm12, %v4751_v14 }
 0x69a   : > { %4872 = vst.msk [vmem:[#allocation3 + $0x60] sm:$0xff] %vm2506_vm14, %v4855_v7 }
 0x69b   : > { %v4012_v18 = vpop.permute.xlu1 %4011  ;;  %v4985_v41 = vld [vmem:[#allocation3 + $0x70] sm:$0xff] }
 0x69c   : > { %4035 = vst.msk [vmem:[#allocation4 + $0x8] sm:$0xff] %vm4033_vm13, %v4012_v18  ;;  %v4959_v16 = vpop.permute.xlu0 %4958  ;;  %v4983_v34 = vld [vmem:[#allocation3 + $0x50] sm:$0xff] }
 0x69d   : > { %4976 = vst.msk [vmem:[#allocation3 + $0x60] sm:$0xff] %vm2611_vm15, %v4959_v16  ;;  %6029 = vmatmul.mubr.msk.f32.gmra.mrb[20].mxu0 %vm2649_vm1, %v4983_v34 }
 0x69f   : > { %v4014_v38 = vpop.permute.xlu1 %4013 }
 0x6a0   : > { %v2832_v57 = vpop.permute.xlu0 %2831 }
 0x6a1   : > { %2856 = vst.msk [vmem:[#allocation4] sm:$0xff] %vm2855_vm11, %v2832_v57 }
 0x6a3   : > { %v2840_v40 = vpop.permute.xlu1 %2839 }
 0x6a4   : > { %2860 = vst.msk [vmem:[#allocation4 + $0x20] sm:$0xff] %vm2855_vm11, %v2840_v40  ;;  %v4010_v21 = vpop.permute.xlu0 %4009  ;;  %v4984_v53 = vld [vmem:[#allocation3 + $0x60] sm:$0xff] }
 0x6a5   : > { %4034 = vst.msk [vmem:[#allocation4] sm:$0xff] %vm4033_vm13, %v4010_v21  ;;  %6031 = vmatprep.mubr.msk.f32.mxu0 %vm2649_vm1, %v4984_v53 }
 0x6a6   : > { %6032 = vmatmul.mubr.msk.f32.gmra.mrb[22].mxu0 %vm2649_vm1, %v4985_v41  ;;  %vm5195_vm1 = vcmask 130144  }
 0x6a7   : > { %v4018_v52 = vpop.permute.xlu1 %4017 }
 0x6a8   : > { %4038 = vst.msk [vmem:[#allocation4 + $0x20] sm:$0xff] %vm4033_vm13, %v4018_v52  ;;  %v2836_v50 = vpop.permute.xlu0 %2835 }
 0x6a9   : > { %2858 = vst.msk [vmem:[#allocation4 + $0x10] sm:$0xff] %vm2855_vm11, %v2836_v50 }
 0x6aa   : > { %4036 = vst.msk [vmem:[#allocation4 + $0x10] sm:$0xff] %vm4033_vm13, %v4014_v38 }
 0x6ab   : > { %v2844_v26 = vpop.permute.xlu1 %2843 }
 0x6ac   : > { %2862 = vst.msk [vmem:[#allocation4 + $0x30] sm:$0xff] %vm2855_vm11, %v2844_v26  ;;  %v2838_v47 = vpop.permute.xlu0 %2837 }
 0x6ad   : > { %2859 = vst.msk [vmem:[#allocation4 + $0x18] sm:$0xff] %vm2855_vm11, %v2838_v47 }
 0x6af   : > { %v4022_v55 = vpop.permute.xlu1 %4021 }
 0x6b0   : > { %4040 = vst.msk [vmem:[#allocation4 + $0x30] sm:$0xff] %vm4033_vm13, %v4022_v55  ;;  %v4016_v48 = vpop.permute.xlu0 %4015 }
 0x6b1   : > { %4037 = vst.msk [vmem:[#allocation4 + $0x18] sm:$0xff] %vm4033_vm13, %v4016_v48 }
 0x6b4   : > { %v2842_v31 = vpop.permute.xlu0 %2841 }
 0x6b5   : > { %2861 = vst.msk [vmem:[#allocation4 + $0x28] sm:$0xff] %vm2855_vm11, %v2842_v31 }
 0x6b8   : > { %v4020_v24 = vpop.permute.xlu0 %4019 }
 0x6b9   : > { %4039 = vst.msk [vmem:[#allocation4 + $0x28] sm:$0xff] %vm4033_vm13, %v4020_v24 }
 0x6bc   : > { %v2846_v9 = vpop.permute.xlu0 %2845 }
 0x6bd   : > { %2863 = vst.msk [vmem:[#allocation4 + $0x38] sm:$0xff] %vm2855_vm11, %v2846_v9 }
 0x725   : > { %v6024_v46 = vpop.f32.mrb[16].mxu0 }
 0x726   : > { %v5106_v54 = vadd.f32 %v6024_v46, %v5812_v36  ;;  %v5100_v60 = vpop.f32.mrb[17].mxu0 }
 0x727   : > { %v5101_v22 = vadd.f32 %v5812_v36, %v5100_v60 }
 0x728   : > { %vm5140_vm2 = vcmp.ge.f32.partialorder %v5106_v54, 0.0  ;;  %v5148_v27 = vmul.f32 0.05, %v5106_v54 }
 0x729   : > { %vm5139_vm7 = vcmp.ge.f32.partialorder %v5101_v22, 0.0  ;;  %v5147_v8 = vmul.f32 0.05, %v5101_v22 }
 0x72a   : > { %v5156_v6 = vsel %vm5140_vm2, %v5106_v54, %v5148_v27 }
 0x72b   : > { %5173 = vrot.lane.b32.xlu0 %v5156_v6, %s6366_s27  ;;  %v5155_v19 = vsel %vm5139_vm7, %v5101_v22, %v5147_v8  ;;  %v5234_v6 = vld [vmem:[%s9386_s10] sm:$0x3] }
 0x72c   : > { %5171 = vrot.lane.b32.xlu1 %v5155_v19, %s6366_s27 }
 0x749   : > { %v6027_v11 = vpop.f32.mrb[18].mxu0 }
 0x74a   : > { %v5116_v59 = vadd.f32 %v6027_v11, %v5812_v36  ;;  %v5110_v29 = vpop.f32.mrb[19].mxu0 }
 0x74b   : > { %v5111_v12 = vadd.f32 %v5812_v36, %v5110_v29  ;;  %v5240_v29 = vld [vmem:[%s9387_s11] sm:$0x3] }
 0x74c   : > { %vm5142_vm8 = vcmp.ge.f32.partialorder %v5116_v59, 0.0  ;;  %v5150_v39 = vmul.f32 0.05, %v5116_v59 }
 0x74d   : > { %vm5141_vm9 = vcmp.ge.f32.partialorder %v5111_v12, 0.0  ;;  %v5149_v17 = vmul.f32 0.05, %v5111_v12 }
 0x74e   : > { %v5158_v1 = vsel %vm5142_vm8, %v5116_v59, %v5150_v39 }
 0x74f   : > { %5177 = vrot.lane.b32.xlu0 %v5158_v1, %s6366_s27  ;;  %v5157_v25 = vsel %vm5141_vm9, %v5111_v12, %v5149_v17  ;;  %v5277_v1 = vld [vmem:[%s9390_s14] sm:$0xff] }
 0x750   : > { %5175 = vrot.lane.b32.xlu1 %v5157_v25, %s6366_s27  ;;  %v5278_v25 = vld [vmem:[%s9390_s14 + $0x8] sm:$0xff] }
 0x770   : > { %v6030_v32 = vpop.f32.mrb[20].mxu0 }
 0x771   : > { %v5126_v4 = vadd.f32 %v6030_v32, %v5812_v36  ;;  %v5120_v30 = vpop.f32.mrb[21].mxu0  ;;  %v6167_v32 = vpack.c.bf16 %v5278_v25, %v5277_v1 }
 0x772   : > { %v5121_v2 = vadd.f32 %v5812_v36, %v5120_v30 }
 0x773   : > { %vm5144_vm10 = vcmp.ge.f32.partialorder %v5126_v4, 0.0  ;;  %v5152_v37 = vmul.f32 0.05, %v5126_v4  ;;  %6168 = vmatprep.subr.bf16.mxu1 %v6167_v32 }
 0x774   : > { %vm5143_vm12 = vcmp.ge.f32.partialorder %v5121_v2, 0.0  ;;  %v5151_v0 = vmul.f32 0.05, %v5121_v2  ;;  %6170 = vmatpush3.bf16.msra.mxu1 %v6167_v32 }
 0x775   : > { %v5160_v58 = vsel %vm5144_vm10, %v5126_v4, %v5152_v37  ;;  %v5243_v4 = vld [vmem:[%s9388_s12] sm:$0x3] }
 0x776   : > { %5181 = vrot.lane.b32.xlu0 %v5160_v58, %s6366_s27  ;;  %v5159_v35 = vsel %vm5143_vm12, %v5121_v2, %v5151_v0 }
 0x777   : > { %5179 = vrot.lane.b32.xlu1 %v5159_v35, %s6366_s27 }
 0x779   : > { %v6033_v28 = vpop.f32.mrb[22].mxu0 }
 0x77a   : > { %v5130_v15 = vpop.f32.mrb[23].mxu0  ;;  %4023 = vrot.lane.b32.xlu0 %v9036_v23, %s9506_s23  ;;  %v5136_v7 = vadd.f32 %v6033_v28, %v5812_v36 }
 0x77b   : > { %v5131_v20 = vadd.f32 %v5812_v36, %v5130_v15 }
 0x77c   : > { %v5154_v42 = vmul.f32 0.05, %v5136_v7  ;;  %vm5146_vm15 = vcmp.ge.f32.partialorder %v5136_v7, 0.0 }
 0x77d   : > { %vm5145_vm14 = vcmp.ge.f32.partialorder %v5131_v20, 0.0  ;;  %v5153_v49 = vmul.f32 0.05, %v5131_v20 }
 0x77e   : > { %v5162_v10 = vsel %vm5146_vm15, %v5136_v7, %v5154_v42  ;;  %v5257_v7 = vld [vmem:[%s9389_s13] sm:$0x1] }
 0x77f   : > { %v5161_v61 = vsel %vm5145_vm14, %v5131_v20, %v5153_v49 }
 0x780   : > { %5183 = vrot.lane.b32.xlu1 %v5161_v61, %s6366_s27 }
 0x784   : > { %5185 = vrot.lane.b32.xlu1 %v5162_v10, %s6366_s27  ;;  %s9563_s27 = sshll.u32 %s6558_s28, 6 }
 0x785   : > { %s539_s21 = scalar_lea.vmem [#allocation8], %s9563_s27 }
 0x786   : > { %s5445_s3 = sshll.u32 %s539_s21, 4  ;;  %s9329_s3 = int_to_ptr.vmem [resolvable:$true] %s5445_s3 }
 0x787   : > { %s6276_s5 = scalar_lea.vmem %s9329_s3, 1024  ;;  %p6283_p8 = scmp.lt.s32.totalorder %s9329_s3, %s6281_s20 }
 0x788   : > { %p6277_p6 = scmp.ne.s32.totalorder %s9329_s3, %s6276_s5  ;;  %p6284_p10 = scmp.lt.s32.totalorder %s6282_s25, %s6276_s5 }
 0x78a   : > { %p6278_p12 = pnand %p6277_p6, %p9573_p11  ;;  %p6285_p0 = por %p6284_p10, %p6283_p8 }
 0x78c   : > { %p6279_p13 = pneg %p6278_p12 }
 0x78e   : > { %p6286_p2 = pnand %p6285_p0, %p6279_p13 }
 0x79d   : > { %v5174_v45 = vpop.permute.xlu0 %5173 }
 0x79e   : > { %5197 = vst.msk [vmem:[#allocation4 + $0x8] sm:$0xff] %vm5195_vm1, %v5174_v45  ;;  %v5172_v13 = vpop.permute.xlu1 %5171 }
 0x79f   : > { %5196 = vst.msk [vmem:[#allocation4] sm:$0xff] %vm5195_vm1, %v5172_v13  ;;  %v5265_v13 = vlaneseq }
 0x7a5   : > { %v9235_v56 = vld [vmem:[#allocation4 + $0x8] sm:$0xff] }
 0x7a6   : > { %v9233_v5 = vld [vmem:[#allocation4] sm:$0xff]  ;;  %v5213_v43 = vsel %vm540_vm0, %v9235_v56, 0.0 }
 0x7a7   : > { %v5212_v44 = vsel %vm540_vm0, %v9233_v5, 0.0 }
 0x7a8   : > { %v5214_v18 = vadd.f32 %v5213_v43, %v5212_v44 }
 0x7c1   : > { %v5178_v23 = vpop.permute.xlu0 %5177 }
 0x7c2   : > { %5199 = vst.msk [vmem:[#allocation4 + $0x18] sm:$0xff] %vm5195_vm1, %v5178_v23  ;;  %v5176_v63 = vpop.permute.xlu1 %5175  ;;  %v5266_v23 = vshrl.u32 %v5265_v13, 7 }
 0x7c3   : > { %5198 = vst.msk [vmem:[#allocation4 + $0x10] sm:$0xff] %vm5195_vm1, %v5176_v63 }
 0x7c4   : > { %v5267_v63 = vsub.s32 0, %v5266_v23 }
 0x7c9   : > { %v9246_v34 = vld [vmem:[#allocation4 + $0x18] sm:$0xff] }
 0x7ca   : > { %v9237_v3 = vld [vmem:[#allocation4 + $0x10] sm:$0xff]  ;;  %v5217_v40 = vsel %vm540_vm0, %v9246_v34, 0.0 }
 0x7cb   : > { %v5215_v14 = vsel %vm540_vm0, %v9237_v3, 0.0 }
 0x7cc   : > { %v5216_v57 = vadd.f32 %v5215_v14, %v5214_v18 }
 0x7ce   : > { %v5218_v41 = vadd.f32 %v5217_v40, %v5216_v57 }
 0x7e8   : > { %v5182_v51 = vpop.permute.xlu0 %5181 }
 0x7e9   : > { %5201 = vst.msk [vmem:[#allocation4 + $0x28] sm:$0xff] %vm5195_vm1, %v5182_v51  ;;  %v5180_v62 = vpop.permute.xlu1 %5179 }
 0x7ea   : > { %5200 = vst.msk [vmem:[#allocation4 + $0x20] sm:$0xff] %vm5195_vm1, %v5180_v62 }
 0x7ec   : > { %v4024_v33 = vpop.permute.xlu0 %4023 }
 0x7ed   : > { %4041 = vst.msk [vmem:[#allocation4 + $0x38] sm:$0xff] %vm4033_vm13, %v4024_v33 }
 0x7f0   : > { %v9256_v52 = vld [vmem:[#allocation4 + $0x28] sm:$0xff] }
 0x7f1   : > { %v9248_v38 = vld [vmem:[#allocation4 + $0x20] sm:$0xff]  ;;  %v5221_v47 = vsel %vm540_vm0, %v9256_v52, 0.0 }
 0x7f2   : > { %v5184_v16 = vpop.permute.xlu1 %5183  ;;  %v5219_v21 = vsel %vm540_vm0, %v9248_v38, 0.0 }
 0x7f3   : > { %5202 = vst.msk [vmem:[#allocation4 + $0x30] sm:$0xff] %vm5195_vm1, %v5184_v16  ;;  %v5220_v50 = vadd.f32 %v5219_v21, %v5218_v41  ;;  %v5822_v16 = vld [vmem:[%s9560_s18] ss:$0 sm:$0xff]  ;;  %v9561_v21 = vld [vmem:[#allocation18_spill] sm:$0xff] }
 0x7f4   : > { %v9562_v41 = vld [vmem:[#allocation17_spill] sm:$0xff] }
 0x7f5   : > { %v5222_v48 = vadd.f32 %v5221_v47, %v5220_v50 }
 0x7f6   : > { %v5186_v53 = vpop.permute.xlu1 %5185 }
 0x7f7   : > { %5203 = vst.msk [vmem:[#allocation4 + $0x38] sm:$0xff] %vm5195_vm1, %v5186_v53 }
 0x7fa   : > { %v9258_v26 = vld [vmem:[#allocation4 + $0x30] sm:$0xff] }
 0x7fb   : > { %v5223_v55 = vsel %vm540_vm0, %v9258_v26, 0.0 }
 0x7fc   : > { %v5224_v24 = vadd.f32 %v5223_v55, %v5222_v48  ;;  %v9565_v48 = vld [vmem:[#allocation20_spill] sm:$0xff] }
 0x7fe   : > { %v9264_v31 = vld [vmem:[#allocation4 + $0x38] sm:$0xff] }
 0x7ff   : > { %v5225_v9 = vsel %vm540_vm0, %v9264_v31, 0.0 }
 0x800   : > { %v5226_v36 = vadd.f32 %v5225_v9, %v5224_v24  ;;  %v9566_v24 = vld [vmem:[#allocation19_spill] sm:$0xff] }
 0x802   : > { %v5227_v46 = vrot.slane %v5226_v36, 4 }
 0x804   : > { %v5228_v54 = vadd.f32 %v5227_v46, %v5226_v36 }
 0x806   : > { %v5229_v60 = vrot.slane %v5228_v54, 2 }
 0x808   : > { %v5230_v22 = vadd.f32 %v5229_v60, %v5228_v54 }
 0x80a   : > { %v5231_v27 = vrot.slane %v5230_v22, 1 }
 0x80c   : > { %v5232_v8 = vadd.f32 %v5231_v27, %v5230_v22  ;;  %v9567_v22 = vld [vmem:[#allocation22_spill] sm:$0xff] }
 0x80e   : > { %v5233_v19 = vmul.f32 0.015625, %v5232_v8  ;;  %v9568_v8 = vld [vmem:[#allocation21_spill] sm:$0xff] }
 0x810   : > { %v5235_v11 = vmul.f32 %v5234_v6, %v5233_v19 }
 0x812   : > { %v5237_v59 = vsel %vm5236_vm3, %v5235_v11, 0.0 }
 0x813   : > { %5238 = vadd.xlane.f32.xlu0 %v5237_v59 }
 0x8a0   : > { %v5239_v12 = vpop.xlane.xlu0 %5238 }
 0x8a1   : > { %v5241_v39 = vadd.f32 %v5240_v29, %v5239_v12  ;;  %v9570_v12 = vld [vmem:[#allocation24_spill] sm:$0xff] }
 0x8a3   : > { %v5242_v17 = vmax.f32 %v5241_v39, 0.0 }
 0x8a5   : > { %5246 = vperm.xlu1 %6241, %v5242_v17   ;;  %v9572_v17 = vld [vmem:[#allocation23_spill] sm:$0xff] }
 0x924   : > { %v5247_v30 = vpop.permute.xlu1 %5246 }
 0x925   : > { %v5249_v2 = vmul.f32 %v5247_v30, %v5243_v4 }
 0x927   : > { %v5250_v37 = vsel %vm5236_vm3, %v5249_v2, 0.0 }
 0x928   : > { %v5251_v0 = vrot.slane %v5250_v37, 4 }
 0x92a   : > { %v5252_v58 = vadd.f32 %v5251_v0, %v5250_v37 }
 0x92c   : > { %v5253_v35 = vrot.slane %v5252_v58, 2 }
 0x92e   : > { %v5254_v28 = vadd.f32 %v5253_v35, %v5252_v58 }
 0x930   : > { %v5255_v15 = vrot.slane %v5254_v28, 1 }
 0x932   : > { %v5256_v20 = vadd.f32 %v5255_v15, %v5254_v28 }
 0x934   : > { %v5258_v49 = vadd.f32 %v5257_v7, %v5256_v20 }
 0x936   : > { %v5259_v42 = vsub.f32 0.0, %v5258_v49 }
 0x938   : > { %v5260_v61 = vmul.f32 1.442695, %v5259_v42 }
 0x93a   : > { %6242 = vpow2.f32 %v5260_v61 }
 0x944   : > { %v6243_v10 = vpop.eup %6242 }
 0x945   : > { %v5262_v45 = vadd.f32 1.0, %v6243_v10 }
 0x947   : > { %6244 = vrcp.f32 %v5262_v45 }
 0x951   : > { %v6245_v51 = vpop.eup %6244 }
 0x952   : > { %v5268_v62 = vrot.slane %v6245_v51, %v5267_v63 }
 0x954   : > { %v5269_v33 = vmul.f32 %v5268_v62, %v9233_v5  ;;  %v5270_v44 = vmul.f32 %v5268_v62, %v9235_v56  ;;  %v5271_v43 = vmul.f32 %v5268_v62, %v9237_v3  ;;  %v5272_v14 = vmul.f32 %v5268_v62, %v9246_v34 }
 0x955   : > { %v5273_v18 = vmul.f32 %v5268_v62, %v9248_v38  ;;  %v5274_v5 = vmul.f32 %v5268_v62, %v9256_v52  ;;  %v5275_v56 = vmul.f32 %v5268_v62, %v9258_v26  ;;  %v5276_v3 = vmul.f32 %v5268_v62, %v9264_v31 }
 0x956   : > { %6038 = vmatprep.mubr.msk.f32.mxu1 %vm540_vm0, %v5269_v33 }
 0x957   : > { %6039 = vmatmul.mubr.msk.f32.vlgmr.msra.gmra.mrb[16].mxu1 %vm540_vm0, %v5270_v44 }
 0x958   : > { %6041 = vmatprep.mubr.msk.f32.mxu1 %vm540_vm0, %v5271_v43 }
 0x95b   : > { %6042 = vmatmul.mubr.msk.f32.gmra.mrb[18].mxu1 %vm540_vm0, %v5272_v14 }
 0x95c   : > { %6044 = vmatprep.mubr.msk.f32.mxu1 %vm540_vm0, %v5273_v18 }
 0x95f   : > { %6045 = vmatmul.mubr.msk.f32.gmra.mrb[20].mxu1 %vm540_vm0, %v5274_v5 }
 0x960   : > { %6047 = vmatprep.mubr.msk.f32.mxu1 %vm540_vm0, %v5275_v56 }
 0x963   : > { %6048 = vmatmul.mubr.msk.f32.gmra.mrb[22].mxu1 %vm540_vm0, %v5276_v3 }
 0xa2a   : > { %v6040_v34 = vpop.f32.mrb[16].mxu1 }
 0xa2b   : > { %v5382_v38 = vadd.f32 %v6040_v34, %v5822_v16  ;;  %v5376_v57 = vpop.f32.mrb[17].mxu1 }
 0xa2c   : > { %v5377_v40 = vadd.f32 %v5822_v16, %v5376_v57 }
 0xa2d   : > { %v5416_v53 = vadd.f32 %v5382_v38, %v9561_v21 }
 0xa2e   : > { %v5415_v52 = vadd.f32 %v5377_v40, %v9562_v41  ;;  %v6043_v50 = vpop.f32.mrb[18].mxu1 }
 0xa2f   : > { %5424 = vst.msk [vmem:[%s539_s21 + $0x8] sm:$0xff] %vm540_vm0, %v5416_v53  ;;  %v5392_v26 = vadd.f32 %v6043_v50, %v5822_v16  ;;  %v5386_v47 = vpop.f32.mrb[19].mxu1 }
 0xa30   : > { %5423 = vst.msk [vmem:[%s539_s21] sm:$0xff] %vm540_vm0, %v5415_v52  ;;  %v5387_v55 = vadd.f32 %v5822_v16, %v5386_v47 }
 0xa31   : > { %v5418_v31 = vadd.f32 %v5392_v26, %v9565_v48 }
 0xa32   : > { %v5417_v9 = vadd.f32 %v5387_v55, %v9566_v24  ;;  %v6046_v36 = vpop.f32.mrb[20].mxu1 }
 0xa33   : > { %5426 = vst.msk [vmem:[%s539_s21 + $0x18] sm:$0xff] %vm540_vm0, %v5418_v31  ;;  %v5402_v46 = vadd.f32 %v6046_v36, %v5822_v16  ;;  %v5396_v54 = vpop.f32.mrb[21].mxu1 }
 0xa34   : > { %5425 = vst.msk [vmem:[%s539_s21 + $0x10] sm:$0xff] %vm540_vm0, %v5417_v9  ;;  %v5397_v60 = vadd.f32 %v5822_v16, %v5396_v54 }
 0xa35   : > { %v5420_v27 = vadd.f32 %v5402_v46, %v9567_v22 }
 0xa36   : > { %v5419_v6 = vadd.f32 %v5397_v60, %v9568_v8  ;;  %v6049_v19 = vpop.f32.mrb[22].mxu1 }
 0xa37   : > { %5428 = vst.msk [vmem:[%s539_s21 + $0x28] sm:$0xff] %vm540_vm0, %v5420_v27  ;;  %v5412_v11 = vadd.f32 %v6049_v19, %v5822_v16  ;;  %v5406_v59 = vpop.f32.mrb[23].mxu1 }
 0xa38   : > { %5427 = vst.msk [vmem:[%s539_s21 + $0x20] sm:$0xff] %vm540_vm0, %v5419_v6  ;;  %v5407_v29 = vadd.f32 %v5822_v16, %v5406_v59 }
 0xa39   : > { %v5422_v39 = vadd.f32 %v5412_v11, %v9570_v12 }
 0xa3a   : > { %v5421_v1 = vadd.f32 %v5407_v29, %v9572_v17 }
 0xa3b   : > { %5430 = vst.msk [vmem:[%s539_s21 + $0x38] sm:$0xff] %vm540_vm0, %v5422_v39 }
 0xa3c   : > { %5429 = vst.msk [vmem:[%s539_s21 + $0x30] sm:$0xff] %vm540_vm0, %v5421_v1 }
 0xa3d   : > { %6289 = shalt.err (!%p6286_p2)
}
 0xa3e   : > { %s6290_s18 = scalar_lea.hbm %s9326_s0, 1024  ;;  %s6294_s29 = scalar_lea.hbm %s9571_s26, 2048 }
 0xa3f   : > { %p6291_p4 = scmp.ne.s32.totalorder %s9326_s0, %s6290_s18  ;;  %p6295_p9 = scmp.lt.u32.totalorder %s9326_s0, %s9571_s26 }
 0xa40   : > { %p6296_p1 = scmp.lt.u32.totalorder %s6294_s29, %s6290_s18  ;;  %p6298_p6 = scmp.lt.u32.totalorder %s6290_s18, %s9326_s0 }
 0xa41   : > { %p6292_p5 = pnand %p6291_p4, %p9573_p11 }
 0xa42   : > { %p6297_p3 = por %p6296_p1, %p6295_p9 }
 0xa43   : > { %p6293_p7 = pneg %p6292_p5 }
 0xa44   : > { %p6299_p12 = por %p6298_p6, %p6297_p3 }
 0xa46   : > { %p6300_p13 = pnand %p6299_p12, %p6293_p7 }
 0xa48   : > { %6303 = shalt.err (!%p6300_p13)
}
 0xa49   : > { %s6368_s30 = smov 128  }
 0xa4a   : > { %6173 = dma.vmem_to_hbm [thread:$0]  (%p9573_p11), %s9329_s3, 1024, %s9326_s0, %s5432_s17, %s6368_s30, %s6368_s30, %s9506_s23  }
 0xa4b PF: > { %s9574_s5 = sld [smem:[#allocation11_spill]]  ;;  %p9575_p8 = scmp.ne.s32.totalorder %s9457_s19, 0 }
 0xa4c   : > { %p9576_p10 = scmp.ge.s32.totalorder %s6342_s24, 2 }
 0xa4e   : > { %p6180_p0 = pnand %p9576_p10, %p9575_p8 }
 0xa51   : > { %s5460_s6 = sand.u32 1, %s9574_s5  }
 0xa52   : > { %s5461_s20 = scalar_lea.sflag [#allocation7], %s5460_s6 }
 0xa53   : > { %6325 = dma.done.wait (!%p6180_p0), %s5461_s20, 1024  }
 0xa54   : > { %6327 = vsyncadd (!%p6180_p0), %s5461_s20, 4294966272  ;;  %s9577_s24 = sld [smem:[#allocation14_spill]]  ;;  %s9578_s15 = sld [smem:[#allocation12_spill]] }
 0xa55   : > { %s9579_s23 = sld [smem:[#allocation15_spill]]  ;;  %s9580_s21 = smov %s6334_s22 }
 0xa5a   : > { %p29_p2 = scmp.ge.s32.totalorder %s9577_s24, 4   ;;  %s9581_s22 = smov %s9578_s15 }
 0xa5c   :  { %31 = sbr.rel (!%p29_p2) target bundleno = 14 (0xe), region = 137 }
 0xa63   :  { %5466 = vsyncpa [#allocation6], 1 }
 0xa64   :  { %5468 = vsyncpa [#allocation6 + $0x1], 1 }
 0xa65   :  { %5469 = vsyncpa [#allocation7], 1 }
 0xa66   :  { %5471 = vsyncpa [#allocation7 + $0x1], 1 }

</bundles_post_ra>
